<compile_context>
chip_gen: v7x
topology: tpu7x:2x2x1
jax: 0.10.0
libtpu: 0.0.40
codegen_flags: <defaults>
</compile_context>

<pallas_src>
import numpy as np
import jax
import jax.numpy as jnp
from jax.experimental import pallas as pl
from jax.experimental.pallas import tpu as pltpu

# ----------------------------- model hyper-parameters -----------------------------
DTYPE       = jnp.float32
BATCH       = 2
IMG_C       = 3
IMG_HW      = 16
PATCH       = 8
GRID_HW     = IMG_HW // PATCH                 # 2
NUM_PATCHES = GRID_HW * GRID_HW               # 4
SEQ_V       = NUM_PATCHES + 1                 # 5 (cls + patches)
VIS_WIDTH   = 64
VIS_HEADS   = 2
EMBED_DIM   = 512                             # adapters are Linear(512, 512)
VOCAB       = 64
TXT_WIDTH   = 64
TXT_HEADS   = 2
NCTX        = 4                               # soft-prompt context tokens
NUM_CLASSES = 3
CTX_LEN     = 1 + NCTX + 3                    # [SOS] ctx*4 [name] [.] [EOT]  = 8
PATCH_DIM   = IMG_C * PATCH * PATCH           # 192

SOS_TOK, EOT_TOK, X_TOK, PERIOD_TOK = 62, 63, 1, 5
_NPTOK = np.array(
    [[SOS_TOK] + [X_TOK] * NCTX + [10 + c, PERIOD_TOK, EOT_TOK] for c in range(NUM_CLASSES)],
    dtype=np.int32,
)                                             # (NUM_CLASSES, CTX_LEN); argmax == EOT position
PROMPT_TOKEN_IDS = jnp.asarray(_NPTOK)

# ------------------- constant selection / mask matrices (built once) -------------------
_ps = np.zeros((BATCH * SEQ_V, BATCH * NUM_PATCHES), np.float32)   # patch -> token-row scatter
_cs = np.zeros((BATCH, BATCH * SEQ_V), np.float32)                 # class-token row selector
for _b in range(BATCH):
    _cs[_b, _b * SEQ_V] = 1.0
    for _s in range(NUM_PATCHES):
        _ps[_b * SEQ_V + 1 + _s, _b * NUM_PATCHES + _s] = 1.0
PATCH_SCATTER = jnp.asarray(_ps)
CLS_SEL       = jnp.asarray(_cs)

# EOT-token selector (argmax over token ids, like CLIP: EOT has the largest id).
_eot = _NPTOK.argmax(axis=-1)
_es = np.zeros((NUM_CLASSES, NUM_CLASSES * CTX_LEN), np.float32)
for _c in range(NUM_CLASSES):
    _es[_c, _c * CTX_LEN + _eot[_c]] = 1.0
EOT_SEL = jnp.asarray(_es)


def _block_diag_mask(nblocks, seq, causal):
    """Additive mask over the fused (nblocks*seq) token axis: -1e9 across blocks,
    0 (or causal) within a block."""
    n = nblocks * seq
    m = np.full((n, n), -1e9, np.float32)
    blk = np.zeros((seq, seq), np.float32)
    if causal:
        blk = np.where(np.arange(seq)[None, :] <= np.arange(seq)[:, None], 0.0, -1e9
                       ).astype(np.float32)
    for b in range(nblocks):
        m[b * seq:(b + 1) * seq, b * seq:(b + 1) * seq] = blk
    return jnp.asarray(m)

VIS_MASK = _block_diag_mask(BATCH, SEQ_V, causal=False)          # (10, 10)
TXT_MASK = _block_diag_mask(NUM_CLASSES, CTX_LEN, causal=True)   # (24, 24)

# ----------------------------- slab layouts (static) -----------------------------

def _round8(n):
    return (n + 7) // 8 * 8


def _make_layout(items):
    layout, off = {}, 0
    for name, rows, cols in items:
        layout[name] = (off, rows, cols)
        off += _round8(rows)
    return layout, off


def _block_items64(p, W):
    return [
        (p + 'ln1_g', 1, W), (p + 'ln1_b', 1, W),
        (p + 'q_b', 1, W), (p + 'k_b', 1, W), (p + 'v_b', 1, W),
        (p + 'wo', W, W), (p + 'out_b', 1, W),
        (p + 'ln2_g', 1, W), (p + 'ln2_b', 1, W),
        (p + 'mlp_w2', 4 * W, W), (p + 'mlp_b2', 1, W),
    ]


def _block_items256(p, W):
    return [
        (p + 'qkv_w', W, 3 * W),
        (p + 'mlp_w1', W, 4 * W),
        (p + 'mlp_b1', 1, 4 * W),
    ]


S64_ITEMS = (
    [('conv_w', PATCH_DIM, VIS_WIDTH),
     ('patch_scatter', BATCH * SEQ_V, BATCH * NUM_PATCHES),
     ('vis_base', BATCH * SEQ_V, VIS_WIDTH),
     ('vis_mask', BATCH * SEQ_V, BATCH * SEQ_V),
     ('ln_pre_g', 1, VIS_WIDTH), ('ln_pre_b', 1, VIS_WIDTH)]
    + _block_items64('vis_', VIS_WIDTH)
    + [('cls_sel', BATCH, BATCH * SEQ_V),
       ('ln_post_g', 1, VIS_WIDTH), ('ln_post_b', 1, VIS_WIDTH),
       ('txt_base', NUM_CLASSES * CTX_LEN, TXT_WIDTH),
       ('txt_mask', NUM_CLASSES * CTX_LEN, NUM_CLASSES * CTX_LEN)]
    + _block_items64('txt_', TXT_WIDTH)
    + [('eot_sel', NUM_CLASSES, NUM_CLASSES * CTX_LEN),
       ('ln_final_g', 1, TXT_WIDTH), ('ln_final_b', 1, TXT_WIDTH),
       ('logit_scale', 1, 1)]
)
S256_ITEMS = _block_items256('vis_', VIS_WIDTH) + _block_items256('txt_', TXT_WIDTH)
S512_ITEMS = [('vis_proj', VIS_WIDTH, EMBED_DIM), ('vad_b', 1, EMBED_DIM),
              ('txt_proj', TXT_WIDTH, EMBED_DIM), ('tad_b', 1, EMBED_DIM)]

S64_LAYOUT,  S64_ROWS  = _make_layout(S64_ITEMS)
S256_LAYOUT, S256_ROWS = _make_layout(S256_ITEMS)
S512_LAYOUT, S512_ROWS = _make_layout(S512_ITEMS)


def _pack_slab(layout, total_rows, width, values):
    assert set(layout) <= set(values), sorted(set(layout) - set(values))
    slab = jnp.zeros((total_rows, width), DTYPE)
    for name, (off, r, c) in layout.items():
        slab = slab.at[off:off + r, 0:c].set(values[name].astype(DTYPE).reshape(r, c))
    return slab


def _getter(ref, layout):
    def get(name):
        off, r, c = layout[name]
        return ref[off:off + r, 0:c]
    return get

# ----------------------------- in-kernel helpers (operate on values) -----------------------------

def _layernorm(x, g, b):
    mu = jnp.mean(x, axis=-1, keepdims=True)
    xc = x - mu
    var = jnp.mean(xc * xc, axis=-1, keepdims=True)
    return xc * jax.lax.rsqrt(var + 1e-5) * g + b


def _mlp(x, w1, b1, w2, b2):
    h = jnp.dot(x, w1, preferred_element_type=jnp.float32) + b1
    h = h * jax.nn.sigmoid(1.702 * h)                 # QuickGELU (as in CLIP)
    return jnp.dot(h, w2, preferred_element_type=jnp.float32) + b2


def _attention(x_ln, qkv_w, q_b, k_b, v_b, wo, out_b, mask, heads):
    """x_ln: (N, D).  qkv_w: (D, 3D) packed [q|k|v] with heads contiguous inside each D slice.
    mask: additive (N, N) block-diagonal (+causal for text).  One lane-dense QKV matmul,
    per-head scores on the fused token axis, lane-concat head merge, single out-proj."""
    f32 = jnp.float32
    N, D = x_ln.shape
    dh = D // heads
    scale = 1.0 / float(dh) ** 0.5

    qkv = jnp.dot(x_ln, qkv_w, preferred_element_type=f32)          # (N, 3D)
    q = qkv[:, 0:D] + q_b
    k = qkv[:, D:2 * D] + k_b
    v = qkv[:, 2 * D:3 * D] + v_b

    outs = []
    for h in range(heads):                                          # static unroll (2)
        sl = slice(h * dh, (h + 1) * dh)
        qh, kh, vh = q[:, sl], k[:, sl], v[:, sl]
        s = jax.lax.dot_general(qh, kh, (((1,), (1,)), ((), ())),
                                preferred_element_type=f32) * scale  # (N, N)
        s = s + mask
        s = s - jnp.max(s, axis=-1, keepdims=True)
        p = jnp.exp(s)
        p = p * pl.reciprocal(jnp.sum(p, axis=-1, keepdims=True), approx=False)
        outs.append(jnp.dot(p, vh, preferred_element_type=f32))      # (N, dh)
    o = jnp.concatenate(outs, axis=-1)                               # (N, D) head merge on lanes
    return jnp.dot(o, wo, preferred_element_type=f32) + out_b


def _residual_block(x, p, g64, g256, mask, heads):
    h = _layernorm(x, g64(p + 'ln1_g'), g64(p + 'ln1_b'))
    x = x + _attention(h, g256(p + 'qkv_w'), g64(p + 'q_b'), g64(p + 'k_b'), g64(p + 'v_b'),
                       g64(p + 'wo'), g64(p + 'out_b'), mask, heads)
    h = _layernorm(x, g64(p + 'ln2_g'), g64(p + 'ln2_b'))
    x = x + _mlp(h, g256(p + 'mlp_w1'), g256(p + 'mlp_b1'),
                 g64(p + 'mlp_w2'), g64(p + 'mlp_b2'))
    return x

# ----------------------------- fused kernel body -----------------------------

def _kernel(patches_ref, s64_ref, s256_ref, s512_ref, out_ref):
    f32 = jnp.float32
    g64  = _getter(s64_ref,  S64_LAYOUT)
    g256 = _getter(s256_ref, S256_LAYOUT)
    g512 = _getter(s512_ref, S512_LAYOUT)

    # ----- visual encoder (ViT) -----
    patch_emb = jnp.dot(patches_ref[...], g64('conv_w'), preferred_element_type=f32)  # (B*NP, VW)
    xv = jnp.dot(g64('patch_scatter'), patch_emb, preferred_element_type=f32) \
        + g64('vis_base')                                                              # (B*SEQ_V, VW)
    xv = _layernorm(xv, g64('ln_pre_g'), g64('ln_pre_b'))
    xv = _residual_block(xv, 'vis_', g64, g256, g64('vis_mask'), VIS_HEADS)
    xcls = jnp.dot(g64('cls_sel'), xv, preferred_element_type=f32)                     # (B, VW)
    xcls = _layernorm(xcls, g64('ln_post_g'), g64('ln_post_b'))
    img = jnp.dot(xcls, g512('vis_proj'), preferred_element_type=f32) + g512('vad_b')  # proj+adapter

    # ----- text encoder over soft prompts -----
    xt = g64('txt_base')                                                               # (C*L, TW)
    xt = _residual_block(xt, 'txt_', g64, g256, g64('txt_mask'), TXT_HEADS)
    xt = _layernorm(xt, g64('ln_final_g'), g64('ln_final_b'))
    xeot = jnp.dot(g64('eot_sel'), xt, preferred_element_type=f32)                     # (C, TW)
    txt = jnp.dot(xeot, g512('txt_proj'), preferred_element_type=f32) + g512('tad_b')  # proj+adapter

    # ----- cosine-similarity logits -----
    img_n = img * jax.lax.rsqrt(jnp.sum(img * img, axis=-1, keepdims=True))
    txt_n = txt * jax.lax.rsqrt(jnp.sum(txt * txt, axis=-1, keepdims=True))
    sim = jax.lax.dot_general(img_n, txt_n, (((1,), (1,)), ((), ())),
                              preferred_element_type=f32)                              # (B, C)
    out_ref[...] = (g64('logit_scale') * sim).astype(out_ref.dtype)

# ----------------------------- input preparation (XLA glue, inside jit) -----------------------------

def _build_soft_prompt(P):
    emb = P['tok_emb'][PROMPT_TOKEN_IDS]                          # (C, L, TW) embedding gather
    prefix = emb[:, :1, :]
    suffix = emb[:, 1 + NCTX:, :]
    ctx = jnp.broadcast_to(P['ctx'][None], (NUM_CLASSES, NCTX, TXT_WIDTH))
    sp = jnp.concatenate([prefix, ctx, suffix], axis=1)
    return sp.reshape(NUM_CLASSES * CTX_LEN, TXT_WIDTH).astype(DTYPE)


def _block_vals64(p, bp, W):
    b = bp['attn_in_b']
    return {
        p + 'ln1_g': bp['ln1_g'], p + 'ln1_b': bp['ln1_b'],
        p + 'q_b': b[0:W], p + 'k_b': b[W:2 * W], p + 'v_b': b[2 * W:3 * W],
        p + 'wo': bp['attn_out_w'], p + 'out_b': bp['attn_out_b'],
        p + 'ln2_g': bp['ln2_g'], p + 'ln2_b': bp['ln2_b'],
        p + 'mlp_w2': bp['mlp_w2'], p + 'mlp_b2': bp['mlp_b2'],
    }


def _block_vals256(p, bp):
    return {p + 'qkv_w': bp['attn_in_w'], p + 'mlp_w1': bp['mlp_w1'], p + 'mlp_b1': bp['mlp_b1']}


def _build_inputs(image, P):
    B = BATCH
    # NCHW -> (B*num_patches, C*p*p) patchify (stride==kernel conv becomes a matmul).
    patches = image.astype(DTYPE).reshape(B, IMG_C, GRID_HW, PATCH, GRID_HW, PATCH)
    patches = patches.transpose(0, 2, 4, 1, 3, 5).reshape(B * NUM_PATCHES, PATCH_DIM)
    conv_w = P['conv1_w'].reshape(VIS_WIDTH, PATCH_DIM).T          # conv (bias=False) as matmul

    # Additive base for the visual token rows: class-token + positional, tiled over batch.
    cls_rows = jnp.concatenate(
        [P['class_emb'].reshape(1, VIS_WIDTH), jnp.zeros((NUM_PATCHES, VIS_WIDTH), DTYPE)], axis=0)
    vis_base = jnp.tile(cls_rows + P['vis_pos'], (B, 1))           # (B*SEQ_V, VW)

    txt_base = _build_soft_prompt(P) + jnp.tile(P['pos_emb'], (NUM_CLASSES, 1))   # (C*L, TW)

    # Adapter fold: projections are bias-free and the adapters follow immediately (exact).
    vis_proj_fused = jnp.dot(P['vis_proj'], P['vad_w'])            # (VW, 512)
    txt_proj_fused = jnp.dot(P['text_proj'], P['tad_w'])           # (TW, 512)

    v64 = {
        'conv_w': conv_w, 'patch_scatter': PATCH_SCATTER, 'vis_base': vis_base, 'vis_mask': VIS_MASK,
        'ln_pre_g': P['ln_pre_g'], 'ln_pre_b': P['ln_pre_b'],
        'cls_sel': CLS_SEL, 'ln_post_g': P['ln_post_g'], 'ln_post_b': P['ln_post_b'],
        'txt_base': txt_base, 'txt_mask': TXT_MASK,
        'eot_sel': EOT_SEL, 'ln_final_g': P['ln_final_g'], 'ln_final_b': P['ln_final_b'],
        'logit_scale': jnp.exp(P['logit_scale']).reshape(1, 1),    # exp precomputed outside kernel
    }
    v64.update(_block_vals64('vis_', P['vis_block'], VIS_WIDTH))
    v64.update(_block_vals64('txt_', P['txt_block'], TXT_WIDTH))

    v256 = {}
    v256.update(_block_vals256('vis_', P['vis_block']))
    v256.update(_block_vals256('txt_', P['txt_block']))

    v512 = {'vis_proj': vis_proj_fused, 'vad_b': P['vad_b'],
            'txt_proj': txt_proj_fused, 'tad_b': P['tad_b']}

    return (patches,
            _pack_slab(S64_LAYOUT,  S64_ROWS,  VIS_WIDTH,     v64),
            _pack_slab(S256_LAYOUT, S256_ROWS, 4 * VIS_WIDTH, v256),
            _pack_slab(S512_LAYOUT, S512_ROWS, EMBED_DIM,     v512))

# ----------------------------- fused forward: one pallas_call, 4 inputs -----------------------------

def clip_with_soft_prompt(image, P):
    patches, s64, s256, s512 = _build_inputs(image, P)
    return pl.pallas_call(
        _kernel,
        out_shape=jax.ShapeDtypeStruct((BATCH, NUM_CLASSES), DTYPE),
        in_specs=[pl.BlockSpec(memory_space=pltpu.MemorySpace.VMEM)] * 4,
        out_specs=pl.BlockSpec(memory_space=pltpu.MemorySpace.VMEM),
    )(patches, s64, s256, s512)

# ----------------------------------- parameter init -----------------------------------

def init_params(key):
    keys = iter(jax.random.split(key, 64))

    def nrm(shape, std=0.02):
        return (std * jax.random.normal(next(keys), shape)).astype(DTYPE)

    def block_params(width):
        return dict(
            ln1_g=jnp.ones((width,), DTYPE), ln1_b=jnp.zeros((width,), DTYPE),
            attn_in_w=nrm((width, 3 * width)), attn_in_b=jnp.zeros((3 * width,), DTYPE),
            attn_out_w=nrm((width, width)), attn_out_b=jnp.zeros((width,), DTYPE),
            ln2_g=jnp.ones((width,), DTYPE), ln2_b=jnp.zeros((width,), DTYPE),
            mlp_w1=nrm((width, 4 * width)), mlp_b1=jnp.zeros((4 * width,), DTYPE),
            mlp_w2=nrm((4 * width, width)), mlp_b2=jnp.zeros((width,), DTYPE),
        )

    return dict(
        # visual encoder (ViT)
        conv1_w=nrm((VIS_WIDTH, IMG_C, PATCH, PATCH)),
        class_emb=nrm((VIS_WIDTH,)),
        vis_pos=nrm((SEQ_V, VIS_WIDTH)),
        ln_pre_g=jnp.ones((VIS_WIDTH,), DTYPE), ln_pre_b=jnp.zeros((VIS_WIDTH,), DTYPE),
        vis_block=block_params(VIS_WIDTH),
        ln_post_g=jnp.ones((VIS_WIDTH,), DTYPE), ln_post_b=jnp.zeros((VIS_WIDTH,), DTYPE),
        vis_proj=nrm((VIS_WIDTH, EMBED_DIM)),
        # text encoder
        tok_emb=nrm((VOCAB, TXT_WIDTH)),
        pos_emb=nrm((CTX_LEN, TXT_WIDTH)),
        txt_block=block_params(TXT_WIDTH),
        ln_final_g=jnp.ones((TXT_WIDTH,), DTYPE), ln_final_b=jnp.zeros((TXT_WIDTH,), DTYPE),
        text_proj=nrm((TXT_WIDTH, EMBED_DIM)),
        # soft prompt (CoOp context vectors, normal(0, 0.02))
        ctx=nrm((NCTX, TXT_WIDTH)),
        # adapters (Linear(512, 512))
        vad_w=nrm((EMBED_DIM, EMBED_DIM)), vad_b=jnp.zeros((EMBED_DIM,), DTYPE),
        tad_w=nrm((EMBED_DIM, EMBED_DIM)), tad_b=jnp.zeros((EMBED_DIM,), DTYPE),
        logit_scale=jnp.full((1, 1), jnp.log(1.0 / 0.07), dtype=jnp.float32),
    )

# ----------------------------------- main -----------------------------------

if __name__ == "__main__":
    # TODO(synk): the original tokenizer_fn / pretrained CLIP weights are replaced by
    # deterministic synthetic token ids and random parameters (no checkpoint load).
    key = jax.random.PRNGKey(0)
    pkey, ikey = jax.random.split(key)
    params = init_params(pkey)
    image = jax.random.normal(ikey, (BATCH, IMG_C, IMG_HW, IMG_HW), dtype=jnp.float32)

    logits = jax.jit(clip_with_soft_prompt)(image, params)
    jax.block_until_ready(logits)

    assert logits.shape == (BATCH, NUM_CLASSES), logits.shape
    assert bool(jnp.all(jnp.isfinite(logits)))
    print("KERNEL_OK")
</pallas_src>

<mosaic_0001>
module attributes {stable_mosaic.version = 11 : i64} {
  func.func @_kernel(%arg0: memref<8x192xf32, #tpu.memory_space<vmem>>, %arg1: memref<1144x64xf32, #tpu.memory_space<vmem>>, %arg2: memref<272x256xf32, #tpu.memory_space<vmem>>, %arg3: memref<144x512xf32, #tpu.memory_space<vmem>>, %arg4: memref<2x3xf32, #tpu.memory_space<vmem>>) attributes {dimension_semantics = [], scalar_prefetch = 0 : i64, scratch_operands = 0 : i64, tpu.core_type = #tpu.core_type<tc>} {
    %c0 = arith.constant 0 : index
    %c0_0 = arith.constant 0 : index
    %0 = vector.load %arg0[%c0, %c0_0] : memref<8x192xf32, #tpu.memory_space<vmem>>, vector<8x192xf32>
    %c0_1 = arith.constant 0 : index
    %c0_2 = arith.constant 0 : index
    %1 = vector.load %arg1[%c0_1, %c0_2] : memref<1144x64xf32, #tpu.memory_space<vmem>>, vector<192x64xf32>
    %cst = arith.constant dense<0.000000e+00> : vector<8x64xf32>
    %2 = tpu.matmul %0, %1, %cst {dimension_numbers = #tpu.dot_dimension_numbers<[1], [0], [0], [1], [0, 0, 1, 1], [], []>} : vector<8x192xf32>, vector<192x64xf32>, vector<8x64xf32> -> vector<8x64xf32>
    %c192 = arith.constant 192 : index
    %c0_3 = arith.constant 0 : index
    %3 = vector.load %arg1[%c192, %c0_3] : memref<1144x64xf32, #tpu.memory_space<vmem>>, vector<10x8xf32>
    %cst_4 = arith.constant dense<0.000000e+00> : vector<10x64xf32>
    %4 = tpu.matmul %3, %2, %cst_4 {dimension_numbers = #tpu.dot_dimension_numbers<[1], [0], [0], [1], [0, 0, 1, 1], [], []>} : vector<10x8xf32>, vector<8x64xf32>, vector<10x64xf32> -> vector<10x64xf32>
    %c208 = arith.constant 208 : index
    %c0_5 = arith.constant 0 : index
    %5 = vector.load %arg1[%c208, %c0_5] : memref<1144x64xf32, #tpu.memory_space<vmem>>, vector<10x64xf32>
    %6 = arith.addf %4, %5 : vector<10x64xf32>
    %c240 = arith.constant 240 : index
    %c0_6 = arith.constant 0 : index
    %7 = vector.load %arg1[%c240, %c0_6] : memref<1144x64xf32, #tpu.memory_space<vmem>>, vector<1x64xf32>
    %c248 = arith.constant 248 : index
    %c0_7 = arith.constant 0 : index
    %8 = vector.load %arg1[%c248, %c0_7] : memref<1144x64xf32, #tpu.memory_space<vmem>>, vector<1x64xf32>
    %cst_8 = arith.constant dense<0.000000e+00> : vector<10xf32>
    %9 = vector.multi_reduction <add>, %6, %cst_8 [1] : vector<10x64xf32> to vector<10xf32>
    %10 = vector.shape_cast %9 : vector<10xf32> to vector<10x1xf32>
    %cst_9 = arith.constant 6.400000e+01 : f32
    %11 = vector.broadcast %cst_9 : f32 to vector<10x1xf32>
    %12 = arith.divf %10, %11 : vector<10x1xf32>
    %13 = vector.broadcast %12 : vector<10x1xf32> to vector<10x64xf32>
    %14 = arith.subf %6, %13 : vector<10x64xf32>
    %15 = arith.mulf %14, %14 : vector<10x64xf32>
    %cst_10 = arith.constant dense<0.000000e+00> : vector<10xf32>
    %16 = vector.multi_reduction <add>, %15, %cst_10 [1] : vector<10x64xf32> to vector<10xf32>
    %17 = vector.shape_cast %16 : vector<10xf32> to vector<10x1xf32>
    %cst_11 = arith.constant 6.400000e+01 : f32
    %18 = vector.broadcast %cst_11 : f32 to vector<10x1xf32>
    %19 = arith.divf %17, %18 : vector<10x1xf32>
    %cst_12 = arith.constant 9.99999974E-6 : f32
    %20 = vector.broadcast %cst_12 : f32 to vector<10x1xf32>
    %21 = arith.addf %19, %20 : vector<10x1xf32>
    %22 = math.rsqrt %21 : vector<10x1xf32>
    %23 = vector.broadcast %22 : vector<10x1xf32> to vector<10x64xf32>
    %24 = arith.mulf %14, %23 : vector<10x64xf32>
    %25 = vector.broadcast %7 : vector<1x64xf32> to vector<10x64xf32>
    %26 = arith.mulf %24, %25 : vector<10x64xf32>
    %27 = vector.broadcast %8 : vector<1x64xf32> to vector<10x64xf32>
    %28 = arith.addf %26, %27 : vector<10x64xf32>
    %c224 = arith.constant 224 : index
    %c0_13 = arith.constant 0 : index
    %29 = vector.load %arg1[%c224, %c0_13] : memref<1144x64xf32, #tpu.memory_space<vmem>>, vector<10x10xf32>
    %c256 = arith.constant 256 : index
    %c0_14 = arith.constant 0 : index
    %30 = vector.load %arg1[%c256, %c0_14] : memref<1144x64xf32, #tpu.memory_space<vmem>>, vector<1x64xf32>
    %c264 = arith.constant 264 : index
    %c0_15 = arith.constant 0 : index
    %31 = vector.load %arg1[%c264, %c0_15] : memref<1144x64xf32, #tpu.memory_space<vmem>>, vector<1x64xf32>
    %cst_16 = arith.constant dense<0.000000e+00> : vector<10xf32>
    %32 = vector.multi_reduction <add>, %28, %cst_16 [1] : vector<10x64xf32> to vector<10xf32>
    %33 = vector.shape_cast %32 : vector<10xf32> to vector<10x1xf32>
    %cst_17 = arith.constant 6.400000e+01 : f32
    %34 = vector.broadcast %cst_17 : f32 to vector<10x1xf32>
    %35 = arith.divf %33, %34 : vector<10x1xf32>
    %36 = vector.broadcast %35 : vector<10x1xf32> to vector<10x64xf32>
    %37 = arith.subf %28, %36 : vector<10x64xf32>
    %38 = arith.mulf %37, %37 : vector<10x64xf32>
    %cst_18 = arith.constant dense<0.000000e+00> : vector<10xf32>
    %39 = vector.multi_reduction <add>, %38, %cst_18 [1] : vector<10x64xf32> to vector<10xf32>
    %40 = vector.shape_cast %39 : vector<10xf32> to vector<10x1xf32>
    %cst_19 = arith.constant 6.400000e+01 : f32
    %41 = vector.broadcast %cst_19 : f32 to vector<10x1xf32>
    %42 = arith.divf %40, %41 : vector<10x1xf32>
    %cst_20 = arith.constant 9.99999974E-6 : f32
    %43 = vector.broadcast %cst_20 : f32 to vector<10x1xf32>
    %44 = arith.addf %42, %43 : vector<10x1xf32>
    %45 = math.rsqrt %44 : vector<10x1xf32>
    %46 = vector.broadcast %45 : vector<10x1xf32> to vector<10x64xf32>
    %47 = arith.mulf %37, %46 : vector<10x64xf32>
    %48 = vector.broadcast %30 : vector<1x64xf32> to vector<10x64xf32>
    %49 = arith.mulf %47, %48 : vector<10x64xf32>
    %50 = vector.broadcast %31 : vector<1x64xf32> to vector<10x64xf32>
    %51 = arith.addf %49, %50 : vector<10x64xf32>
    %c0_21 = arith.constant 0 : index
    %c0_22 = arith.constant 0 : index
    %52 = vector.load %arg2[%c0_21, %c0_22] : memref<272x256xf32, #tpu.memory_space<vmem>>, vector<64x192xf32>
    %c272 = arith.constant 272 : index
    %c0_23 = arith.constant 0 : index
    %53 = vector.load %arg1[%c272, %c0_23] : memref<1144x64xf32, #tpu.memory_space<vmem>>, vector<1x64xf32>
    %c280 = arith.constant 280 : index
    %c0_24 = arith.constant 0 : index
    %54 = vector.load %arg1[%c280, %c0_24] : memref<1144x64xf32, #tpu.memory_space<vmem>>, vector<1x64xf32>
    %c288 = arith.constant 288 : index
    %c0_25 = arith.constant 0 : index
    %55 = vector.load %arg1[%c288, %c0_25] : memref<1144x64xf32, #tpu.memory_space<vmem>>, vector<1x64xf32>
    %c296 = arith.constant 296 : index
    %c0_26 = arith.constant 0 : index
    %56 = vector.load %arg1[%c296, %c0_26] : memref<1144x64xf32, #tpu.memory_space<vmem>>, vector<64x64xf32>
    %c360 = arith.constant 360 : index
    %c0_27 = arith.constant 0 : index
    %57 = vector.load %arg1[%c360, %c0_27] : memref<1144x64xf32, #tpu.memory_space<vmem>>, vector<1x64xf32>
    %cst_28 = arith.constant dense<0.000000e+00> : vector<10x192xf32>
    %58 = tpu.matmul %51, %52, %cst_28 {dimension_numbers = #tpu.dot_dimension_numbers<[1], [0], [0], [1], [0, 0, 1, 1], [], []>} : vector<10x64xf32>, vector<64x192xf32>, vector<10x192xf32> -> vector<10x192xf32>
    %59 = vector.extract_strided_slice %58 {offsets = [0, 0], sizes = [10, 64], strides = [1, 1]} : vector<10x192xf32> to vector<10x64xf32>
    %60 = vector.broadcast %53 : vector<1x64xf32> to vector<10x64xf32>
    %61 = arith.addf %59, %60 : vector<10x64xf32>
    %62 = vector.extract_strided_slice %58 {offsets = [0, 64], sizes = [10, 64], strides = [1, 1]} : vector<10x192xf32> to vector<10x64xf32>
    %63 = vector.broadcast %54 : vector<1x64xf32> to vector<10x64xf32>
    %64 = arith.addf %62, %63 : vector<10x64xf32>
    %65 = vector.extract_strided_slice %58 {offsets = [0, 128], sizes = [10, 64], strides = [1, 1]} : vector<10x192xf32> to vector<10x64xf32>
    %66 = vector.broadcast %55 : vector<1x64xf32> to vector<10x64xf32>
    %67 = arith.addf %65, %66 : vector<10x64xf32>
    %68 = vector.extract_strided_slice %61 {offsets = [0, 0], sizes = [10, 32], strides = [1, 1]} : vector<10x64xf32> to vector<10x32xf32>
    %69 = vector.extract_strided_slice %64 {offsets = [0, 0], sizes = [10, 32], strides = [1, 1]} : vector<10x64xf32> to vector<10x32xf32>
    %70 = vector.extract_strided_slice %67 {offsets = [0, 0], sizes = [10, 32], strides = [1, 1]} : vector<10x64xf32> to vector<10x32xf32>
    %cst_29 = arith.constant dense<0.000000e+00> : vector<10x10xf32>
    %71 = tpu.matmul %68, %69, %cst_29 {dimension_numbers = #tpu.dot_dimension_numbers<[1], [1], [0], [0], [0, 0, 1, 0], [], []>} : vector<10x32xf32>, vector<10x32xf32>, vector<10x10xf32> -> vector<10x10xf32>
    %cst_30 = arith.constant 0.176776692 : f32
    %72 = vector.broadcast %cst_30 : f32 to vector<10x10xf32>
    %73 = arith.mulf %71, %72 : vector<10x10xf32>
    %74 = arith.addf %73, %29 : vector<10x10xf32>
    %cst_31 = arith.constant dense<0xFF800000> : vector<10xf32>
    %75 = vector.multi_reduction <maximumf>, %74, %cst_31 [1] : vector<10x10xf32> to vector<10xf32>
    %76 = vector.shape_cast %75 : vector<10xf32> to vector<10x1xf32>
    %77 = vector.broadcast %76 : vector<10x1xf32> to vector<10x10xf32>
    %78 = arith.subf %74, %77 : vector<10x10xf32>
    %79 = math.exp %78 : vector<10x10xf32>
    %cst_32 = arith.constant dense<0.000000e+00> : vector<10xf32>
    %80 = vector.multi_reduction <add>, %79, %cst_32 [1] : vector<10x10xf32> to vector<10xf32>
    %81 = vector.shape_cast %80 : vector<10xf32> to vector<10x1xf32>
    %82 = tpu.reciprocal %81 : vector<10x1xf32> -> vector<10x1xf32>
    %83 = vector.broadcast %82 : vector<10x1xf32> to vector<10x10xf32>
    %84 = arith.mulf %79, %83 : vector<10x10xf32>
    %cst_33 = arith.constant dense<0.000000e+00> : vector<10x32xf32>
    %85 = tpu.matmul %84, %70, %cst_33 {dimension_numbers = #tpu.dot_dimension_numbers<[1], [0], [0], [1], [0, 0, 1, 1], [], []>} : vector<10x10xf32>, vector<10x32xf32>, vector<10x32xf32> -> vector<10x32xf32>
    %86 = vector.extract_strided_slice %61 {offsets = [0, 32], sizes = [10, 32], strides = [1, 1]} : vector<10x64xf32> to vector<10x32xf32>
    %87 = vector.extract_strided_slice %64 {offsets = [0, 32], sizes = [10, 32], strides = [1, 1]} : vector<10x64xf32> to vector<10x32xf32>
    %88 = vector.extract_strided_slice %67 {offsets = [0, 32], sizes = [10, 32], strides = [1, 1]} : vector<10x64xf32> to vector<10x32xf32>
    %cst_34 = arith.constant dense<0.000000e+00> : vector<10x10xf32>
    %89 = tpu.matmul %86, %87, %cst_34 {dimension_numbers = #tpu.dot_dimension_numbers<[1], [1], [0], [0], [0, 0, 1, 0], [], []>} : vector<10x32xf32>, vector<10x32xf32>, vector<10x10xf32> -> vector<10x10xf32>
    %cst_35 = arith.constant 0.176776692 : f32
    %90 = vector.broadcast %cst_35 : f32 to vector<10x10xf32>
    %91 = arith.mulf %89, %90 : vector<10x10xf32>
    %92 = arith.addf %91, %29 : vector<10x10xf32>
    %cst_36 = arith.constant dense<0xFF800000> : vector<10xf32>
    %93 = vector.multi_reduction <maximumf>, %92, %cst_36 [1] : vector<10x10xf32> to vector<10xf32>
    %94 = vector.shape_cast %93 : vector<10xf32> to vector<10x1xf32>
    %95 = vector.broadcast %94 : vector<10x1xf32> to vector<10x10xf32>
    %96 = arith.subf %92, %95 : vector<10x10xf32>
    %97 = math.exp %96 : vector<10x10xf32>
    %cst_37 = arith.constant dense<0.000000e+00> : vector<10xf32>
    %98 = vector.multi_reduction <add>, %97, %cst_37 [1] : vector<10x10xf32> to vector<10xf32>
    %99 = vector.shape_cast %98 : vector<10xf32> to vector<10x1xf32>
    %100 = tpu.reciprocal %99 : vector<10x1xf32> -> vector<10x1xf32>
    %101 = vector.broadcast %100 : vector<10x1xf32> to vector<10x10xf32>
    %102 = arith.mulf %97, %101 : vector<10x10xf32>
    %cst_38 = arith.constant dense<0.000000e+00> : vector<10x32xf32>
    %103 = tpu.matmul %102, %88, %cst_38 {dimension_numbers = #tpu.dot_dimension_numbers<[1], [0], [0], [1], [0, 0, 1, 1], [], []>} : vector<10x10xf32>, vector<10x32xf32>, vector<10x32xf32> -> vector<10x32xf32>
    %104 = tpu.concatenate %85, %103 in 1 : vector<10x32xf32>, vector<10x32xf32> -> vector<10x64xf32>
    %cst_39 = arith.constant dense<0.000000e+00> : vector<10x64xf32>
    %105 = tpu.matmul %104, %56, %cst_39 {dimension_numbers = #tpu.dot_dimension_numbers<[1], [0], [0], [1], [0, 0, 1, 1], [], []>} : vector<10x64xf32>, vector<64x64xf32>, vector<10x64xf32> -> vector<10x64xf32>
    %106 = vector.broadcast %57 : vector<1x64xf32> to vector<10x64xf32>
    %107 = arith.addf %105, %106 : vector<10x64xf32>
    %108 = arith.addf %28, %107 : vector<10x64xf32>
    %c368 = arith.constant 368 : index
    %c0_40 = arith.constant 0 : index
    %109 = vector.load %arg1[%c368, %c0_40] : memref<1144x64xf32, #tpu.memory_space<vmem>>, vector<1x64xf32>
    %c376 = arith.constant 376 : index
    %c0_41 = arith.constant 0 : index
    %110 = vector.load %arg1[%c376, %c0_41] : memref<1144x64xf32, #tpu.memory_space<vmem>>, vector<1x64xf32>
    %cst_42 = arith.constant dense<0.000000e+00> : vector<10xf32>
    %111 = vector.multi_reduction <add>, %108, %cst_42 [1] : vector<10x64xf32> to vector<10xf32>
    %112 = vector.shape_cast %111 : vector<10xf32> to vector<10x1xf32>
    %cst_43 = arith.constant 6.400000e+01 : f32
    %113 = vector.broadcast %cst_43 : f32 to vector<10x1xf32>
    %114 = arith.divf %112, %113 : vector<10x1xf32>
    %115 = vector.broadcast %114 : vector<10x1xf32> to vector<10x64xf32>
    %116 = arith.subf %108, %115 : vector<10x64xf32>
    %117 = arith.mulf %116, %116 : vector<10x64xf32>
    %cst_44 = arith.constant dense<0.000000e+00> : vector<10xf32>
    %118 = vector.multi_reduction <add>, %117, %cst_44 [1] : vector<10x64xf32> to vector<10xf32>
    %119 = vector.shape_cast %118 : vector<10xf32> to vector<10x1xf32>
    %cst_45 = arith.constant 6.400000e+01 : f32
    %120 = vector.broadcast %cst_45 : f32 to vector<10x1xf32>
    %121 = arith.divf %119, %120 : vector<10x1xf32>
    %cst_46 = arith.constant 9.99999974E-6 : f32
    %122 = vector.broadcast %cst_46 : f32 to vector<10x1xf32>
    %123 = arith.addf %121, %122 : vector<10x1xf32>
    %124 = math.rsqrt %123 : vector<10x1xf32>
    %125 = vector.broadcast %124 : vector<10x1xf32> to vector<10x64xf32>
    %126 = arith.mulf %116, %125 : vector<10x64xf32>
    %127 = vector.broadcast %109 : vector<1x64xf32> to vector<10x64xf32>
    %128 = arith.mulf %126, %127 : vector<10x64xf32>
    %129 = vector.broadcast %110 : vector<1x64xf32> to vector<10x64xf32>
    %130 = arith.addf %128, %129 : vector<10x64xf32>
    %c64 = arith.constant 64 : index
    %c0_47 = arith.constant 0 : index
    %131 = vector.load %arg2[%c64, %c0_47] : memref<272x256xf32, #tpu.memory_space<vmem>>, vector<64x256xf32>
    %c128 = arith.constant 128 : index
    %c0_48 = arith.constant 0 : index
    %132 = vector.load %arg2[%c128, %c0_48] : memref<272x256xf32, #tpu.memory_space<vmem>>, vector<1x256xf32>
    %c384 = arith.constant 384 : index
    %c0_49 = arith.constant 0 : index
    %133 = vector.load %arg1[%c384, %c0_49] : memref<1144x64xf32, #tpu.memory_space<vmem>>, vector<256x64xf32>
    %c640 = arith.constant 640 : index
    %c0_50 = arith.constant 0 : index
    %134 = vector.load %arg1[%c640, %c0_50] : memref<1144x64xf32, #tpu.memory_space<vmem>>, vector<1x64xf32>
    %cst_51 = arith.constant dense<0.000000e+00> : vector<10x256xf32>
    %135 = tpu.matmul %130, %131, %cst_51 {dimension_numbers = #tpu.dot_dimension_numbers<[1], [0], [0], [1], [0, 0, 1, 1], [], []>} : vector<10x64xf32>, vector<64x256xf32>, vector<10x256xf32> -> vector<10x256xf32>
    %136 = vector.broadcast %132 : vector<1x256xf32> to vector<10x256xf32>
    %137 = arith.addf %135, %136 : vector<10x256xf32>
    %cst_52 = arith.constant 1.702000e+00 : f32
    %138 = vector.broadcast %cst_52 : f32 to vector<10x256xf32>
    %139 = arith.mulf %138, %137 : vector<10x256xf32>
    %140 = arith.negf %139 : vector<10x256xf32>
    %141 = math.exp %140 : vector<10x256xf32>
    %cst_53 = arith.constant 1.000000e+00 : f32
    %142 = vector.broadcast %cst_53 : f32 to vector<10x256xf32>
    %143 = arith.addf %142, %141 : vector<10x256xf32>
    %144 = arith.divf %142, %143 : vector<10x256xf32>
    %145 = arith.mulf %137, %144 : vector<10x256xf32>
    %cst_54 = arith.constant dense<0.000000e+00> : vector<10x64xf32>
    %146 = tpu.matmul %145, %133, %cst_54 {dimension_numbers = #tpu.dot_dimension_numbers<[1], [0], [0], [1], [0, 0, 1, 1], [], []>} : vector<10x256xf32>, vector<256x64xf32>, vector<10x64xf32> -> vector<10x64xf32>
    %147 = vector.broadcast %134 : vector<1x64xf32> to vector<10x64xf32>
    %148 = arith.addf %146, %147 : vector<10x64xf32>
    %149 = arith.addf %108, %148 : vector<10x64xf32>
    %c648 = arith.constant 648 : index
    %c0_55 = arith.constant 0 : index
    %150 = vector.load %arg1[%c648, %c0_55] : memref<1144x64xf32, #tpu.memory_space<vmem>>, vector<2x10xf32>
    %cst_56 = arith.constant dense<0.000000e+00> : vector<2x64xf32>
    %151 = tpu.matmul %150, %149, %cst_56 {dimension_numbers = #tpu.dot_dimension_numbers<[1], [0], [0], [1], [0, 0, 1, 1], [], []>} : vector<2x10xf32>, vector<10x64xf32>, vector<2x64xf32> -> vector<2x64xf32>
    %c656 = arith.constant 656 : index
    %c0_57 = arith.constant 0 : index
    %152 = vector.load %arg1[%c656, %c0_57] : memref<1144x64xf32, #tpu.memory_space<vmem>>, vector<1x64xf32>
    %c664 = arith.constant 664 : index
    %c0_58 = arith.constant 0 : index
    %153 = vector.load %arg1[%c664, %c0_58] : memref<1144x64xf32, #tpu.memory_space<vmem>>, vector<1x64xf32>
    %cst_59 = arith.constant dense<0.000000e+00> : vector<2xf32>
    %154 = vector.multi_reduction <add>, %151, %cst_59 [1] : vector<2x64xf32> to vector<2xf32>
    %155 = vector.shape_cast %154 : vector<2xf32> to vector<2x1xf32>
    %cst_60 = arith.constant 6.400000e+01 : f32
    %156 = vector.broadcast %cst_60 : f32 to vector<2x1xf32>
    %157 = arith.divf %155, %156 : vector<2x1xf32>
    %158 = vector.broadcast %157 : vector<2x1xf32> to vector<2x64xf32>
    %159 = arith.subf %151, %158 : vector<2x64xf32>
    %160 = arith.mulf %159, %159 : vector<2x64xf32>
    %cst_61 = arith.constant dense<0.000000e+00> : vector<2xf32>
    %161 = vector.multi_reduction <add>, %160, %cst_61 [1] : vector<2x64xf32> to vector<2xf32>
    %162 = vector.shape_cast %161 : vector<2xf32> to vector<2x1xf32>
    %cst_62 = arith.constant 6.400000e+01 : f32
    %163 = vector.broadcast %cst_62 : f32 to vector<2x1xf32>
    %164 = arith.divf %162, %163 : vector<2x1xf32>
    %cst_63 = arith.constant 9.99999974E-6 : f32
    %165 = vector.broadcast %cst_63 : f32 to vector<2x1xf32>
    %166 = arith.addf %164, %165 : vector<2x1xf32>
    %167 = math.rsqrt %166 : vector<2x1xf32>
    %168 = vector.broadcast %167 : vector<2x1xf32> to vector<2x64xf32>
    %169 = arith.mulf %159, %168 : vector<2x64xf32>
    %170 = vector.broadcast %152 : vector<1x64xf32> to vector<2x64xf32>
    %171 = arith.mulf %169, %170 : vector<2x64xf32>
    %172 = vector.broadcast %153 : vector<1x64xf32> to vector<2x64xf32>
    %173 = arith.addf %171, %172 : vector<2x64xf32>
    %c0_64 = arith.constant 0 : index
    %c0_65 = arith.constant 0 : index
    %174 = vector.load %arg3[%c0_64, %c0_65] : memref<144x512xf32, #tpu.memory_space<vmem>>, vector<64x512xf32>
    %cst_66 = arith.constant dense<0.000000e+00> : vector<2x512xf32>
    %175 = tpu.matmul %173, %174, %cst_66 {dimension_numbers = #tpu.dot_dimension_numbers<[1], [0], [0], [1], [0, 0, 1, 1], [], []>} : vector<2x64xf32>, vector<64x512xf32>, vector<2x512xf32> -> vector<2x512xf32>
    %c64_67 = arith.constant 64 : index
    %c0_68 = arith.constant 0 : index
    %176 = vector.load %arg3[%c64_67, %c0_68] : memref<144x512xf32, #tpu.memory_space<vmem>>, vector<1x512xf32>
    %177 = vector.broadcast %176 : vector<1x512xf32> to vector<2x512xf32>
    %178 = arith.addf %175, %177 : vector<2x512xf32>
    %c672 = arith.constant 672 : index
    %c0_69 = arith.constant 0 : index
    %179 = vector.load %arg1[%c672, %c0_69] : memref<1144x64xf32, #tpu.memory_space<vmem>>, vector<24x64xf32>
    %c696 = arith.constant 696 : index
    %c0_70 = arith.constant 0 : index
    %180 = vector.load %arg1[%c696, %c0_70] : memref<1144x64xf32, #tpu.memory_space<vmem>>, vector<24x24xf32>
    %c720 = arith.constant 720 : index
    %c0_71 = arith.constant 0 : index
    %181 = vector.load %arg1[%c720, %c0_71] : memref<1144x64xf32, #tpu.memory_space<vmem>>, vector<1x64xf32>
    %c728 = arith.constant 728 : index
    %c0_72 = arith.constant 0 : index
    %182 = vector.load %arg1[%c728, %c0_72] : memref<1144x64xf32, #tpu.memory_space<vmem>>, vector<1x64xf32>
    %cst_73 = arith.constant dense<0.000000e+00> : vector<24xf32>
    %183 = vector.multi_reduction <add>, %179, %cst_73 [1] : vector<24x64xf32> to vector<24xf32>
    %184 = vector.shape_cast %183 : vector<24xf32> to vector<24x1xf32>
    %cst_74 = arith.constant 6.400000e+01 : f32
    %185 = vector.broadcast %cst_74 : f32 to vector<24x1xf32>
    %186 = arith.divf %184, %185 : vector<24x1xf32>
    %187 = vector.broadcast %186 : vector<24x1xf32> to vector<24x64xf32>
    %188 = arith.subf %179, %187 : vector<24x64xf32>
    %189 = arith.mulf %188, %188 : vector<24x64xf32>
    %cst_75 = arith.constant dense<0.000000e+00> : vector<24xf32>
    %190 = vector.multi_reduction <add>, %189, %cst_75 [1] : vector<24x64xf32> to vector<24xf32>
    %191 = vector.shape_cast %190 : vector<24xf32> to vector<24x1xf32>
    %cst_76 = arith.constant 6.400000e+01 : f32
    %192 = vector.broadcast %cst_76 : f32 to vector<24x1xf32>
    %193 = arith.divf %191, %192 : vector<24x1xf32>
    %cst_77 = arith.constant 9.99999974E-6 : f32
    %194 = vector.broadcast %cst_77 : f32 to vector<24x1xf32>
    %195 = arith.addf %193, %194 : vector<24x1xf32>
    %196 = math.rsqrt %195 : vector<24x1xf32>
    %197 = vector.broadcast %196 : vector<24x1xf32> to vector<24x64xf32>
    %198 = arith.mulf %188, %197 : vector<24x64xf32>
    %199 = vector.broadcast %181 : vector<1x64xf32> to vector<24x64xf32>
    %200 = arith.mulf %198, %199 : vector<24x64xf32>
    %201 = vector.broadcast %182 : vector<1x64xf32> to vector<24x64xf32>
    %202 = arith.addf %200, %201 : vector<24x64xf32>
    %c136 = arith.constant 136 : index
    %c0_78 = arith.constant 0 : index
    %203 = vector.load %arg2[%c136, %c0_78] : memref<272x256xf32, #tpu.memory_space<vmem>>, vector<64x192xf32>
    %c736 = arith.constant 736 : index
    %c0_79 = arith.constant 0 : index
    %204 = vector.load %arg1[%c736, %c0_79] : memref<1144x64xf32, #tpu.memory_space<vmem>>, vector<1x64xf32>
    %c744 = arith.constant 744 : index
    %c0_80 = arith.constant 0 : index
    %205 = vector.load %arg1[%c744, %c0_80] : memref<1144x64xf32, #tpu.memory_space<vmem>>, vector<1x64xf32>
    %c752 = arith.constant 752 : index
    %c0_81 = arith.constant 0 : index
    %206 = vector.load %arg1[%c752, %c0_81] : memref<1144x64xf32, #tpu.memory_space<vmem>>, vector<1x64xf32>
    %c760 = arith.constant 760 : index
    %c0_82 = arith.constant 0 : index
    %207 = vector.load %arg1[%c760, %c0_82] : memref<1144x64xf32, #tpu.memory_space<vmem>>, vector<64x64xf32>
    %c824 = arith.constant 824 : index
    %c0_83 = arith.constant 0 : index
    %208 = vector.load %arg1[%c824, %c0_83] : memref<1144x64xf32, #tpu.memory_space<vmem>>, vector<1x64xf32>
    %cst_84 = arith.constant dense<0.000000e+00> : vector<24x192xf32>
    %209 = tpu.matmul %202, %203, %cst_84 {dimension_numbers = #tpu.dot_dimension_numbers<[1], [0], [0], [1], [0, 0, 1, 1], [], []>} : vector<24x64xf32>, vector<64x192xf32>, vector<24x192xf32> -> vector<24x192xf32>
    %210 = vector.extract_strided_slice %209 {offsets = [0, 0], sizes = [24, 64], strides = [1, 1]} : vector<24x192xf32> to vector<24x64xf32>
    %211 = vector.broadcast %204 : vector<1x64xf32> to vector<24x64xf32>
    %212 = arith.addf %210, %211 : vector<24x64xf32>
    %213 = vector.extract_strided_slice %209 {offsets = [0, 64], sizes = [24, 64], strides = [1, 1]} : vector<24x192xf32> to vector<24x64xf32>
    %214 = vector.broadcast %205 : vector<1x64xf32> to vector<24x64xf32>
    %215 = arith.addf %213, %214 : vector<24x64xf32>
    %216 = vector.extract_strided_slice %209 {offsets = [0, 128], sizes = [24, 64], strides = [1, 1]} : vector<24x192xf32> to vector<24x64xf32>
    %217 = vector.broadcast %206 : vector<1x64xf32> to vector<24x64xf32>
    %218 = arith.addf %216, %217 : vector<24x64xf32>
    %219 = vector.extract_strided_slice %212 {offsets = [0, 0], sizes = [24, 32], strides = [1, 1]} : vector<24x64xf32> to vector<24x32xf32>
    %220 = vector.extract_strided_slice %215 {offsets = [0, 0], sizes = [24, 32], strides = [1, 1]} : vector<24x64xf32> to vector<24x32xf32>
    %221 = vector.extract_strided_slice %218 {offsets = [0, 0], sizes = [24, 32], strides = [1, 1]} : vector<24x64xf32> to vector<24x32xf32>
    %cst_85 = arith.constant dense<0.000000e+00> : vector<24x24xf32>
    %222 = tpu.matmul %219, %220, %cst_85 {dimension_numbers = #tpu.dot_dimension_numbers<[1], [1], [0], [0], [0, 0, 1, 0], [], []>} : vector<24x32xf32>, vector<24x32xf32>, vector<24x24xf32> -> vector<24x24xf32>
    %cst_86 = arith.constant 0.176776692 : f32
    %223 = vector.broadcast %cst_86 : f32 to vector<24x24xf32>
    %224 = arith.mulf %222, %223 : vector<24x24xf32>
    %225 = arith.addf %224, %180 : vector<24x24xf32>
    %cst_87 = arith.constant dense<0xFF800000> : vector<24xf32>
    %226 = vector.multi_reduction <maximumf>, %225, %cst_87 [1] : vector<24x24xf32> to vector<24xf32>
    %227 = vector.shape_cast %226 : vector<24xf32> to vector<24x1xf32>
    %228 = vector.broadcast %227 : vector<24x1xf32> to vector<24x24xf32>
    %229 = arith.subf %225, %228 : vector<24x24xf32>
    %230 = math.exp %229 : vector<24x24xf32>
    %cst_88 = arith.constant dense<0.000000e+00> : vector<24xf32>
    %231 = vector.multi_reduction <add>, %230, %cst_88 [1] : vector<24x24xf32> to vector<24xf32>
    %232 = vector.shape_cast %231 : vector<24xf32> to vector<24x1xf32>
    %233 = tpu.reciprocal %232 : vector<24x1xf32> -> vector<24x1xf32>
    %234 = vector.broadcast %233 : vector<24x1xf32> to vector<24x24xf32>
    %235 = arith.mulf %230, %234 : vector<24x24xf32>
    %cst_89 = arith.constant dense<0.000000e+00> : vector<24x32xf32>
    %236 = tpu.matmul %235, %221, %cst_89 {dimension_numbers = #tpu.dot_dimension_numbers<[1], [0], [0], [1], [0, 0, 1, 1], [], []>} : vector<24x24xf32>, vector<24x32xf32>, vector<24x32xf32> -> vector<24x32xf32>
    %237 = vector.extract_strided_slice %212 {offsets = [0, 32], sizes = [24, 32], strides = [1, 1]} : vector<24x64xf32> to vector<24x32xf32>
    %238 = vector.extract_strided_slice %215 {offsets = [0, 32], sizes = [24, 32], strides = [1, 1]} : vector<24x64xf32> to vector<24x32xf32>
    %239 = vector.extract_strided_slice %218 {offsets = [0, 32], sizes = [24, 32], strides = [1, 1]} : vector<24x64xf32> to vector<24x32xf32>
    %cst_90 = arith.constant dense<0.000000e+00> : vector<24x24xf32>
    %240 = tpu.matmul %237, %238, %cst_90 {dimension_numbers = #tpu.dot_dimension_numbers<[1], [1], [0], [0], [0, 0, 1, 0], [], []>} : vector<24x32xf32>, vector<24x32xf32>, vector<24x24xf32> -> vector<24x24xf32>
    %cst_91 = arith.constant 0.176776692 : f32
    %241 = vector.broadcast %cst_91 : f32 to vector<24x24xf32>
    %242 = arith.mulf %240, %241 : vector<24x24xf32>
    %243 = arith.addf %242, %180 : vector<24x24xf32>
    %cst_92 = arith.constant dense<0xFF800000> : vector<24xf32>
    %244 = vector.multi_reduction <maximumf>, %243, %cst_92 [1] : vector<24x24xf32> to vector<24xf32>
    %245 = vector.shape_cast %244 : vector<24xf32> to vector<24x1xf32>
    %246 = vector.broadcast %245 : vector<24x1xf32> to vector<24x24xf32>
    %247 = arith.subf %243, %246 : vector<24x24xf32>
    %248 = math.exp %247 : vector<24x24xf32>
    %cst_93 = arith.constant dense<0.000000e+00> : vector<24xf32>
    %249 = vector.multi_reduction <add>, %248, %cst_93 [1] : vector<24x24xf32> to vector<24xf32>
    %250 = vector.shape_cast %249 : vector<24xf32> to vector<24x1xf32>
    %251 = tpu.reciprocal %250 : vector<24x1xf32> -> vector<24x1xf32>
    %252 = vector.broadcast %251 : vector<24x1xf32> to vector<24x24xf32>
    %253 = arith.mulf %248, %252 : vector<24x24xf32>
    %cst_94 = arith.constant dense<0.000000e+00> : vector<24x32xf32>
    %254 = tpu.matmul %253, %239, %cst_94 {dimension_numbers = #tpu.dot_dimension_numbers<[1], [0], [0], [1], [0, 0, 1, 1], [], []>} : vector<24x24xf32>, vector<24x32xf32>, vector<24x32xf32> -> vector<24x32xf32>
    %255 = tpu.concatenate %236, %254 in 1 : vector<24x32xf32>, vector<24x32xf32> -> vector<24x64xf32>
    %cst_95 = arith.constant dense<0.000000e+00> : vector<24x64xf32>
    %256 = tpu.matmul %255, %207, %cst_95 {dimension_numbers = #tpu.dot_dimension_numbers<[1], [0], [0], [1], [0, 0, 1, 1], [], []>} : vector<24x64xf32>, vector<64x64xf32>, vector<24x64xf32> -> vector<24x64xf32>
    %257 = vector.broadcast %208 : vector<1x64xf32> to vector<24x64xf32>
    %258 = arith.addf %256, %257 : vector<24x64xf32>
    %259 = arith.addf %179, %258 : vector<24x64xf32>
    %c832 = arith.constant 832 : index
    %c0_96 = arith.constant 0 : index
    %260 = vector.load %arg1[%c832, %c0_96] : memref<1144x64xf32, #tpu.memory_space<vmem>>, vector<1x64xf32>
    %c840 = arith.constant 840 : index
    %c0_97 = arith.constant 0 : index
    %261 = vector.load %arg1[%c840, %c0_97] : memref<1144x64xf32, #tpu.memory_space<vmem>>, vector<1x64xf32>
    %cst_98 = arith.constant dense<0.000000e+00> : vector<24xf32>
    %262 = vector.multi_reduction <add>, %259, %cst_98 [1] : vector<24x64xf32> to vector<24xf32>
    %263 = vector.shape_cast %262 : vector<24xf32> to vector<24x1xf32>
    %cst_99 = arith.constant 6.400000e+01 : f32
    %264 = vector.broadcast %cst_99 : f32 to vector<24x1xf32>
    %265 = arith.divf %263, %264 : vector<24x1xf32>
    %266 = vector.broadcast %265 : vector<24x1xf32> to vector<24x64xf32>
    %267 = arith.subf %259, %266 : vector<24x64xf32>
    %268 = arith.mulf %267, %267 : vector<24x64xf32>
    %cst_100 = arith.constant dense<0.000000e+00> : vector<24xf32>
    %269 = vector.multi_reduction <add>, %268, %cst_100 [1] : vector<24x64xf32> to vector<24xf32>
    %270 = vector.shape_cast %269 : vector<24xf32> to vector<24x1xf32>
    %cst_101 = arith.constant 6.400000e+01 : f32
    %271 = vector.broadcast %cst_101 : f32 to vector<24x1xf32>
    %272 = arith.divf %270, %271 : vector<24x1xf32>
    %cst_102 = arith.constant 9.99999974E-6 : f32
    %273 = vector.broadcast %cst_102 : f32 to vector<24x1xf32>
    %274 = arith.addf %272, %273 : vector<24x1xf32>
    %275 = math.rsqrt %274 : vector<24x1xf32>
    %276 = vector.broadcast %275 : vector<24x1xf32> to vector<24x64xf32>
    %277 = arith.mulf %267, %276 : vector<24x64xf32>
    %278 = vector.broadcast %260 : vector<1x64xf32> to vector<24x64xf32>
    %279 = arith.mulf %277, %278 : vector<24x64xf32>
    %280 = vector.broadcast %261 : vector<1x64xf32> to vector<24x64xf32>
    %281 = arith.addf %279, %280 : vector<24x64xf32>
    %c200 = arith.constant 200 : index
    %c0_103 = arith.constant 0 : index
    %282 = vector.load %arg2[%c200, %c0_103] : memref<272x256xf32, #tpu.memory_space<vmem>>, vector<64x256xf32>
    %c264_104 = arith.constant 264 : index
    %c0_105 = arith.constant 0 : index
    %283 = vector.load %arg2[%c264_104, %c0_105] : memref<272x256xf32, #tpu.memory_space<vmem>>, vector<1x256xf32>
    %c848 = arith.constant 848 : index
    %c0_106 = arith.constant 0 : index
    %284 = vector.load %arg1[%c848, %c0_106] : memref<1144x64xf32, #tpu.memory_space<vmem>>, vector<256x64xf32>
    %c1104 = arith.constant 1104 : index
    %c0_107 = arith.constant 0 : index
    %285 = vector.load %arg1[%c1104, %c0_107] : memref<1144x64xf32, #tpu.memory_space<vmem>>, vector<1x64xf32>
    %cst_108 = arith.constant dense<0.000000e+00> : vector<24x256xf32>
    %286 = tpu.matmul %281, %282, %cst_108 {dimension_numbers = #tpu.dot_dimension_numbers<[1], [0], [0], [1], [0, 0, 1, 1], [], []>} : vector<24x64xf32>, vector<64x256xf32>, vector<24x256xf32> -> vector<24x256xf32>
    %287 = vector.broadcast %283 : vector<1x256xf32> to vector<24x256xf32>
    %288 = arith.addf %286, %287 : vector<24x256xf32>
    %cst_109 = arith.constant 1.702000e+00 : f32
    %289 = vector.broadcast %cst_109 : f32 to vector<24x256xf32>
    %290 = arith.mulf %289, %288 : vector<24x256xf32>
    %291 = arith.negf %290 : vector<24x256xf32>
    %292 = math.exp %291 : vector<24x256xf32>
    %cst_110 = arith.constant 1.000000e+00 : f32
    %293 = vector.broadcast %cst_110 : f32 to vector<24x256xf32>
    %294 = arith.addf %293, %292 : vector<24x256xf32>
    %295 = arith.divf %293, %294 : vector<24x256xf32>
    %296 = arith.mulf %288, %295 : vector<24x256xf32>
    %cst_111 = arith.constant dense<0.000000e+00> : vector<24x64xf32>
    %297 = tpu.matmul %296, %284, %cst_111 {dimension_numbers = #tpu.dot_dimension_numbers<[1], [0], [0], [1], [0, 0, 1, 1], [], []>} : vector<24x256xf32>, vector<256x64xf32>, vector<24x64xf32> -> vector<24x64xf32>
    %298 = vector.broadcast %285 : vector<1x64xf32> to vector<24x64xf32>
    %299 = arith.addf %297, %298 : vector<24x64xf32>
    %300 = arith.addf %259, %299 : vector<24x64xf32>
    %c1120 = arith.constant 1120 : index
    %c0_112 = arith.constant 0 : index
    %301 = vector.load %arg1[%c1120, %c0_112] : memref<1144x64xf32, #tpu.memory_space<vmem>>, vector<1x64xf32>
    %c1128 = arith.constant 1128 : index
    %c0_113 = arith.constant 0 : index
    %302 = vector.load %arg1[%c1128, %c0_113] : memref<1144x64xf32, #tpu.memory_space<vmem>>, vector<1x64xf32>
    %cst_114 = arith.constant dense<0.000000e+00> : vector<24xf32>
    %303 = vector.multi_reduction <add>, %300, %cst_114 [1] : vector<24x64xf32> to vector<24xf32>
    %304 = vector.shape_cast %303 : vector<24xf32> to vector<24x1xf32>
    %cst_115 = arith.constant 6.400000e+01 : f32
    %305 = vector.broadcast %cst_115 : f32 to vector<24x1xf32>
    %306 = arith.divf %304, %305 : vector<24x1xf32>
    %307 = vector.broadcast %306 : vector<24x1xf32> to vector<24x64xf32>
    %308 = arith.subf %300, %307 : vector<24x64xf32>
    %309 = arith.mulf %308, %308 : vector<24x64xf32>
    %cst_116 = arith.constant dense<0.000000e+00> : vector<24xf32>
    %310 = vector.multi_reduction <add>, %309, %cst_116 [1] : vector<24x64xf32> to vector<24xf32>
    %311 = vector.shape_cast %310 : vector<24xf32> to vector<24x1xf32>
    %cst_117 = arith.constant 6.400000e+01 : f32
    %312 = vector.broadcast %cst_117 : f32 to vector<24x1xf32>
    %313 = arith.divf %311, %312 : vector<24x1xf32>
    %cst_118 = arith.constant 9.99999974E-6 : f32
    %314 = vector.broadcast %cst_118 : f32 to vector<24x1xf32>
    %315 = arith.addf %313, %314 : vector<24x1xf32>
    %316 = math.rsqrt %315 : vector<24x1xf32>
    %317 = vector.broadcast %316 : vector<24x1xf32> to vector<24x64xf32>
    %318 = arith.mulf %308, %317 : vector<24x64xf32>
    %319 = vector.broadcast %301 : vector<1x64xf32> to vector<24x64xf32>
    %320 = arith.mulf %318, %319 : vector<24x64xf32>
    %321 = vector.broadcast %302 : vector<1x64xf32> to vector<24x64xf32>
    %322 = arith.addf %320, %321 : vector<24x64xf32>
    %c1112 = arith.constant 1112 : index
    %c0_119 = arith.constant 0 : index
    %323 = vector.load %arg1[%c1112, %c0_119] : memref<1144x64xf32, #tpu.memory_space<vmem>>, vector<3x24xf32>
    %cst_120 = arith.constant dense<0.000000e+00> : vector<3x64xf32>
    %324 = tpu.matmul %323, %322, %cst_120 {dimension_numbers = #tpu.dot_dimension_numbers<[1], [0], [0], [1], [0, 0, 1, 1], [], []>} : vector<3x24xf32>, vector<24x64xf32>, vector<3x64xf32> -> vector<3x64xf32>
    %c72 = arith.constant 72 : index
    %c0_121 = arith.constant 0 : index
    %325 = vector.load %arg3[%c72, %c0_121] : memref<144x512xf32, #tpu.memory_space<vmem>>, vector<64x512xf32>
    %cst_122 = arith.constant dense<0.000000e+00> : vector<3x512xf32>
    %326 = tpu.matmul %324, %325, %cst_122 {dimension_numbers = #tpu.dot_dimension_numbers<[1], [0], [0], [1], [0, 0, 1, 1], [], []>} : vector<3x64xf32>, vector<64x512xf32>, vector<3x512xf32> -> vector<3x512xf32>
    %c136_123 = arith.constant 136 : index
    %c0_124 = arith.constant 0 : index
    %327 = vector.load %arg3[%c136_123, %c0_124] : memref<144x512xf32, #tpu.memory_space<vmem>>, vector<1x512xf32>
    %328 = vector.broadcast %327 : vector<1x512xf32> to vector<3x512xf32>
    %329 = arith.addf %326, %328 : vector<3x512xf32>
    %330 = arith.mulf %178, %178 : vector<2x512xf32>
    %cst_125 = arith.constant dense<0.000000e+00> : vector<2xf32>
    %331 = vector.multi_reduction <add>, %330, %cst_125 [1] : vector<2x512xf32> to vector<2xf32>
    %332 = vector.shape_cast %331 : vector<2xf32> to vector<2x1xf32>
    %333 = math.rsqrt %332 : vector<2x1xf32>
    %334 = vector.broadcast %333 : vector<2x1xf32> to vector<2x512xf32>
    %335 = arith.mulf %178, %334 : vector<2x512xf32>
    %336 = arith.mulf %329, %329 : vector<3x512xf32>
    %cst_126 = arith.constant dense<0.000000e+00> : vector<3xf32>
    %337 = vector.multi_reduction <add>, %336, %cst_126 [1] : vector<3x512xf32> to vector<3xf32>
    %338 = vector.shape_cast %337 : vector<3xf32> to vector<3x1xf32>
    %339 = math.rsqrt %338 : vector<3x1xf32>
    %340 = vector.broadcast %339 : vector<3x1xf32> to vector<3x512xf32>
    %341 = arith.mulf %329, %340 : vector<3x512xf32>
    %cst_127 = arith.constant dense<0.000000e+00> : vector<2x3xf32>
    %342 = tpu.matmul %335, %341, %cst_127 {dimension_numbers = #tpu.dot_dimension_numbers<[1], [1], [0], [0], [0, 0, 1, 0], [], []>} : vector<2x512xf32>, vector<3x512xf32>, vector<2x3xf32> -> vector<2x3xf32>
    %c1136 = arith.constant 1136 : index
    %c0_128 = arith.constant 0 : index
    %343 = vector.load %arg1[%c1136, %c0_128] : memref<1144x64xf32, #tpu.memory_space<vmem>>, vector<1x1xf32>
    %344 = vector.broadcast %343 : vector<1x1xf32> to vector<2x3xf32>
    %345 = arith.mulf %344, %342 : vector<2x3xf32>
    %c0_129 = arith.constant 0 : index
    %c0_130 = arith.constant 0 : index
    %346 = vector.load %arg4[%c0_129, %c0_130] : memref<2x3xf32, #tpu.memory_space<vmem>>, vector<2x3xf32>
    tpu.vector_store %arg4[%c0_129, %c0_130], %345 {strides = array<i32>} : memref<2x3xf32, #tpu.memory_space<vmem>>, vector<2x3xf32>,
    return
  }
}

</mosaic_0001>

<bundles_post_ra>
// kernel: clip_with_soft_prompt.1
= control target key start
LH: loop header
LB: loop body
LE: loop exit
PB: predicated region body
PF: predicated region fallthrough
CT: control target
= control target key end

     0   :  { %v4079_v3 = vmov 0.0|0.0   ;;  %vm44_vm0 = vcmask 523264   ;;  %s5378_s0 = inlined_call_operand.vmem [shape: f32[8,192], index: 0, kind: input, shape index: {}]   ;;  %s5379_s1 = inlined_call_operand.vmem [shape: f32[1144,64], index: 1, kind: input, shape index: {}]   ;;  %s5380_s2 = inlined_call_operand.vmem [shape: f32[272,256], index: 2, kind: input, shape index: {}]   ;;  %s5381_s3 = inlined_call_operand.vmem [shape: f32[144,512], index: 3, kind: input, shape index: {}]   ;;  %s5382_s4 = inlined_call_operand.hbm [shape: f32[2,3], index: 4, kind: output, shape index: {}]  }
   0x1   :  { %v20_v0 = vld [vmem:[%s5379_s1] sm:$0xff]  ;;  %v21_v1 = vld [vmem:[%s5379_s1 + $0x8] sm:$0xff]  ;;  %v22_v2 = vld [vmem:[%s5379_s1 + $0x10] sm:$0xff]  ;;  %3593 = vmatprep.subr.bf16.mxu0 %v4079_v3 }
   0x2   :  { %v3594_v4 = vpack.c.bf16 %v21_v1, %v20_v0  ;;  %v23_v5 = vld [vmem:[%s5379_s1 + $0x18] sm:$0xff]  ;;  %v24_v7 = vld [vmem:[%s5379_s1 + $0x20] sm:$0xff]  ;;  %v25_v8 = vld [vmem:[%s5379_s1 + $0x28] sm:$0xff] }
   0x3   :  { %v3597_v6 = vpack.c.bf16 %v23_v5, %v22_v2  ;;  %v3600_v9 = vpack.c.bf16 %v25_v8, %v24_v7  ;;  %v26_v10 = vld [vmem:[%s5379_s1 + $0x30] sm:$0xff]  ;;  %v27_v11 = vld [vmem:[%s5379_s1 + $0x38] sm:$0xff]  ;;  %v19_v12 = vld [vmem:[%s5378_s0 + $0x8] sm:$0xff] }
   0x4   :  { %3595 = vmatpush1.bf16.msra.mxu0 %v3594_v4 }
   0x5   :  { %3596 = vmatprep.subr.bf16.mxu0 %v4079_v3 }
   0x8   :  { %3598 = vmatpush1.bf16.msra.mxu0 %v3597_v6 }
   0x9   :  { %3599 = vmatprep.subr.bf16.mxu0 %v4079_v3 }
   0xa   :  { %9 = vsyncpa [#allocation3], 0  ;;  %3195 = vmatprep.mubr.msk.f32.mxu0 %vm44_vm0, %v19_v12  ;;  %v3603_v13 = vpack.c.bf16 %v27_v11, %v26_v10  ;;  %v28_v14 = vld [vmem:[%s5379_s1 + $0x40] sm:$0xff]  ;;  %v29_v15 = vld [vmem:[%s5379_s1 + $0x48] sm:$0xff]  ;;  %vm122_vm1 = vcmask 64512   ;;  %vm209_vm2 = vcmask 517120  }
   0xb   :  { %v3606_v16 = vpack.c.bf16 %v29_v15, %v28_v14  ;;  %v30_v17 = vld [vmem:[%s5379_s1 + $0x50] sm:$0xff]  ;;  %v31_v18 = vld [vmem:[%s5379_s1 + $0x58] sm:$0xff]  ;;  %v32_v20 = vld [vmem:[%s5379_s1 + $0x60] sm:$0xff]  ;;  %s4081_s7 = smov 64   ;;  %vm427_vm3 = vcmask 261120   ;;  %vm547_vm4 = vcmask 1041408  }
   0xc   :  { %3601 = vmatpush1.bf16.msra.mxu0 %v3600_v9  ;;  %v3609_v19 = vpack.c.bf16 %v31_v18, %v30_v17  ;;  %v33_v21 = vld [vmem:[%s5379_s1 + $0x68] sm:$0xff]  ;;  %v34_v23 = vld [vmem:[%s5379_s1 + $0x70] sm:$0xff]  ;;  %v35_v24 = vld [vmem:[%s5379_s1 + $0x78] sm:$0xff]  ;;  %vm4082_vm6 = vmmov 1   ;;  %vm521_vm8 = vcmask 74752   ;;  %vm517_vm9 = vcmask 80896  }
   0xd   :  { %3602 = vmatprep.subr.bf16.mxu0 %v4079_v3  ;;  %v3612_v22 = vpack.c.bf16 %v33_v21, %v32_v20  ;;  %v3615_v25 = vpack.c.bf16 %v35_v24, %v34_v23  ;;  %v36_v26 = vld [vmem:[%s5379_s1 + $0x80] sm:$0xff]  ;;  %v37_v27 = vld [vmem:[%s5379_s1 + $0x88] sm:$0xff]  ;;  %v38_v29 = vld [vmem:[%s5379_s1 + $0x90] sm:$0xff]  ;;  %s4083_s20 = smov 96   ;;  %vm4085_vm10 = vmmov 0   ;;  %vm1845_vm11 = vcmask 195584  }
   0xe   :  { %v3618_v28 = vpack.c.bf16 %v37_v27, %v36_v26  ;;  %v39_v30 = vld [vmem:[%s5379_s1 + $0x98] sm:$0xff]  ;;  %v40_v32 = vld [vmem:[%s5379_s1 + $0xa0] sm:$0xff]  ;;  %v41_v33 = vld [vmem:[%s5379_s1 + $0xa8] sm:$0xff]  ;;  %vm3018_vm12 = vcmask 1042432   ;;  %s4086_s9 = smov [#allocation2]   ;;  %vm3179_vm13 = vcmask 17408  }
   0xf   :  { %v3621_v31 = vpack.c.bf16 %v39_v30, %v38_v29  ;;  %v3624_v34 = vpack.c.bf16 %v41_v33, %v40_v32  ;;  %v42_v35 = vld [vmem:[%s5379_s1 + $0xb0] sm:$0xff]  ;;  %v43_v36 = vld [vmem:[%s5379_s1 + $0xb8] sm:$0xff]  ;;  %v18_v38 = vld [vmem:[%s5378_s0] sm:$0xff]  ;;  %s4084_s0 = smov 32   ;;  %s3187_s10 = sshll.u32 %s4086_s9, 4  ;;  %s3188_s10 = int_to_ptr.vmem [resolvable:$true] %s3187_s10 }
  0x10   :  { %3604 = vmatpush1.bf16.msra.mxu0 %v3603_v13  ;;  %v3627_v37 = vpack.c.bf16 %v43_v36, %v42_v35  ;;  %v118_v39 = vld [vmem:[%s5379_s1 + $0xc0] sm:$0xff]  ;;  %v119_v41 = vld [vmem:[%s5379_s1 + $0xc8] sm:$0x3]  ;;  %v120_v43 = vld [vmem:[%s5379_s1 + $0xd0] sm:$0xff]  ;;  %s4055_s11 = scalar_lea.vmem %s3188_s10, 32  ;;  %p4060_p1 = scmp.lt.s32.totalorder %s3188_s10, %s3188_s10 }
  0x11   :  { %3605 = vmatprep.subr.bf16.mxu0 %v4079_v3  ;;  %3442 = vmatprep.mubr.msk.f32.mxu1 %vm122_vm1, %v118_v39  ;;  %v121_v45 = vld [vmem:[%s5379_s1 + $0xd8] sm:$0x3]  ;;  %v3198_v5 = vld [vmem:[%s5379_s1 + $0xf0] ss:$0 sm:$0xff]  ;;  %v289_v26 = vld [vmem:[%s5380_s2 + $0x8] sm:$0xff]  ;;  %p4056_p0 = scmp.ne.s32.totalorder %s3188_s10, %s4055_s11  ;;  %p4061_p2 = scmp.lt.s32.totalorder %s4055_s11, %s4055_s11 }
  0x12   :  { %v3199_v7 = vld [vmem:[%s5379_s1 + $0xf8] ss:$0 sm:$0xff]  ;;  %v288_v29 = vld [vmem:[%s5380_s2] sm:$0xff]  ;;  %v290_v30 = vld [vmem:[%s5380_s2 + $0x10] sm:$0xff] }
  0x13   :  { %v291_v27 = vld [vmem:[%s5380_s2 + $0x18] sm:$0xff]  ;;  %v293_v32 = vld [vmem:[%s5380_s2 + $0x28] sm:$0xff]  ;;  %v292_v35 = vld [vmem:[%s5380_s2 + $0x20] sm:$0xff]  ;;  %p4062_p3 = por %p4061_p2, %p4060_p1 }
  0x14   :  { %3607 = vmatpush1.bf16.msra.mxu0 %v3606_v16  ;;  %v295_v33 = vld [vmem:[%s5380_s2 + $0x38] sm:$0xff]  ;;  %v294_v36 = vld [vmem:[%s5380_s2 + $0x30] sm:$0xff]  ;;  %vm4318_vm5 = vmpackc.low %vm427_vm3, %vm427_vm3 }
  0x15   :  { %3608 = vmatprep.subr.bf16.mxu0 %v4079_v3  ;;  %v299_v39 = vld [vmem:[%s5380_s2 + $0x58] sm:$0xff]  ;;  %vm4323_vm7 = vmpackc.low %vm547_vm4, %vm4082_vm6  ;;  %p4063_p4 = pnand %p4062_p3, %p4056_p0 }
  0x18   :  { %3610 = vmatpush1.bf16.msra.mxu0 %v3609_v19 }
  0x19   :  { %3611 = vmatprep.subr.bf16.mxu0 %v4079_v3 }
  0x1c   :  { %3613 = vmatpush1.bf16.msra.mxu0 %v3612_v22 }
  0x1d   :  { %3614 = vmatprep.subr.bf16.mxu0 %v4079_v3 }
  0x20   :  { %3616 = vmatpush1.bf16.msra.mxu0 %v3615_v25 }
  0x21   :  { %3617 = vmatprep.subr.bf16.mxu0 %v4079_v3 }
  0x24   :  { %3619 = vmatpush1.bf16.msra.mxu0 %v3618_v28  ;;  %v3629_v28 = vpack.c.bf16 %v291_v27, %v289_v26 }
  0x25   :  { %3620 = vmatprep.subr.bf16.mxu0 %v4079_v3 }
  0x28   :  { %3622 = vmatpush1.bf16.msra.mxu0 %v3621_v31  ;;  %v3631_v31 = vpack.c.bf16 %v290_v30, %v288_v29  ;;  %v247_v30 = vld [vmem:[%s5379_s1 + $0xe8] sm:$0x3] }
  0x29   :  { %3623 = vmatprep.subr.bf16.mxu0 %v4079_v3 }
  0x2c   :  { %3625 = vmatpush1.bf16.msra.mxu0 %v3624_v34  ;;  %v3633_v34 = vpack.c.bf16 %v295_v33, %v293_v32  ;;  %v246_v33 = vld [vmem:[%s5379_s1 + $0xe0] sm:$0xff] }
  0x2d   :  { %3626 = vmatprep.subr.bf16.mxu0 %v4079_v3 }
  0x30   :  { %3628 = vmatpush1.bf16.msra.mxu0 %v3627_v37  ;;  %v3635_v37 = vpack.c.bf16 %v294_v36, %v292_v35 }
  0x33   :  { %113 = vmatmul.mubr.f32.vlgmr.msra.gmra.mrb[0].mxu0 %v18_v38  ;;  %v297_v38 = vld [vmem:[%s5380_s2 + $0x48] sm:$0xff] }
 0x106   :  { %v114_v40 = vpop.f32.mrb[0].mxu0 }
 0x107   :  { %v116_v42 = vpop.f32.mrb[1].mxu0  ;;  %3440 = vmatprep.subr.mxu1 %v114_v40 }
 0x108   :  { %3441 = vmatpush3.msra.mxu1 %v114_v40  ;;  %v3637_v40 = vpack.c.bf16 %v299_v39, %v297_v38  ;;  %v298_v42 = vld [vmem:[%s5380_s2 + $0x50] sm:$0xff] }
 0x109   :  { %3443 = vmatmul.mubr.msk.f32.vlgmr.msra.gmra.mrb[0].mxu1 %vm122_vm1, %v119_v41  ;;  %3630 = vmatprep.subr.bf16.mxu1 %v3629_v28  ;;  %v296_v41 = vld [vmem:[%s5380_s2 + $0x40] sm:$0xff] }
 0x10a   :  { %3632 = vmatpush1.bf16.msra.mxu1 %v3631_v31  ;;  %v3246_v28 = vld [vmem:[%s5379_s1 + $0x2e0] ss:$0 sm:$0xff] }
 0x10b   :  { %3634 = vmatprep.subr.bf16.mxu1 %v3633_v34 }
 0x10e   :  { %3636 = vmatpush1.bf16.msra.mxu1 %v3635_v37 }
 0x10f   :  { %3638 = vmatprep.subr.bf16.mxu1 %v3637_v40 }
 0x1dc   :  { %v3444_v44 = vpop.f32.mrb[0].mxu1 }
 0x1dd   :  { %v195_v46 = vpop.f32.mrb[1].mxu1  ;;  %v201_v48 = vadd.f32 %v3444_v44, %v121_v45  ;;  %v301_v44 = vld [vmem:[%s5380_s2 + $0x68] sm:$0xff]  ;;  %v303_v45 = vld [vmem:[%s5380_s2 + $0x78] sm:$0xff] }
 0x1de   :  { %v196_v47 = vadd.f32 %v195_v46, %v120_v43  ;;  %v3639_v43 = vpack.c.bf16 %v298_v42, %v296_v41  ;;  %v3641_v46 = vpack.c.bf16 %v303_v45, %v301_v44 }
 0x1df   :  { %v210_v50 = vsel %vm209_vm2, %v201_v48, 0.0 }
 0x1e0   :  { %v206_v49 = vsel %vm44_vm0, %v196_v47, 0.0  ;;  %3640 = vmatpush1.bf16.msra.mxu1 %v3639_v43 }
 0x1e1   :  { %207 = vadd.xlane.f32.xlu0 %v206_v49  ;;  %3642 = vmatprep.subr.bf16.mxu1 %v3641_v46 }
 0x1e5   :  { %211 = vadd.xlane.f32.xlu0 %v210_v50  ;;  %v4080_v50 = vmov 0.0  }
 0x1e6   :  { %386 = vmatprep.mubr.f32.mxu1 %v4080_v50  ;;  %1101 = vmatprep.mubr.f32.mxu0 %v4080_v50 }
 0x26e   :  { %v208_v51 = vpop.xlane.xlu0 %207 }
 0x26f   :  { %v214_v52 = vmul.f32 0.015625, %v208_v51  ;;  %v3205_v51 = vld [vmem:[%s5379_s1 + $0x118] ss:$0 sm:$0xff] }
 0x271   :  { %v216_v53 = vsub.f32 %v196_v47, %v214_v52  ;;  %v300_v47 = vld [vmem:[%s5380_s2 + $0x60] sm:$0xff] }
 0x272   :  { %v212_v54 = vpop.xlane.xlu0 %211 }
 0x273   :  { %v215_v55 = vmul.f32 0.015625, %v212_v54  ;;  %v218_v56 = vmul.f32 %v216_v53, %v216_v53 }
 0x275   :  { %v217_v57 = vsub.f32 %v201_v48, %v215_v55  ;;  %v220_v58 = vsel %vm44_vm0, %v218_v56, 0.0  ;;  %v302_v48 = vld [vmem:[%s5380_s2 + $0x70] sm:$0xff] }
 0x276   :  { %221 = vadd.xlane.f32.xlu1 %v220_v58  ;;  %v3643_v49 = vpack.c.bf16 %v302_v48, %v300_v47 }
 0x277   :  { %v219_v59 = vmul.f32 %v217_v57, %v217_v57 }
 0x278   :  { %3644 = vmatpush1.bf16.msra.mxu1 %v3643_v49 }
 0x279   :  { %v223_v60 = vsel %vm209_vm2, %v219_v59, 0.0  ;;  %v3200_v59 = vld [vmem:[%s5379_s1 + $0x100] ss:$0 sm:$0xff] }
 0x27a   :  { %224 = vadd.xlane.f32.xlu1 %v223_v60 }
 0x303   :  { %v222_v61 = vpop.xlane.xlu1 %221 }
 0x304   :  { %v226_v62 = vmul.f32 0.015625, %v222_v61  ;;  %v3201_v61 = vld [vmem:[%s5379_s1 + $0x108] ss:$0 sm:$0xff] }
 0x306   :  { %v228_v63 = vadd.f32 1e-05, %v226_v62 }
 0x307   :  { %v225_v0 = vpop.xlane.xlu1 %224 }
 0x308   :  { %3936 = vrsqrt.f32 %v228_v63  ;;  %v227_v1 = vmul.f32 0.015625, %v225_v0 }
 0x30a   :  { %v229_v2 = vadd.f32 1e-05, %v227_v1 }
 0x30c   :  { %3938 = vrsqrt.f32 %v229_v2 }
 0x312   :  { %v3937_v4 = vpop.eup %3936 }
 0x313   :  { %v232_v6 = vmul.f32 %v3937_v4, %v216_v53 }
 0x315   :  { %v238_v8 = vmul.f32 %v3198_v5, %v232_v6 }
 0x316   :  { %v3939_v9 = vpop.eup %3938 }
 0x317   :  { %v4225_v10 = vadd.f32 %v3199_v7, %v238_v8  ;;  %v233_v11 = vmul.f32 %v3939_v9, %v217_v57 }
 0x319   :  { %v250_v12 = vsel %vm44_vm0, %v4225_v10, 0.0  ;;  %v239_v13 = vmul.f32 %v3198_v5, %v233_v11  ;;  %v3204_v5 = vld [vmem:[%s5379_s1 + $0x110] ss:$0 sm:$0xff]  ;;  %v3206_v11 = vld [vmem:[%s5379_s1 + $0x120] ss:$0 sm:$0xff] }
 0x31a   :  { %251 = vadd.xlane.f32.xlu0 %v250_v12 }
 0x31b   :  { %v4229_v14 = vadd.f32 %v3199_v7, %v239_v13 }
 0x31d   :  { %v253_v15 = vsel %vm209_vm2, %v4229_v14, 0.0 }
 0x31e   :  { %254 = vadd.xlane.f32.xlu1 %v253_v15 }
 0x3a7   :  { %v252_v16 = vpop.xlane.xlu0 %251 }
 0x3a8   :  { %v256_v17 = vmul.f32 0.015625, %v252_v16 }
 0x3aa   :  { %v258_v18 = vsub.f32 %v4225_v10, %v256_v17 }
 0x3ab   :  { %v255_v19 = vpop.xlane.xlu1 %254 }
 0x3ac   :  { %v257_v20 = vmul.f32 0.015625, %v255_v19  ;;  %v260_v21 = vmul.f32 %v258_v18, %v258_v18 }
 0x3ae   :  { %v259_v22 = vsub.f32 %v4229_v14, %v257_v20  ;;  %v262_v23 = vsel %vm44_vm0, %v260_v21, 0.0 }
 0x3af   :  { %263 = vadd.xlane.f32.xlu0 %v262_v23 }
 0x3b0   :  { %v261_v24 = vmul.f32 %v259_v22, %v259_v22 }
 0x3b2   :  { %v265_v25 = vsel %vm209_vm2, %v261_v24, 0.0 }
 0x3b3   :  { %266 = vadd.xlane.f32.xlu1 %v265_v25 }
 0x3c5   :  { %410 = vrot.lane.b32.xlu0 %v3205_v51, %s4081_s7 }
 0x43c   :  { %v264_v52 = vpop.xlane.xlu0 %263 }
 0x43d   :  { %v268_v53 = vmul.f32 0.015625, %v264_v52 }
 0x43f   :  { %v270_v54 = vadd.f32 1e-05, %v268_v53 }
 0x440   :  { %v267_v55 = vpop.xlane.xlu1 %266  ;;  %v411_v9 = vpop.permute.xlu0 %410 }
 0x441   :  { %3940 = vrsqrt.f32 %v270_v54  ;;  %v269_v56 = vmul.f32 0.015625, %v267_v55 }
 0x443   :  { %v271_v57 = vadd.f32 1e-05, %v269_v56 }
 0x445   :  { %3942 = vrsqrt.f32 %v271_v57 }
 0x44b   :  { %v3941_v58 = vpop.eup %3940 }
 0x44c   :  { %v274_v60 = vmul.f32 %v3941_v58, %v258_v18 }
 0x44e   :  { %v280_v62 = vmul.f32 %v3200_v59, %v274_v60 }
 0x44f   :  { %v3943_v63 = vpop.eup %3942 }
 0x450   :  { %v286_v0 = vadd.f32 %v3201_v61, %v280_v62  ;;  %v275_v1 = vmul.f32 %v3943_v63, %v259_v22 }
 0x452   :  { %3202 = vmatmul.mubr.msk.f32.vlgmr.msra.gmra.mrb[2].mxu1 %vm44_vm0, %v286_v0  ;;  %v281_v2 = vmul.f32 %v3200_v59, %v275_v1 }
 0x453   :  { %392 = vmatprep.mubr.f32.mxu1 %v4080_v50 }
 0x454   :  { %v287_v4 = vadd.f32 %v3201_v61, %v281_v2 }
 0x456   :  { %3203 = vmatmul.mubr.msk.f32.gmra.mrb[4].mxu1 %vm44_vm0, %v287_v4 }
 0x525   :  { %v388_v6 = vpop.f32.mrb[2].mxu1 }
 0x526   :  { %v403_v7 = vadd.f32 %v3204_v5, %v388_v6  ;;  %v390_v8 = vpop.f32.mrb[3].mxu1  ;;  %v413_v13 = vadd.f32 %v411_v9, %v388_v6 }
 0x527   :  { %v4307_v18 = vadd.f32 %v3206_v11, %v390_v8 }
 0x528   :  { %3449 = vmatprep.mubr.msk.f32.mxu1 %vm427_vm3, %v403_v7 }
 0x529   :  { %v394_v12 = vpop.f32.mrb[4].mxu1 }
 0x52a   :  { %v404_v15 = vadd.f32 %v3204_v5, %v394_v12  ;;  %v414_v16 = vadd.f32 %v411_v9, %v394_v12  ;;  %v396_v17 = vpop.f32.mrb[5].mxu1 }
 0x52b   :  { %v4309_v19 = vadd.f32 %v3206_v11, %v396_v17 }
 0x52c   :  { %v3911_v20 = vpack.i.bf16 %v414_v16, %v413_v13 }
 0x52d   :  { %v3916_v21 = vpack.i.bf16 %v4309_v19, %v4307_v18  ;;  %v3651_v22 = vpack.c.bf16 %v4309_v19, %v4307_v18 }
 0x52e   :  { %3907 = vrot.lane.b32.xlu1 %v3911_v20, %s4081_s7 }
 0x5a0   :  { %v3908_v23 = vpop.permute.xlu1 %3907 }
 0x5a1   :  { %v3910_v24 = vunpack.i.h.bf16 %v3908_v23  ;;  %v3909_v25 = vunpack.i.l.bf16 %v3908_v23 }
 0x5a3   :  { %v3645_v27 = vpack.c.bf16 %v3910_v24, %v3909_v25 }
 0x5a5   :  { %3647 = vmatprep.subr.msk.bf16.mxu1 %vm4318_vm5, %v3645_v27 }
 0x5a6   :  { %3650 = vmatpush3.bf16.xpose.msk.msra.mxu1 %vm4318_vm5, %v3645_v27 }
 0x5a7   :  { %3653 = vmatprep.subr.msk.bf16.mxu1 %vm4323_vm7, %v3651_v22 }
 0x5ad   :  { %3450 = vmatmul.mubr.msk.f32.vlgmr.msra.gmra.mrb[6].mxu1 %vm427_vm3, %v404_v15 }
 0x5ae   :  { %3656 = vmatpush3.bf16.msk.msra.mxu1 %vm4323_vm7, %v3651_v22 }
 0x680   :  { %v3451_v29 = vpop.f32.mrb[6].mxu1 }
 0x681   :  { %v514_v31 = vmul.f32 0.17677669, %v3451_v29  ;;  %v504_v32 = vpop.f32.mrb[7].mxu1 }
 0x682   :  { %v513_v34 = vmul.f32 0.17677669, %v504_v32 }
 0x683   :  { %v516_v35 = vadd.f32 %v514_v31, %v247_v30 }
 0x684   :  { %v515_v36 = vadd.f32 %v513_v34, %v246_v33  ;;  %v308_v34 = vld [vmem:[%s5379_s1 + $0x130] sm:$0xff] }
 0x685   :  { %v522_v37 = vsel %vm521_vm8, %v516_v35, -inf }
 0x686   :  { %523 = vmax.xlane.f32.xlu0 %v522_v37  ;;  %v518_v38 = vsel %vm517_vm9, %v515_v36, -inf  ;;  %v310_v37 = vld [vmem:[%s5379_s1 + $0x140] sm:$0xff] }
 0x687   :  { %519 = vmax.xlane.f32.xlu1 %v518_v38 }
 0x713   :  { %v524_v39 = vpop.xlane.xlu0 %523 }
 0x714   :  { %v526_v40 = vsub.f32 %v516_v35, %v524_v39  ;;  %v520_v41 = vpop.xlane.xlu1 %519  ;;  %v309_v35 = vld [vmem:[%s5379_s1 + $0x138] sm:$0xff]  ;;  %v311_v39 = vld [vmem:[%s5379_s1 + $0x148] sm:$0xff] }
 0x715   :  { %v525_v42 = vsub.f32 %v515_v36, %v520_v41  ;;  %v3673_v38 = vpack.c.bf16 %v310_v37, %v309_v35  ;;  %v4481_v35 = vld [vmem:[%s5379_s1 + $0x2a8] sm:$0xff] }
 0x716   :  { %v529_v43 = vmul.f32 1.442695, %v526_v40  ;;  %v312_v40 = vld [vmem:[%s5379_s1 + $0x150] sm:$0xff] }
 0x717   :  { %v527_v44 = vmul.f32 1.442695, %v525_v42  ;;  %v3677_v41 = vpack.c.bf16 %v312_v40, %v311_v39  ;;  %v313_v42 = vld [vmem:[%s5379_s1 + $0x158] sm:$0xff] }
 0x718   :  { %3944 = vpow2.f32 %v529_v43  ;;  %v314_v43 = vld [vmem:[%s5379_s1 + $0x160] sm:$0xff] }
 0x719   :  { %3946 = vpow2.f32 %v527_v44  ;;  %v3681_v44 = vpack.c.bf16 %v314_v43, %v313_v42 }
 0x722   :  { %v3945_v45 = vpop.eup %3944 }
 0x723   :  { %v3947_v46 = vpop.eup %3946  ;;  %v534_v47 = vsel %vm521_vm8, %v3945_v45, 0.0 }
 0x724   :  { %535 = vadd.xlane.f32.xlu1 %v534_v47  ;;  %v531_v48 = vsel %vm517_vm9, %v3947_v46, 0.0 }
 0x725   :  { %532 = vadd.xlane.f32.xlu0 %v531_v48 }
 0x735   :  { %626 = vrot.lane.b32.xlu1 %v403_v7, %s4083_s20 }
 0x739   :  { %628 = vrot.lane.b32.xlu1 %v404_v15, %s4083_s20 }
 0x73b   :  { %3912 = vrot.lane.b32.xlu0 %v3911_v20, %s4084_s0 }
 0x7b1   :  { %v536_v49 = vpop.xlane.xlu1 %535 }
 0x7b2   :  { %3948 = vrcp.f32 %v536_v49  ;;  %v533_v51 = vpop.xlane.xlu0 %532 }
 0x7b3   :  { %3950 = vrcp.f32 %v533_v51 }
 0x7b5   :  { %v627_v60 = vpop.permute.xlu1 %626 }
 0x7b6   :  { %v3913_v52 = vpop.permute.xlu0 %3912 }
 0x7b7   :  { %v3915_v53 = vunpack.i.h.bf16 %v3913_v52  ;;  %v3914_v54 = vunpack.i.l.bf16 %v3913_v52  ;;  %v3221_v52 = vld [vmem:[%s5379_s1 + $0x168] ss:$0 sm:$0xff] }
 0x7b9   :  { %v3657_v55 = vpack.c.bf16 %v3915_v53, %v3914_v54  ;;  %v629_v61 = vpop.permute.xlu1 %628 }
 0x7bb   :  { %3659 = vmatprep.subr.msk.bf16.mxu1 %vm4318_vm5, %v3657_v55 }
 0x7bc   :  { %v3949_v56 = vpop.eup %3948 }
 0x7bd   :  { %v3951_v57 = vpop.eup %3950  ;;  %v540_v59 = vmul.f32 %v3949_v56, %v3945_v45 }
 0x7be   :  { %v539_v58 = vmul.f32 %v3951_v57, %v3947_v46 }
 0x7c0   :  { %3456 = vmatprep.mubr.msk.f32.mxu1 %vm517_vm9, %v539_v58 }
 0x7c1   :  { %3457 = vmatmul.mubr.msk.f32.vlgmr.msra.gmra.mrb[8].mxu1 %vm517_vm9, %v540_v59 }
 0x7c2   :  { %3662 = vmatpush3.bf16.xpose.msk.msra.mxu1 %vm4318_vm5, %v3657_v55  ;;  %3463 = vmatprep.mubr.msk.f32.mxu1 %vm427_vm3, %v627_v60 }
 0x7c9   :  { %3464 = vmatmul.mubr.msk.f32.vlgmr.msra.gmra.mrb[10].mxu1 %vm427_vm3, %v629_v61 }
 0x894   :  { %v4357_v62 = vpop.f32.mrb[8].mxu1 }
 0x895   :  { %v4359_v63 = vpop.f32.mrb[9].mxu1 }
 0x89c   :  { %v3465_v0 = vpop.f32.mrb[10].mxu1 }
 0x89d   :  { %v718_v1 = vmul.f32 0.17677669, %v3465_v0  ;;  %v708_v2 = vpop.f32.mrb[11].mxu1 }
 0x89e   :  { %v717_v4 = vmul.f32 0.17677669, %v708_v2 }
 0x89f   :  { %v720_v5 = vadd.f32 %v718_v1, %v247_v30 }
 0x8a0   :  { %v719_v6 = vadd.f32 %v717_v4, %v246_v33  ;;  %v307_v33 = vld [vmem:[%s5379_s1 + $0x128] sm:$0xff] }
 0x8a1   :  { %v724_v7 = vsel %vm521_vm8, %v720_v5, -inf  ;;  %v3669_v36 = vpack.c.bf16 %v308_v34, %v307_v33  ;;  %v4476_v34 = vld [vmem:[%s5379_s1 + $0x2a0] sm:$0xff] }
 0x8a2   :  { %725 = vmax.xlane.f32.xlu0 %v724_v7  ;;  %v721_v8 = vsel %vm517_vm9, %v719_v6, -inf  ;;  %v972_v7 = vld [vmem:[%s5380_s2 + $0x98] sm:$0xff]  ;;  %v1537_v37 = vsel %vm44_vm0, %v4476_v34, 0.0 }
 0x8a3   :  { %722 = vmax.xlane.f32.xlu1 %v721_v8 }
 0x8b4   :  { %3917 = vrot.lane.b32.xlu1 %v3916_v21, %s4083_s20 }
 0x92f   :  { %v726_v9 = vpop.xlane.xlu0 %725 }
 0x930   :  { %v728_v11 = vsub.f32 %v720_v5, %v726_v9  ;;  %v723_v12 = vpop.xlane.xlu1 %722  ;;  %v969_v9 = vld [vmem:[%s5380_s2 + $0x80] sm:$0xff] }
 0x931   :  { %v727_v13 = vsub.f32 %v719_v6, %v723_v12  ;;  %v970_v6 = vld [vmem:[%s5380_s2 + $0x88] sm:$0xff] }
 0x932   :  { %v731_v15 = vmul.f32 1.442695, %v728_v11  ;;  %v3685_v8 = vpack.c.bf16 %v972_v7, %v970_v6  ;;  %v971_v11 = vld [vmem:[%s5380_s2 + $0x90] sm:$0xff]  ;;  %v1007_v6 = vld [vmem:[%s5379_s1 + $0x220] sm:$0xff]  ;;  %v1008_v7 = vld [vmem:[%s5379_s1 + $0x228] sm:$0xff] }
 0x933   :  { %v729_v16 = vmul.f32 1.442695, %v727_v13  ;;  %v3687_v12 = vpack.c.bf16 %v971_v11, %v969_v9  ;;  %v974_v13 = vld [vmem:[%s5380_s2 + $0xa8] sm:$0xff]  ;;  %v991_v9 = vld [vmem:[%s5379_s1 + $0x1a0] sm:$0xff] }
 0x934   :  { %v3918_v17 = vpop.permute.xlu1 %3917  ;;  %3686 = vmatprep.subr.bf16.mxu0 %v3685_v8  ;;  %v3709_v8 = vpack.c.bf16 %v1008_v7, %v1007_v6  ;;  %v992_v11 = vld [vmem:[%s5379_s1 + $0x1a8] sm:$0xff] }
 0x935   :  { %3952 = vpow2.f32 %v729_v16  ;;  %v3920_v20 = vunpack.i.h.bf16 %v3918_v17  ;;  %v3919_v22 = vunpack.i.l.bf16 %v3918_v17  ;;  %3688 = vmatpush1.bf16.msra.mxu0 %v3687_v12  ;;  %v973_v17 = vld [vmem:[%s5380_s2 + $0xa0] sm:$0xff]  ;;  %v3711_v12 = vpack.c.bf16 %v992_v11, %v991_v9 }
 0x936   :  { %3954 = vpow2.f32 %v731_v15  ;;  %v976_v15 = vld [vmem:[%s5380_s2 + $0xb8] sm:$0xff] }
 0x937   :  { %v3663_v23 = vpack.c.bf16 %v3920_v20, %v3919_v22  ;;  %v3689_v16 = vpack.c.bf16 %v976_v15, %v974_v13  ;;  %v975_v20 = vld [vmem:[%s5380_s2 + $0xb0] sm:$0xff]  ;;  %v1010_v15 = vld [vmem:[%s5379_s1 + $0x238] sm:$0xff] }
 0x938   :  { %v3691_v22 = vpack.c.bf16 %v975_v20, %v973_v17  ;;  %v1009_v13 = vld [vmem:[%s5379_s1 + $0x230] sm:$0xff]  ;;  %v994_v20 = vld [vmem:[%s5379_s1 + $0x1b8] sm:$0xff] }
 0x939   :  { %3665 = vmatprep.subr.msk.bf16.mxu1 %vm4323_vm7, %v3663_v23  ;;  %3690 = vmatprep.subr.bf16.mxu0 %v3689_v16  ;;  %v3713_v16 = vpack.c.bf16 %v1010_v15, %v1009_v13  ;;  %v993_v17 = vld [vmem:[%s5379_s1 + $0x1b0] sm:$0xff] }
 0x93a   :  { %3668 = vmatpush3.bf16.msk.msra.mxu1 %vm4323_vm7, %v3663_v23  ;;  %3692 = vmatpush1.bf16.msra.mxu0 %v3691_v22  ;;  %v978_v23 = vld [vmem:[%s5380_s2 + $0xc8] sm:$0xff]  ;;  %v3715_v22 = vpack.c.bf16 %v994_v20, %v993_v17 }
 0x93b   :  { %3670 = vmatprep.subr.bf16.mxu1 %v3669_v36 }
 0x93f   :  { %v3953_v18 = vpop.eup %3952 }
 0x940   :  { %v733_v19 = vsel %vm517_vm9, %v3953_v18, 0.0  ;;  %v3955_v21 = vpop.eup %3954 }
 0x941   :  { %734 = vadd.xlane.f32.xlu0 %v733_v19  ;;  %v736_v24 = vsel %vm521_vm8, %v3955_v21, 0.0 }
 0x945   :  { %737 = vadd.xlane.f32.xlu0 %v736_v24  ;;  %v979_v24 = vld [vmem:[%s5380_s2 + $0xd0] sm:$0xff] }
 0x9ce   :  { %v735_v25 = vpop.xlane.xlu0 %734 }
 0x9cf   :  { %3956 = vrcp.f32 %v735_v25 }
 0x9d2   :  { %v738_v27 = vpop.xlane.xlu0 %737 }
 0x9d3   :  { %3958 = vrcp.f32 %v738_v27  ;;  %v982_v27 = vld [vmem:[%s5380_s2 + $0xe8] sm:$0xff] }
 0x9d9   :  { %v3957_v29 = vpop.eup %3956 }
 0x9da   :  { %v741_v30 = vmul.f32 %v3957_v29, %v3953_v18  ;;  %v980_v18 = vld [vmem:[%s5380_s2 + $0xd8] sm:$0xff] }
 0x9db   :  { %v3693_v19 = vpack.c.bf16 %v980_v18, %v978_v23  ;;  %v984_v29 = vld [vmem:[%s5380_s2 + $0xf8] sm:$0xff]  ;;  %v1011_v23 = vld [vmem:[%s5379_s1 + $0x240] sm:$0xff]  ;;  %v1012_v18 = vld [vmem:[%s5379_s1 + $0x248] sm:$0xff] }
 0x9dc   :  { %3470 = vmatprep.mubr.msk.f32.mxu1 %vm517_vm9, %v741_v30  ;;  %v3697_v30 = vpack.c.bf16 %v984_v29, %v982_v27  ;;  %v1013_v27 = vld [vmem:[%s5379_s1 + $0x250] sm:$0xff]  ;;  %v1014_v29 = vld [vmem:[%s5379_s1 + $0x258] sm:$0xff] }
 0x9dd   :  { %v3959_v31 = vpop.eup %3958  ;;  %3694 = vmatprep.subr.bf16.mxu0 %v3693_v19  ;;  %v3717_v19 = vpack.c.bf16 %v1012_v18, %v1011_v23 }
 0x9de   :  { %v742_v32 = vmul.f32 %v3959_v31, %v3955_v21  ;;  %v977_v21 = vld [vmem:[%s5380_s2 + $0xc0] sm:$0xff] }
 0x9df   :  { %v3695_v25 = vpack.c.bf16 %v979_v24, %v977_v21  ;;  %v981_v31 = vld [vmem:[%s5380_s2 + $0xe0] sm:$0xff]  ;;  %v996_v24 = vld [vmem:[%s5379_s1 + $0x1c8] sm:$0xff] }
 0x9e0   :  { %3471 = vmatmul.mubr.msk.f32.vlgmr.msra.gmra.mrb[12].mxu1 %vm517_vm9, %v742_v32  ;;  %v983_v32 = vld [vmem:[%s5380_s2 + $0xf0] sm:$0xff]  ;;  %v995_v21 = vld [vmem:[%s5379_s1 + $0x1c0] sm:$0xff] }
 0x9e1   :  { %3672 = vmatpush3.bf16.msra.mxu1 %v3669_v36  ;;  %3696 = vmatpush1.bf16.msra.mxu0 %v3695_v25  ;;  %v3699_v33 = vpack.c.bf16 %v983_v32, %v981_v31  ;;  %v4486_v36 = vld [vmem:[%s5379_s1 + $0x2b0] sm:$0xff]  ;;  %v3719_v25 = vpack.c.bf16 %v996_v24, %v995_v21  ;;  %v998_v32 = vld [vmem:[%s5379_s1 + $0x1d8] sm:$0xff] }
 0x9e2   :  { %3674 = vmatprep.subr.bf16.mxu1 %v3673_v38  ;;  %3698 = vmatprep.subr.bf16.mxu0 %v3697_v30  ;;  %v1543_v39 = vsel %vm44_vm0, %v4486_v36, 0.0  ;;  %v3721_v30 = vpack.c.bf16 %v1014_v29, %v1013_v27  ;;  %v997_v31 = vld [vmem:[%s5379_s1 + $0x1d0] sm:$0xff] }
 0x9e5   :  { %3676 = vmatpush3.bf16.msra.mxu1 %v3673_v38  ;;  %3700 = vmatpush1.bf16.msra.mxu0 %v3699_v33  ;;  %v1540_v38 = vsel %vm44_vm0, %v4481_v35, 0.0  ;;  %v3723_v33 = vpack.c.bf16 %v998_v32, %v997_v31 }
 0x9e6   :  { %3678 = vmatprep.subr.bf16.mxu1 %v3677_v41  ;;  %3733 = vmatprep.subr.bf16.mxu0 %v4079_v3 }
 0x9e9   :  { %3680 = vmatpush3.bf16.msra.mxu1 %v3677_v41 }
 0x9ea   :  { %3682 = vmatprep.subr.bf16.mxu1 %v3681_v44 }
 0x9ed   :  { %3684 = vmatpush3.bf16.msra.mxu1 %v3681_v44 }
 0xab3   :  { %v3472_v45 = vpop.f32.mrb[12].mxu1 }
 0xab4   :  { %836 = vrot.lane.b32.xlu1 %v3472_v45, %s4084_s0  ;;  %v823_v46 = vpop.f32.mrb[13].mxu1 }
 0xab5   :  { %834 = vrot.lane.b32.xlu0 %v823_v46, %s4084_s0 }
 0xb26   :  { %v837_v47 = vpop.permute.xlu1 %836 }
 0xb27   :  { %v835_v48 = vpop.permute.xlu0 %834  ;;  %v841_v51 = vsel %vm427_vm3, %v4357_v62, %v837_v47 }
 0xb28   :  { %v840_v49 = vsel %vm427_vm3, %v4359_v63, %v835_v48  ;;  %v3224_v48 = vld [vmem:[%s5379_s1 + $0x170] ss:$0 sm:$0xff] }
 0xb29   :  { %3489 = vmatprep.mubr.msk.f32.mxu1 %vm44_vm0, %v840_v49 }
 0xb2a   :  { %3490 = vmatmul.mubr.msk.f32.vlgmr.msra.gmra.mrb[14].mxu1 %vm44_vm0, %v841_v51 }
 0xbfd   :  { %v3491_v53 = vpop.f32.mrb[14].mxu1 }
 0xbfe   :  { %v924_v54 = vadd.f32 %v3491_v53, %v3221_v52  ;;  %v918_v55 = vpop.f32.mrb[15].mxu1 }
 0xbff   :  { %v919_v56 = vadd.f32 %v3221_v52, %v918_v55  ;;  %v3225_v52 = vld [vmem:[%s5379_s1 + $0x178] ss:$0 sm:$0xff] }
 0xc00   :  { %v4411_v57 = vadd.f32 %v924_v54, %v4229_v14 }
 0xc01   :  { %v4414_v58 = vadd.f32 %v919_v56, %v4225_v10 }
 0xc02   :  { %v934_v59 = vsel %vm209_vm2, %v4411_v57, 0.0 }
 0xc03   :  { %935 = vadd.xlane.f32.xlu0 %v934_v59  ;;  %v931_v60 = vsel %vm44_vm0, %v4414_v58, 0.0  ;;  %v1003_v59 = vld [vmem:[%s5379_s1 + $0x200] sm:$0xff] }
 0xc04   :  { %932 = vadd.xlane.f32.xlu1 %v931_v60  ;;  %v1004_v60 = vld [vmem:[%s5379_s1 + $0x208] sm:$0xff] }
 0xc90   :  { %v936_v61 = vpop.xlane.xlu0 %935 }
 0xc91   :  { %v938_v62 = vmul.f32 0.015625, %v936_v61  ;;  %v933_v63 = vpop.xlane.xlu1 %932  ;;  %v3701_v61 = vpack.c.bf16 %v1004_v60, %v1003_v59 }
 0xc92   :  { %v937_v0 = vmul.f32 0.015625, %v933_v63  ;;  %v988_v63 = vld [vmem:[%s5379_s1 + $0x188] sm:$0xff] }
 0xc93   :  { %v940_v1 = vsub.f32 %v4411_v57, %v938_v62  ;;  %v987_v62 = vld [vmem:[%s5379_s1 + $0x180] sm:$0xff]  ;;  %3702 = vmatprep.subr.bf16.mxu1 %v3701_v61 }
 0xc94   :  { %v939_v14 = vsub.f32 %v4414_v58, %v937_v0  ;;  %v3703_v0 = vpack.c.bf16 %v988_v63, %v987_v62 }
 0xc95   :  { %v942_v2 = vmul.f32 %v940_v1, %v940_v1 }
 0xc96   :  { %v941_v4 = vmul.f32 %v939_v14, %v939_v14  ;;  %3704 = vmatpush3.bf16.msra.mxu1 %v3703_v0 }
 0xc97   :  { %v946_v10 = vsel %vm209_vm2, %v942_v2, 0.0 }
 0xc98   :  { %947 = vadd.xlane.f32.xlu1 %v946_v10  ;;  %v943_v5 = vsel %vm44_vm0, %v941_v4, 0.0  ;;  %v989_v4 = vld [vmem:[%s5379_s1 + $0x190] sm:$0xff]  ;;  %v990_v10 = vld [vmem:[%s5379_s1 + $0x198] sm:$0xff] }
 0xc99   :  { %944 = vadd.xlane.f32.xlu0 %v943_v5  ;;  %v3707_v5 = vpack.c.bf16 %v990_v10, %v989_v4 }
 0xc9c   :  { %1541 = vadd.xlane.f32.xlu1 %v1540_v38  ;;  %v1016_v38 = vld [vmem:[%s5379_s1 + $0x268] sm:$0xff] }
 0xc9d   :  { %1538 = vadd.xlane.f32.xlu0 %v1537_v37  ;;  %v1015_v37 = vld [vmem:[%s5379_s1 + $0x260] sm:$0xff] }
 0xca1   :  { %1544 = vadd.xlane.f32.xlu0 %v1543_v39  ;;  %v3725_v39 = vpack.c.bf16 %v1016_v38, %v1015_v37 }
 0xd25   :  { %v948_v40 = vpop.xlane.xlu1 %947 }
 0xd26   :  { %v950_v41 = vmul.f32 0.015625, %v948_v40  ;;  %v945_v42 = vpop.xlane.xlu0 %944  ;;  %v999_v40 = vld [vmem:[%s5379_s1 + $0x1e0] sm:$0xff] }
 0xd27   :  { %v949_v43 = vmul.f32 0.015625, %v945_v42 }
 0xd28   :  { %v952_v44 = vadd.f32 1e-05, %v950_v41  ;;  %v1000_v41 = vld [vmem:[%s5379_s1 + $0x1e8] sm:$0xff] }
 0xd29   :  { %v951_v45 = vadd.f32 1e-05, %v949_v43  ;;  %v3727_v42 = vpack.c.bf16 %v1000_v41, %v999_v40  ;;  %v1017_v43 = vld [vmem:[%s5379_s1 + $0x270] sm:$0xff] }
 0xd2a   :  { %3960 = vrsqrt.f32 %v952_v44  ;;  %v1018_v44 = vld [vmem:[%s5379_s1 + $0x278] sm:$0xff] }
 0xd2b   :  { %3962 = vrsqrt.f32 %v951_v45  ;;  %v3729_v45 = vpack.c.bf16 %v1018_v44, %v1017_v43 }
 0xd34   :  { %v3961_v46 = vpop.eup %3960 }
 0xd35   :  { %v3963_v47 = vpop.eup %3962  ;;  %v956_v51 = vmul.f32 %v3961_v46, %v940_v1  ;;  %v1005_v1 = vld [vmem:[%s5379_s1 + $0x210] sm:$0xff] }
 0xd36   :  { %v955_v49 = vmul.f32 %v3963_v47, %v939_v14  ;;  %v1006_v14 = vld [vmem:[%s5379_s1 + $0x218] sm:$0xff]  ;;  %v1001_v46 = vld [vmem:[%s5379_s1 + $0x1f0] sm:$0xff] }
 0xd37   :  { %v962_v55 = vmul.f32 %v3224_v48, %v956_v51  ;;  %v3705_v2 = vpack.c.bf16 %v1006_v14, %v1005_v1  ;;  %v1002_v47 = vld [vmem:[%s5379_s1 + $0x1f8] sm:$0xff]  ;;  %v1542_v51 = vpop.xlane.xlu1 %1541  ;;  %v1021_v1 = vlaneseq }
 0xd38   :  { %v961_v53 = vmul.f32 %v3224_v48, %v955_v49  ;;  %v3731_v48 = vpack.c.bf16 %v1002_v47, %v1001_v46  ;;  %v1539_v49 = vpop.xlane.xlu0 %1538  ;;  %v1591_v47 = vld [vmem:[%s5380_s2 + $0x118] sm:$0xff] }
 0xd39   :  { %v968_v56 = vadd.f32 %v3225_v52, %v962_v55  ;;  %3706 = vmatprep.subr.bf16.mxu1 %v3705_v2  ;;  %v4617_v14 = vshrl.u32 %v1021_v1, 7  ;;  %v1596_v1 = vld [vmem:[%s5380_s2 + $0x140] sm:$0xff] }
 0xd3a   :  { %v967_v54 = vadd.f32 %v3225_v52, %v961_v53  ;;  %3708 = vmatpush3.bf16.msra.mxu1 %v3707_v5  ;;  %v1546_v52 = vmul.f32 0.015625, %v1539_v49  ;;  %v1547_v53 = vmul.f32 0.015625, %v1542_v51  ;;  %v1593_v51 = vld [vmem:[%s5380_s2 + $0x128] sm:$0xff] }
 0xd3b   :  { %3710 = vmatprep.subr.bf16.mxu1 %v3709_v8  ;;  %v4620_v2 = vsub.s32 0, %v4617_v14  ;;  %v4626_v4 = vsub.s32 1, %v4617_v14 }
 0xd3c   :  { %3227 = vmatmul.mubr.msk.f32.vlgmr.msra.gmra.mrb[2].mxu0 %vm44_vm0, %v967_v54  ;;  %v4600_v54 = vsub.f32 %v4476_v34, %v1546_v52  ;;  %v4603_v55 = vsub.f32 %v4481_v35, %v1547_v53  ;;  %v1590_v52 = vld [vmem:[%s5380_s2 + $0x110] sm:$0xff]  ;;  %v1592_v53 = vld [vmem:[%s5380_s2 + $0x120] sm:$0xff] }
 0xd3d   :  { %1107 = vmatprep.mubr.f32.mxu0 %v4080_v50 }
 0xd3e   :  { %3712 = vmatpush3.bf16.msra.mxu1 %v3711_v12  ;;  %v1552_v59 = vmul.f32 %v4600_v54, %v4600_v54  ;;  %v1553_v61 = vmul.f32 %v4603_v55, %v4603_v55 }
 0xd3f   :  { %3714 = vmatprep.subr.bf16.mxu1 %v3713_v16 }
 0xd40   :  { %3228 = vmatmul.mubr.msk.f32.gmra.mrb[4].mxu0 %vm44_vm0, %v968_v56  ;;  %v1545_v56 = vpop.xlane.xlu0 %1544  ;;  %v1555_v62 = vsel %vm44_vm0, %v1552_v59, 0.0  ;;  %v1558_v0 = vsel %vm44_vm0, %v1553_v61, 0.0  ;;  %v3771_v59 = vpack.c.bf16 %v1592_v53, %v1590_v52  ;;  %v1597_v61 = vld [vmem:[%s5380_s2 + $0x148] sm:$0xff]  ;;  %v3248_v53 = vld [vmem:[%s5379_s1 + $0x2f0] ss:$0 sm:$0xff] }
 0xd41   :  { %v1548_v60 = vmul.f32 0.015625, %v1545_v56  ;;  %1556 = vadd.xlane.f32.xlu1 %v1555_v62  ;;  %1559 = vadd.xlane.f32.xlu0 %v1558_v0  ;;  %v3769_v56 = vpack.c.bf16 %v1593_v51, %v1591_v47  ;;  %v1594_v62 = vld [vmem:[%s5380_s2 + $0x130] sm:$0xff]  ;;  %v1227_v51 = vld [vmem:[%s5379_s1 + $0x288] sm:$0x3] }
 0xd42   :  { %3716 = vmatpush3.bf16.msra.mxu1 %v3715_v22  ;;  %3496 = vmatprep.mubr.msk.f32.mxu0 %vm4085_vm10, %v4080_v50 }
 0xd43   :  { %3718 = vmatprep.subr.bf16.mxu1 %v3717_v19  ;;  %v4611_v63 = vsub.f32 %v4486_v36, %v1548_v60  ;;  %v3226_v36 = vld [vmem:[%s5380_s2 + $0x100] ss:$8 sm:$0x3]  ;;  %v1595_v60 = vld [vmem:[%s5380_s2 + $0x138] sm:$0xff] }
 0xd44   :  { %v1024_v10 = vrot.slane %v3226_v36, %v4620_v2  ;;  %v1028_v5 = vrot.slane %v3226_v36, %v4626_v4  ;;  %v1599_v36 = vld [vmem:[%s5380_s2 + $0x158] sm:$0xff] }
 0xd45   :  { %v1554_v34 = vmul.f32 %v4611_v63, %v4611_v63 }
 0xd46   :  { %3720 = vmatpush3.bf16.msra.mxu1 %v3719_v25 }
 0xd47   :  { %3722 = vmatprep.subr.bf16.mxu1 %v3721_v30  ;;  %v1561_v35 = vsel %vm44_vm0, %v1554_v34, 0.0 }
 0xd48   :  { %1562 = vadd.xlane.f32.xlu1 %v1561_v35  ;;  %v3773_v35 = vpack.c.bf16 %v1597_v61, %v1595_v60 }
 0xd4a   :  { %3724 = vmatpush3.bf16.msra.mxu1 %v3723_v33 }
 0xd4b   :  { %3726 = vmatprep.subr.bf16.mxu1 %v3725_v39 }
 0xd4e   :  { %3728 = vmatpush3.bf16.msra.mxu1 %v3727_v42 }
 0xd4f   :  { %3730 = vmatprep.subr.bf16.mxu1 %v3729_v45 }
 0xd52   :  { %3732 = vmatpush3.bf16.msra.mxu1 %v3731_v48 }
 0xd53   :  { %3770 = vmatprep.subr.bf16.mxu1 %v3769_v56 }
 0xdce   :  { %v1557_v45 = vpop.xlane.xlu1 %1556  ;;  %v1560_v46 = vpop.xlane.xlu0 %1559 }
 0xdcf   :  { %v1564_v48 = vmul.f32 0.015625, %v1557_v45  ;;  %v1565_v49 = vmul.f32 0.015625, %v1560_v46 }
 0xdd1   :  { %v1567_v0 = vadd.f32 1e-05, %v1564_v48  ;;  %v1568_v34 = vadd.f32 1e-05, %v1565_v49 }
 0xe0f   :  { %v1103_v6 = vpop.f32.mrb[2].mxu0 }
 0xe10   :  { %v1104_v7 = vadd.f32 %v1103_v6, %v1024_v10  ;;  %v1105_v8 = vpop.f32.mrb[3].mxu0 }
 0xe11   :  { %v1106_v9 = vadd.f32 %v1105_v8, %v1028_v5 }
 0xe12   :  { %v3229_v11 = vmul.f32 -1.702, %v1104_v7 }
 0xe13   :  { %v3230_v12 = vmul.f32 -1.702, %v1106_v9  ;;  %v1109_v13 = vpop.f32.mrb[4].mxu0 }
 0xe14   :  { %v1122_v15 = vmul.f32 1.442695, %v3229_v11  ;;  %v1110_v16 = vadd.f32 %v1109_v13, %v1024_v10  ;;  %v1111_v17 = vpop.f32.mrb[5].mxu0  ;;  %v1563_v10 = vpop.xlane.xlu1 %1562  ;;  %v1600_v11 = vld [vmem:[%s5380_s2 + $0x160] sm:$0xff] }
 0xe15   :  { %v1124_v20 = vmul.f32 1.442695, %v3230_v12  ;;  %v1112_v22 = vadd.f32 %v1111_v17, %v1028_v5  ;;  %v1601_v5 = vld [vmem:[%s5380_s2 + $0x168] sm:$0xff]  ;;  %v1566_v6 = vmul.f32 0.015625, %v1563_v10 }
 0xe16   :  { %3964 = vpow2.f32 %v1122_v15  ;;  %v3231_v23 = vmul.f32 -1.702, %v1110_v16  ;;  %v3777_v8 = vpack.c.bf16 %v1601_v5, %v1599_v36  ;;  %v3247_v12 = vld [vmem:[%s5379_s1 + $0x2e8] ss:$0 sm:$0xff]  ;;  %v1603_v15 = vld [vmem:[%s5380_s2 + $0x178] sm:$0xff] }
 0xe17   :  { %3966 = vpow2.f32 %v1124_v20  ;;  %v3232_v18 = vmul.f32 -1.702, %v1112_v22  ;;  %v1569_v13 = vadd.f32 1e-05, %v1566_v6  ;;  %1722 = vrot.lane.b32.xlu1 %v3247_v12, %s4081_s7 }
 0xe18   :  { %v1126_v19 = vmul.f32 1.442695, %v3231_v23  ;;  %v1604_v23 = vld [vmem:[%s5380_s2 + $0x180] sm:$0xff] }
 0xe19   :  { %v1128_v21 = vmul.f32 1.442695, %v3232_v18 }
 0xe1a   :  { %3968 = vpow2.f32 %v1126_v19 }
 0xe1b   :  { %3970 = vpow2.f32 %v1128_v21  ;;  %v3241_v21 = vld [vmem:[%s5379_s1 + $0x2d0] ss:$0 sm:$0xff] }
 0xe20   :  { %v3965_v24 = vpop.eup %3964 }
 0xe21   :  { %v3967_v25 = vpop.eup %3966  ;;  %v1130_v27 = vadd.f32 1.0, %v3965_v24 }
 0xe22   :  { %v1131_v29 = vadd.f32 1.0, %v3967_v25 }
 0xe23   :  { %3972 = vrcp.f32 %v1130_v27  ;;  %v3242_v27 = vld [vmem:[%s5379_s1 + $0x2d8] ss:$0 sm:$0xff] }
 0xe24   :  { %v3969_v30 = vpop.eup %3968  ;;  %3974 = vrcp.f32 %v1131_v29 }
 0xe25   :  { %v3971_v31 = vpop.eup %3970  ;;  %v1132_v32 = vadd.f32 1.0, %v3969_v30 }
 0xe26   :  { %v1133_v33 = vadd.f32 1.0, %v3971_v31 }
 0xe27   :  { %3976 = vrcp.f32 %v1132_v32 }
 0xe28   :  { %3978 = vrcp.f32 %v1133_v33 }
 0xe29   :  { %3980 = vrsqrt.f32 %v1567_v0 }
 0xe2a   :  { %3982 = vrsqrt.f32 %v1568_v34 }
 0xe2b   :  { %3984 = vrsqrt.f32 %v1569_v13 }
 0xe2d   :  { %v3973_v37 = vpop.eup %3972 }
 0xe2e   :  { %v3975_v38 = vpop.eup %3974  ;;  %v1142_v40 = vmul.f32 %v3973_v37, %v1104_v7  ;;  %v3775_v7 = vpack.c.bf16 %v1596_v1, %v1594_v62 }
 0xe2f   :  { %v1143_v39 = vmul.f32 %v3975_v38, %v1106_v9  ;;  %v1598_v9 = vld [vmem:[%s5380_s2 + $0x150] sm:$0xff] }
 0xe30   :  { %v3779_v17 = vpack.c.bf16 %v1600_v11, %v1598_v9 }
 0xe31   :  { %v3977_v41 = vpop.eup %3976  ;;  %1214 = vmatprep.mubr.f32.mxu1 %v1143_v39 }
 0xe32   :  { %v3979_v42 = vpop.eup %3978  ;;  %1215 = vmatmul.mubr.f32.vlgmr.msra.gmra.mrb[16].mxu1 %v1142_v40  ;;  %v1144_v44 = vmul.f32 %v3977_v41, %v1110_v16  ;;  %v1605_v16 = vld [vmem:[%s5380_s2 + $0x188] sm:$0xff] }
 0xe33   :  { %v1145_v43 = vmul.f32 %v3979_v42, %v1112_v22  ;;  %3772 = vmatpush1.bf16.msra.mxu1 %v3771_v59  ;;  %v3781_v20 = vpack.c.bf16 %v1605_v16, %v1603_v15  ;;  %v1602_v22 = vld [vmem:[%s5380_s2 + $0x170] sm:$0xff]  ;;  %v3981_v19 = vpop.eup %3980 }
 0xe34   :  { %3774 = vmatprep.subr.bf16.mxu1 %v3773_v35  ;;  %v3783_v18 = vpack.c.bf16 %v1604_v23, %v1602_v22  ;;  %v3983_v24 = vpop.eup %3982  ;;  %v1573_v25 = vmul.f32 %v3981_v19, %v4600_v54  ;;  %v1330_v23 = vld [vmem:[%s5381_s3 + $0x8] sm:$0xff] }
 0xe35   :  { %1219 = vmatprep.mubr.f32.mxu1 %v1145_v43  ;;  %v1574_v29 = vmul.f32 %v3983_v24, %v4603_v55  ;;  %v3985_v31 = vpop.eup %3984  ;;  %v1333_v24 = vld [vmem:[%s5381_s3 + $0x20] sm:$0xff] }
 0xe36   :  { %1220 = vmatmul.mubr.f32.gmra.mrb[18].mxu1 %v1144_v44  ;;  %v1580_v30 = vmul.f32 %v3241_v21, %v1573_v25  ;;  %v1575_v37 = vmul.f32 %v3985_v31, %v4611_v63  ;;  %v3233_v63 = vld [vmem:[%s5379_s1 + $0x280] ss:$0 sm:$0xff] }
 0xe37   :  { %1691 = vmatprep.mubr.f32.mxu1 %v4080_v50  ;;  %3776 = vmatpush1.bf16.msra.mxu1 %v3775_v7  ;;  %v1581_v32 = vmul.f32 %v3241_v21, %v1574_v29  ;;  %v1342_v29 = vld [vmem:[%s5381_s3 + $0x68] sm:$0xff]  ;;  %v1337_v31 = vld [vmem:[%s5381_s3 + $0x40] sm:$0xff] }
 0xe38   :  { %3778 = vmatprep.subr.bf16.mxu1 %v3777_v8  ;;  %v1587_v33 = vadd.f32 %v3242_v27, %v1580_v30  ;;  %v1582_v39 = vmul.f32 %v3241_v21, %v1575_v37  ;;  %v1329_v21 = vld [vmem:[%s5381_s3] sm:$0xff]  ;;  %v1346_v37 = vld [vmem:[%s5381_s3 + $0x88] sm:$0xff] }
 0xe39   :  { %v1588_v38 = vadd.f32 %v3242_v27, %v1581_v32  ;;  %v3739_v25 = vpack.c.bf16 %v1333_v24, %v1329_v21  ;;  %v1341_v32 = vld [vmem:[%s5381_s3 + $0x60] sm:$0xff]  ;;  %v1355_v21 = vld [vmem:[%s5381_s3 + $0xd0] sm:$0xff] }
 0xe3a   :  { %v1589_v54 = vadd.f32 %v3242_v27, %v1582_v39  ;;  %v1338_v27 = vld [vmem:[%s5381_s3 + $0x48] sm:$0xff]  ;;  %v1359_v24 = vld [vmem:[%s5381_s3 + $0xf0] sm:$0xff] }
 0xe3b   :  { %3780 = vmatpush1.bf16.msra.mxu1 %v3779_v17  ;;  %v3741_v30 = vpack.c.bf16 %v1342_v29, %v1338_v27 }
 0xe3c   :  { %3782 = vmatprep.subr.bf16.mxu1 %v3781_v20 }
 0xe3f   :  { %3784 = vmatpush1.bf16.msra.mxu1 %v3783_v18  ;;  %v1334_v18 = vld [vmem:[%s5381_s3 + $0x28] sm:$0xff] }
 0xe40   :  { %3789 = vmatprep.subr.bf16.mxu1 %v4079_v3  ;;  %v3737_v19 = vpack.c.bf16 %v1334_v18, %v1330_v23  ;;  %v1360_v23 = vld [vmem:[%s5381_s3 + $0xf8] sm:$0xff] }
 0xe42   :  { %3243 = vmatmul.mubr.msk.f32.vlgmr.msra.gmra.mrb[20].mxu1 %vm44_vm0, %v1587_v33  ;;  %v3743_v33 = vpack.c.bf16 %v1341_v32, %v1337_v31 }
 0xe43   :  { %1697 = vmatprep.mubr.f32.mxu1 %v4080_v50 }
 0xe46   :  { %3244 = vmatmul.mubr.msk.f32.gmra.mrb[22].mxu1 %vm44_vm0, %v1588_v38  ;;  %v1350_v38 = vld [vmem:[%s5381_s3 + $0xa8] sm:$0xff] }
 0xe47   :  { %1703 = vmatprep.mubr.f32.mxu1 %v4080_v50  ;;  %v3745_v39 = vpack.c.bf16 %v1350_v38, %v1346_v37 }
 0xe4a   :  { %3245 = vmatmul.mubr.msk.f32.gmra.mrb[24].mxu1 %vm44_vm0, %v1589_v54  ;;  %v1345_v54 = vld [vmem:[%s5381_s3 + $0x80] sm:$0xff] }
 0xe4b   :  { %3520 = vmatprep.mubr.msk.f32.mxu1 %vm4085_vm10, %v4080_v50 }
 0xe89   :  { %v1723_v56 = vpop.permute.xlu1 %1722 }
 0xf05   :  { %v3351_v55 = vpop.f32.mrb[16].mxu1 }
 0xf06   :  { %v3352_v40 = vpop.f32.mrb[17].mxu1 }
 0xf07   :  { %v3353_v41 = vadd.f32 %v3352_v40, %v3351_v55  ;;  %v1349_v55 = vld [vmem:[%s5381_s3 + $0xa0] sm:$0xff] }
 0xf08   :  { %v3747_v40 = vpack.c.bf16 %v1349_v55, %v1345_v54 }
 0xf09   :  { %v3354_v42 = vpop.f32.mrb[18].mxu1  ;;  %v1217_v44 = vadd.f32 %v3353_v41, %v3233_v63  ;;  %v1354_v41 = vld [vmem:[%s5381_s3 + $0xc8] sm:$0xff] }
 0xf0a   :  { %v3355_v43 = vpop.f32.mrb[19].mxu1 }
 0xf0b   :  { %v3356_v45 = vadd.f32 %v3355_v43, %v3354_v42  ;;  %v1225_v47 = vadd.f32 %v1217_v44, %v4414_v58  ;;  %v1353_v43 = vld [vmem:[%s5381_s3 + $0xc0] sm:$0xff] }
 0xf0c   :  { %v1357_v44 = vld [vmem:[%s5381_s3 + $0xe0] sm:$0xff] }
 0xf0d   :  { %v1222_v46 = vadd.f32 %v3356_v45, %v3233_v63  ;;  %v1358_v63 = vld [vmem:[%s5381_s3 + $0xe8] sm:$0xff]  ;;  %v3751_v45 = vpack.c.bf16 %v1357_v44, %v1353_v43 }
 0xf0e   :  { %v3749_v42 = vpack.c.bf16 %v1358_v63, %v1354_v41 }
 0xf0f   :  { %v1226_v48 = vadd.f32 %v1222_v46, %v4411_v57  ;;  %v1332_v46 = vld [vmem:[%s5381_s3 + $0x18] sm:$0xff] }
 0xf11   :  { %v3734_v49 = vpack.c.bf16 %v1226_v48, %v1225_v47  ;;  %v1336_v47 = vld [vmem:[%s5381_s3 + $0x38] sm:$0xff] }
 0xf12   :  { %v3753_v48 = vpack.c.bf16 %v1336_v47, %v1332_v46  ;;  %v1533_v47 = vld [vmem:[%s5379_s1 + $0x2c0] sm:$0xff] }
 0xf13   :  { %3736 = vmatpush3.bf16.msk.msra.mxu0 %vm4323_vm7, %v3734_v49 }
 0xf14   :  { %3738 = vmatprep.subr.bf16.mxu0 %v3737_v19 }
 0xf15   :  { %v1693_v52 = vpop.f32.mrb[20].mxu1 }
 0xf16   :  { %3497 = vmatmul.mubr.msk.f32.vlgmr.msra.gmra.mrb[6].mxu0 %vm517_vm9, %v1227_v51  ;;  %v1695_v58 = vpop.f32.mrb[21].mxu1  ;;  %v1725_v57 = vadd.f32 %v1723_v56, %v1693_v52  ;;  %v4737_v8 = vadd.f32 %v3246_v28, %v1693_v52 }
 0xf17   :  { %1451 = vmatprep.mubr.f32.mxu0 %v4080_v50  ;;  %v4720_v59 = vadd.f32 %v3248_v53, %v1695_v58  ;;  %3740 = vmatpush1.bf16.msra.mxu0 %v3739_v25  ;;  %v3236_v58 = vld [vmem:[%s5379_s1 + $0x290] ss:$0 sm:$0xff]  ;;  %v3767_v25 = vpack.c.bf16 %v1359_v24, %v1355_v21 }
 0xf18   :  { %3742 = vmatprep.subr.bf16.mxu0 %v3741_v30 }
 0xf19   :  { %v1699_v60 = vpop.f32.mrb[22].mxu1 }
 0xf1a   :  { %v4722_v61 = vadd.f32 %v3246_v28, %v1699_v60  ;;  %v1701_v62 = vpop.f32.mrb[23].mxu1  ;;  %v1726_v0 = vadd.f32 %v1723_v56, %v1699_v60  ;;  %v3237_v60 = vld [vmem:[%s5379_s1 + $0x298] ss:$0 sm:$0xff] }
 0xf1b   :  { %v4724_v34 = vadd.f32 %v3248_v53, %v1701_v62  ;;  %3744 = vmatpush1.bf16.msra.mxu0 %v3743_v33  ;;  %v1340_v62 = vld [vmem:[%s5381_s3 + $0x58] sm:$0xff] }
 0xf1c   :  { %v3926_v35 = vpack.i.bf16 %v1726_v0, %v1725_v57  ;;  %3746 = vmatprep.subr.bf16.mxu0 %v3745_v39  ;;  %v1331_v57 = vld [vmem:[%s5381_s3 + $0x10] sm:$0xff]  ;;  %v1344_v0 = vld [vmem:[%s5381_s3 + $0x78] sm:$0xff] }
 0xf1d   :  { %v3931_v1 = vpack.i.bf16 %v4724_v34, %v4720_v59  ;;  %v3790_v36 = vpack.c.bf16 %v4724_v34, %v4720_v59  ;;  %v1705_v10 = vpop.f32.mrb[24].mxu1 }
 0xf1e   :  { %v1727_v5 = vadd.f32 %v1723_v56, %v1705_v10  ;;  %v1707_v6 = vpop.f32.mrb[25].mxu1  ;;  %v4740_v9 = vadd.f32 %v3246_v28, %v1705_v10  ;;  %v1335_v28 = vld [vmem:[%s5381_s3 + $0x30] sm:$0xff] }
 0xf1f   :  { %3791 = vmatpush3.bf16.msra.mxu1 %v3790_v36  ;;  %v4730_v7 = vadd.f32 %v3248_v53, %v1707_v6  ;;  %3748 = vmatpush1.bf16.msra.mxu0 %v3747_v40  ;;  %v3755_v36 = vpack.c.bf16 %v1335_v28, %v1331_v57  ;;  %v1339_v6 = vld [vmem:[%s5381_s3 + $0x50] sm:$0xff] }
 0xf20   :  { %1742 = vrot.lane.b32.xlu1 %v1727_v5, %s4081_s7  ;;  %3518 = vmatprep.subr.mxu1 %v4080_v50 }
 0xf21   :  { %3750 = vmatprep.subr.bf16.mxu0 %v3749_v42  ;;  %v1532_v42 = vld [vmem:[%s5379_s1 + $0x2b8] sm:$0xff] }
 0xf23   :  { %3519 = vmatpush3.msra.mxu1 %v4730_v7  ;;  %3752 = vmatpush1.bf16.msra.mxu0 %v3751_v45 }
 0xf24   :  { %3927 = vrot.lane.b32.xlu1 %v3926_v35, %s4084_s0  ;;  %3796 = vmatprep.subr.bf16.mxu1 %v4079_v3 }
 0xf25   :  { %3754 = vmatprep.subr.bf16.mxu0 %v3753_v48 }
 0xf28   :  { %1978 = vrot.lane.b32.xlu1 %v1727_v5, %s4084_s0  ;;  %v3757_v5 = vpack.c.bf16 %v1344_v0, %v1340_v62 }
 0xf2c   :  { %1968 = vrot.lane.b32.xlu1 %v4737_v8, %s4083_s20 }
 0xf30   :  { %1972 = vrot.lane.b32.xlu1 %v4740_v9, %s4083_s20 }
 0xf92   :  { %v1743_v32 = vpop.permute.xlu1 %1742 }
 0xf96   :  { %v3928_v33 = vpop.permute.xlu1 %3927 }
 0xf97   :  { %v3930_v37 = vunpack.i.h.bf16 %v3928_v33  ;;  %v3929_v38 = vunpack.i.l.bf16 %v3928_v33 }
 0xf99   :  { %v3793_v39 = vpack.c.bf16 %v3930_v37, %v3929_v38 }
 0xf9a   :  { %v1979_v54 = vpop.permute.xlu1 %1978 }
 0xf9e   :  { %v1969_v26 = vpop.permute.xlu1 %1968 }
 0xfe9   :  { %v1300_v11 = vpop.f32.mrb[6].mxu0 }
 0xfea   :  { %v3498_v12 = vpop.f32.mrb[7].mxu0  ;;  %v1306_v13 = vsel %vm209_vm2, %v1300_v11, 0.0 }
 0xfeb   :  { %1307 = vadd.xlane.f32.xlu0 %v1306_v13  ;;  %v1348_v12 = vld [vmem:[%s5381_s3 + $0x98] sm:$0xff] }
 0xfec   :  { %v1352_v13 = vld [vmem:[%s5381_s3 + $0xb8] sm:$0xff] }
0x1078   :  { %v1308_v15 = vpop.xlane.xlu0 %1307 }
0x1079   :  { %v1309_v16 = vmul.f32 0.015625, %v1308_v15 }
0x107b   :  { %v1310_v17 = vsub.f32 %v1300_v11, %v1309_v16  ;;  %v1343_v11 = vld [vmem:[%s5381_s3 + $0x70] sm:$0xff]  ;;  %v3761_v16 = vpack.c.bf16 %v1352_v13, %v1348_v12 }
0x107c   :  { %v3759_v15 = vpack.c.bf16 %v1343_v11, %v1339_v6 }
0x107d   :  { %v1311_v20 = vmul.f32 %v1310_v17, %v1310_v17 }
0x107f   :  { %v1312_v22 = vsel %vm209_vm2, %v1311_v20, 0.0  ;;  %v1351_v20 = vld [vmem:[%s5381_s3 + $0xb0] sm:$0xff] }
0x1080   :  { %1313 = vadd.xlane.f32.xlu0 %v1312_v22  ;;  %v1356_v22 = vld [vmem:[%s5381_s3 + $0xd8] sm:$0xff] }
0x1081   :  { %v3765_v19 = vpack.c.bf16 %v1360_v23, %v1356_v22 }
0x1096   :  { %3922 = vrot.lane.b32.xlu0 %v3926_v35, %s4081_s7 }
0x109a   :  { %1970 = vrot.lane.b32.xlu0 %v4722_v61, %s4083_s20 }
0x110d   :  { %v1314_v49 = vpop.xlane.xlu0 %1313 }
0x110e   :  { %v1315_v51 = vmul.f32 0.015625, %v1314_v49 }
0x1110   :  { %v1316_v52 = vadd.f32 1e-05, %v1315_v51 }
0x1111   :  { %v3923_v27 = vpop.permute.xlu0 %3922 }
0x1112   :  { %3986 = vrsqrt.f32 %v1316_v52  ;;  %v3925_v29 = vunpack.i.h.bf16 %v3923_v27  ;;  %v3924_v30 = vunpack.i.l.bf16 %v3923_v27 }
0x1114   :  { %v3786_v31 = vpack.c.bf16 %v3925_v29, %v3924_v30 }
0x111c   :  { %v3987_v53 = vpop.eup %3986 }
0x111d   :  { %v1318_v56 = vmul.f32 %v3987_v53, %v1310_v17  ;;  %v1347_v17 = vld [vmem:[%s5381_s3 + $0x90] sm:$0xff] }
0x111e   :  { %v3763_v18 = vpack.c.bf16 %v1351_v20, %v1347_v17 }
0x111f   :  { %v1323_v35 = vmul.f32 %v3236_v58, %v1318_v56  ;;  %v1534_v58 = vld [vmem:[%s5379_s1 + $0x2c8] sm:$0xff] }
0x1121   :  { %v1328_v10 = vadd.f32 %v3237_v60, %v1323_v35 }
0x1123   :  { %3239 = vmatmul.mubr.msk.f32.vlgmr.msra.gmra.mrb[8].mxu0 %vm44_vm0, %v1328_v10 }
0x1124   :  { %3756 = vmatpush1.bf16.msra.mxu0 %v3755_v36  ;;  %1522 = vmatprep.mubr.f32.mxu0 %v4080_v50 }
0x1125   :  { %3758 = vmatprep.subr.bf16.mxu0 %v3757_v5 }
0x1128   :  { %3760 = vmatpush1.bf16.msra.mxu0 %v3759_v15 }
0x1129   :  { %3762 = vmatprep.subr.bf16.mxu0 %v3761_v16 }
0x112c   :  { %3764 = vmatpush1.bf16.msra.mxu0 %v3763_v18 }
0x112d   :  { %3766 = vmatprep.subr.bf16.mxu0 %v3765_v19 }
0x1130   :  { %3768 = vmatpush1.bf16.msra.mxu0 %v3767_v25 }
0x1131   :  { %3785 = vmatprep.subr.bf16.mxu0 %v4079_v3 }
0x1133   :  { %3240 = vmatmul.mubr.msk.f32.vlgmr.msra.gmra.mrb[10].mxu0 %vm44_vm0, %v1328_v10 }
0x1134   :  { %3505 = vmatprep.mubr.msk.f32.mxu0 %vm4085_vm10, %v4080_v50 }
0x1139   :  { %3788 = vmatpush3.bf16.xpose.msk.msra.mxu0 %vm4318_vm5, %v3786_v31 }
0x113a   :  { %3503 = vmatprep.subr.mxu0 %v4080_v50 }
0x1141   :  { %3504 = vmatpush3.xpose.msk.msra.mxu0 %vm427_vm3, %v1743_v32 }
0x1142   :  { %3792 = vmatprep.subr.bf16.mxu0 %v4079_v3 }
0x1144   :  { %3506 = vmatmul.mubr.msk.f32.vlgmr.msra.gmra.mrb[12].mxu0 %vm427_vm3, %v4737_v8  ;;  %v1973_v8 = vpop.permute.xlu1 %1972 }
0x1145   :  { %3795 = vmatpush3.bf16.xpose.msk.msra.mxu0 %vm4318_vm5, %v3793_v39  ;;  %3508 = vmatprep.mubr.msk.f32.mxu0 %vm4085_vm10, %v4080_v50 }
0x1146   :  { %3533 = vmatprep.subr.mxu0 %v4080_v50 }
0x1148   :  { %3509 = vmatmul.mubr.msk.f32.gmra.mrb[14].mxu0 %vm427_vm3, %v4722_v61  ;;  %v1971_v61 = vpop.permute.xlu0 %1970 }
0x1149   :  { %3511 = vmatprep.mubr.msk.f32.mxu0 %vm4085_vm10, %v4080_v50 }
0x114c   :  { %3512 = vmatmul.mubr.msk.f32.gmra.mrb[16].mxu0 %vm427_vm3, %v4740_v9 }
0x114d   :  { %3534 = vmatpush3.xpose.msk.msra.mxu0 %vm427_vm3, %v1979_v54  ;;  %3535 = vmatprep.mubr.msk.f32.mxu0 %vm4085_vm10, %v4080_v50 }
0x114e   :  { %3799 = vmatprep.subr.bf16.mxu0 %v4079_v3 }
0x1150   :  { %3536 = vmatmul.mubr.msk.f32.vlgmr.msra.gmra.mrb[18].mxu0 %vm427_vm3, %v1969_v26 }
0x1151   :  { %3538 = vmatprep.mubr.msk.f32.mxu0 %vm4085_vm10, %v4080_v50 }
0x1154   :  { %3539 = vmatmul.mubr.msk.f32.gmra.mrb[20].mxu0 %vm427_vm3, %v1971_v61 }
0x1155   :  { %3541 = vmatprep.mubr.msk.f32.mxu0 %vm4085_vm10, %v4080_v50 }
0x1158   :  { %3542 = vmatmul.mubr.msk.f32.gmra.mrb[22].mxu0 %vm427_vm3, %v1973_v8 }
0x1159   :  { %3575 = vmatprep.mubr.msk.f32.mxu0 %vm4085_vm10, %v4080_v50 }
0x11f6   :  { %v4890_v9 = vpop.f32.mrb[8].mxu0 }
0x11f7   :  { %v4892_v55 = vpop.f32.mrb[9].mxu0 }
0x1206   :  { %v4894_v40 = vpop.f32.mrb[10].mxu0 }
0x1207   :  { %v4896_v41 = vpop.f32.mrb[11].mxu0 }
0x1217   :  { %v1825_v63 = vpop.f32.mrb[12].mxu0 }
0x1218   :  { %v1839_v43 = vmul.f32 0.17677669, %v1825_v63  ;;  %v3507_v44 = vpop.f32.mrb[13].mxu0 }
0x121a   :  { %v1842_v45 = vadd.f32 %v1839_v43, %v1532_v42 }
0x121b   :  { %v1830_v46 = vpop.f32.mrb[14].mxu0 }
0x121c   :  { %v1840_v48 = vmul.f32 0.17677669, %v1830_v46  ;;  %v3510_v49 = vpop.f32.mrb[15].mxu0  ;;  %v1846_v51 = vsel %vm1845_vm11, %v1842_v45, -inf }
0x121d   :  { %1847 = vmax.xlane.f32.xlu0 %v1846_v51 }
0x121e   :  { %v1843_v52 = vadd.f32 %v1840_v48, %v1533_v47 }
0x121f   :  { %v1835_v53 = vpop.f32.mrb[16].mxu0 }
0x1220   :  { %v1841_v56 = vmul.f32 0.17677669, %v1835_v53  ;;  %v3513_v57 = vpop.f32.mrb[17].mxu0  ;;  %v1849_v28 = vsel %vm1845_vm11, %v1843_v52, -inf }
0x1221   :  { %1850 = vmax.xlane.f32.xlu1 %v1849_v28 }
0x1222   :  { %v1844_v60 = vadd.f32 %v1841_v56, %v1534_v58 }
0x1223   :  { %v2058_v62 = vpop.f32.mrb[18].mxu0 }
0x1224   :  { %v2072_v0 = vmul.f32 0.17677669, %v2058_v62  ;;  %v3537_v35 = vpop.f32.mrb[19].mxu0  ;;  %v1852_v36 = vsel %vm1845_vm11, %v1844_v60, -inf }
0x1225   :  { %1853 = vmax.xlane.f32.xlu0 %v1852_v36 }
0x1226   :  { %v2075_v10 = vadd.f32 %v2072_v0, %v1532_v42 }
0x1227   :  { %v2063_v5 = vpop.f32.mrb[20].mxu0 }
0x1228   :  { %v2073_v6 = vmul.f32 0.17677669, %v2063_v5  ;;  %v3540_v11 = vpop.f32.mrb[21].mxu0  ;;  %v2078_v12 = vsel %vm1845_vm11, %v2075_v10, -inf }
0x1229   :  { %2079 = vmax.xlane.f32.xlu0 %v2078_v12 }
0x122a   :  { %v2076_v13 = vadd.f32 %v2073_v6, %v1533_v47 }
0x122b   :  { %v2068_v15 = vpop.f32.mrb[22].mxu0 }
0x122c   :  { %v2074_v16 = vmul.f32 0.17677669, %v2068_v15  ;;  %v3543_v17 = vpop.f32.mrb[23].mxu0  ;;  %v2081_v20 = vsel %vm1845_vm11, %v2076_v13, -inf }
0x122d   :  { %2082 = vmax.xlane.f32.xlu0 %v2081_v20 }
0x122e   :  { %v2077_v22 = vadd.f32 %v2074_v16, %v1534_v58 }
0x1230   :  { %v2084_v23 = vsel %vm1845_vm11, %v2077_v22, -inf }
0x1231   :  { %2085 = vmax.xlane.f32.xlu1 %v2084_v23  ;;  %v1610_v23 = vld [vmem:[%s5379_s1 + $0x300] sm:$0xff] }
0x12aa   :  { %v1848_v18 = vpop.xlane.xlu0 %1847 }
0x12ab   :  { %v1855_v19 = vsub.f32 %v1842_v45, %v1848_v18  ;;  %v1611_v18 = vld [vmem:[%s5379_s1 + $0x308] sm:$0xff] }
0x12ad   :  { %v1858_v21 = vmul.f32 1.442695, %v1855_v19 }
0x12ae   :  { %v1851_v24 = vpop.xlane.xlu1 %1850 }
0x12af   :  { %3988 = vpow2.f32 %v1858_v21  ;;  %v1856_v25 = vsub.f32 %v1843_v52, %v1851_v24  ;;  %v1612_v21 = vld [vmem:[%s5379_s1 + $0x310] sm:$0xff] }
0x12b0   :  { %v3803_v24 = vpack.c.bf16 %v1612_v21, %v1611_v18 }
0x12b1   :  { %v1860_v27 = vmul.f32 1.442695, %v1856_v25  ;;  %v1613_v25 = vld [vmem:[%s5379_s1 + $0x318] sm:$0xff] }
0x12b2   :  { %v1854_v29 = vpop.xlane.xlu0 %1853 }
0x12b3   :  { %3990 = vpow2.f32 %v1860_v27  ;;  %v1857_v30 = vsub.f32 %v1844_v60, %v1854_v29  ;;  %v1614_v27 = vld [vmem:[%s5379_s1 + $0x320] sm:$0xff] }
0x12b4   :  { %v3806_v29 = vpack.c.bf16 %v1614_v27, %v1613_v25 }
0x12b5   :  { %v1862_v31 = vmul.f32 1.442695, %v1857_v30  ;;  %v1615_v30 = vld [vmem:[%s5379_s1 + $0x328] sm:$0xff] }
0x12b6   :  { %v2080_v32 = vpop.xlane.xlu0 %2079 }
0x12b7   :  { %3992 = vpow2.f32 %v1862_v31  ;;  %v2087_v33 = vsub.f32 %v2075_v10, %v2080_v32  ;;  %v1616_v31 = vld [vmem:[%s5379_s1 + $0x330] sm:$0xff] }
0x12b8   :  { %v3809_v32 = vpack.c.bf16 %v1616_v31, %v1615_v30  ;;  %v2379_v30 = vld [vmem:[%s5380_s2 + $0x198] sm:$0xff]  ;;  %v2381_v31 = vld [vmem:[%s5380_s2 + $0x1a8] sm:$0xff] }
0x12b9   :  { %v3989_v37 = vpop.eup %3988  ;;  %v2090_v38 = vmul.f32 1.442695, %v2087_v33 }
0x12ba   :  { %v2083_v39 = vpop.xlane.xlu0 %2082  ;;  %v1864_v54 = vsel %vm1845_vm11, %v3989_v37, 0.0 }
0x12bb   :  { %3994 = vpow2.f32 %v2090_v38  ;;  %v2088_v26 = vsub.f32 %v2076_v13, %v2083_v39  ;;  %1865 = vadd.xlane.f32.xlu0 %v1864_v54 }
0x12bd   :  { %v3991_v61 = vpop.eup %3990  ;;  %v2092_v8 = vmul.f32 1.442695, %v2088_v26 }
0x12be   :  { %v2086_v63 = vpop.xlane.xlu1 %2085  ;;  %v1867_v42 = vsel %vm1845_vm11, %v3991_v61, 0.0 }
0x12bf   :  { %3996 = vpow2.f32 %v2092_v8  ;;  %v2089_v43 = vsub.f32 %v2077_v22, %v2086_v63  ;;  %1868 = vadd.xlane.f32.xlu1 %v1867_v42  ;;  %v1609_v22 = vld [vmem:[%s5379_s1 + $0x2f8] sm:$0xff] }
0x12c0   :  { %v3800_v19 = vpack.c.bf16 %v1610_v23, %v1609_v22 }
0x12c1   :  { %v3993_v44 = vpop.eup %3992  ;;  %v2094_v45 = vmul.f32 1.442695, %v2089_v43 }
0x12c2   :  { %v1870_v46 = vsel %vm1845_vm11, %v3993_v44, 0.0  ;;  %3801 = vmatpush3.bf16.msra.mxu0 %v3800_v19 }
0x12c3   :  { %3998 = vpow2.f32 %v2094_v45  ;;  %1871 = vadd.xlane.f32.xlu0 %v1870_v46  ;;  %3802 = vmatprep.subr.bf16.mxu0 %v4079_v3 }
0x12c5   :  { %v3995_v47 = vpop.eup %3994 }
0x12c6   :  { %v2096_v48 = vsel %vm1845_vm11, %v3995_v47, 0.0  ;;  %3804 = vmatpush3.bf16.msra.mxu0 %v3803_v24 }
0x12c7   :  { %2097 = vadd.xlane.f32.xlu1 %v2096_v48  ;;  %3805 = vmatprep.subr.bf16.mxu0 %v4079_v3 }
0x12c9   :  { %v3997_v49 = vpop.eup %3996 }
0x12ca   :  { %v2099_v51 = vsel %vm1845_vm11, %v3997_v49, 0.0  ;;  %3807 = vmatpush3.bf16.msra.mxu0 %v3806_v29 }
0x12cb   :  { %2100 = vadd.xlane.f32.xlu0 %v2099_v51  ;;  %3808 = vmatprep.subr.bf16.mxu0 %v4079_v3 }
0x12cd   :  { %v3999_v52 = vpop.eup %3998 }
0x12ce   :  { %v2102_v53 = vsel %vm1845_vm11, %v3999_v52, 0.0  ;;  %3810 = vmatpush3.bf16.msra.mxu0 %v3809_v32  ;;  %v3811_v32 = vpack.c.bf16 %v2381_v31, %v2379_v30  ;;  %v2414_v30 = vld [vmem:[%s5379_s1 + $0x3e0] sm:$0xff]  ;;  %v2415_v31 = vld [vmem:[%s5379_s1 + $0x3e8] sm:$0xff] }
0x12cf   :  { %2103 = vadd.xlane.f32.xlu1 %v2102_v53 }
0x12e0   :  { %2118 = vrot.lane.b32.xlu1 %v4730_v7, %s4083_s20 }
0x12e1   :  { %3932 = vrot.lane.b32.xlu0 %v3931_v1, %s4083_s20 }
0x1348   :  { %v1866_v58 = vpop.xlane.xlu0 %1865 }
0x1349   :  { %4000 = vrcp.f32 %v1866_v58 }
0x134c   :  { %v1869_v56 = vpop.xlane.xlu1 %1868 }
0x134d   :  { %4002 = vrcp.f32 %v1869_v56 }
0x1350   :  { %v1872_v57 = vpop.xlane.xlu0 %1871 }
0x1351   :  { %4004 = vrcp.f32 %v1872_v57  ;;  %v4052_v57 = vld [vmem:[%s5379_s1 + $0x2a0] sm:$0xff] }
0x1353   :  { %v4001_v28 = vpop.eup %4000 }
0x1354   :  { %v1876_v60 = vmul.f32 %v4001_v28, %v3989_v37  ;;  %v2098_v62 = vpop.xlane.xlu1 %2097 }
0x1355   :  { %4006 = vrcp.f32 %v2098_v62 }
0x1356   :  { %3521 = vmatmul.mubr.msk.f32.vlgmr.msra.gmra.mrb[26].mxu1 %vm1845_vm11, %v1876_v60 }
0x1357   :  { %v4003_v0 = vpop.eup %4002  ;;  %3523 = vmatprep.mubr.msk.f32.mxu1 %vm4085_vm10, %v4080_v50 }
0x1358   :  { %v2101_v7 = vpop.xlane.xlu0 %2100  ;;  %v1877_v35 = vmul.f32 %v4003_v0, %v3991_v61 }
0x1359   :  { %4008 = vrcp.f32 %v2101_v7 }
0x135a   :  { %3524 = vmatmul.mubr.msk.f32.gmra.mrb[28].mxu1 %vm1845_vm11, %v1877_v35  ;;  %v4053_v35 = vld [vmem:[%s5379_s1 + $0x2a8] sm:$0xff] }
0x135b   :  { %v4005_v59 = vpop.eup %4004  ;;  %3526 = vmatprep.mubr.msk.f32.mxu1 %vm4085_vm10, %v4080_v50 }
0x135c   :  { %v3933_v34 = vpop.permute.xlu0 %3932  ;;  %v2104_v1 = vpop.xlane.xlu1 %2103  ;;  %v1878_v36 = vmul.f32 %v4005_v59, %v3993_v44 }
0x135d   :  { %v3935_v10 = vunpack.i.h.bf16 %v3933_v34  ;;  %v3934_v5 = vunpack.i.l.bf16 %v3933_v34  ;;  %4010 = vrcp.f32 %v2104_v1 }
0x135e   :  { %3527 = vmatmul.mubr.msk.f32.gmra.mrb[30].mxu1 %vm1845_vm11, %v1878_v36 }
0x135f   :  { %v3797_v6 = vpack.c.bf16 %v3935_v10, %v3934_v5  ;;  %3550 = vmatprep.mubr.msk.f32.mxu1 %vm4085_vm10, %v4080_v50  ;;  %v4007_v11 = vpop.eup %4006  ;;  %v4054_v5 = vld [vmem:[%s5379_s1 + $0x2b0] sm:$0xff] }
0x1360   :  { %v2108_v12 = vmul.f32 %v4007_v11, %v3995_v47  ;;  %v2119_v13 = vpop.permute.xlu1 %2118 }
0x1361   :  { %3798 = vmatpush3.bf16.msra.mxu1 %v3797_v6 }
0x1362   :  { %3548 = vmatprep.subr.mxu1 %v4080_v50 }
0x1363   :  { %v4009_v15 = vpop.eup %4008 }
0x1364   :  { %v2109_v16 = vmul.f32 %v4009_v15, %v3997_v49 }
0x1365   :  { %3549 = vmatpush3.msra.mxu1 %v2119_v13 }
0x1366   :  { %3551 = vmatmul.mubr.msk.f32.vlgmr.msra.gmra.mrb[32].mxu1 %vm1845_vm11, %v2108_v12  ;;  %3812 = vmatprep.subr.bf16.mxu1 %v3811_v32  ;;  %v3831_v32 = vpack.c.bf16 %v2415_v31, %v2414_v30 }
0x1367   :  { %3553 = vmatprep.mubr.msk.f32.mxu1 %vm4085_vm10, %v4080_v50  ;;  %v4011_v17 = vpop.eup %4010 }
0x1368   :  { %v2110_v20 = vmul.f32 %v4011_v17, %v3999_v52  ;;  %v3267_v52 = vld [vmem:[%s5379_s1 + $0x338] ss:$0 sm:$0xff] }
0x136a   :  { %3554 = vmatmul.mubr.msk.f32.gmra.mrb[34].mxu1 %vm1845_vm11, %v2109_v16 }
0x136b   :  { %3556 = vmatprep.mubr.msk.f32.mxu1 %vm4085_vm10, %v4080_v50 }
0x136e   :  { %3557 = vmatmul.mubr.msk.f32.gmra.mrb[36].mxu1 %vm1845_vm11, %v2110_v20 }
0x136f   :  { %2513 = vmatprep.mubr.f32.mxu1 %v4080_v50 }
0x1429   :  { %v1954_v33 = vpop.f32.mrb[26].mxu1 }
0x142a   :  { %v3522_v37 = vpop.f32.mrb[27].mxu1 }
0x142b   :  { %v2380_v37 = vld [vmem:[%s5380_s2 + $0x1a0] sm:$0xff] }
0x142d   :  { %v1959_v38 = vpop.f32.mrb[28].mxu1 }
0x142e   :  { %v3525_v39 = vpop.f32.mrb[29].mxu1 }
0x142f   :  { %v2383_v39 = vld [vmem:[%s5380_s2 + $0x1b8] sm:$0xff] }
0x1431   :  { %v1964_v54 = vpop.f32.mrb[30].mxu1 }
0x1432   :  { %v3528_v26 = vpop.f32.mrb[31].mxu1 }
0x1439   :  { %v2198_v61 = vpop.f32.mrb[32].mxu1 }
0x143a   :  { %2215 = vrot.lane.b32.xlu1 %v2198_v61, %s4084_s0  ;;  %v3552_v8 = vpop.f32.mrb[33].mxu1  ;;  %v2382_v61 = vld [vmem:[%s5380_s2 + $0x1b0] sm:$0xff] }
0x143b   :  { %v2384_v8 = vld [vmem:[%s5380_s2 + $0x1c0] sm:$0xff] }
0x143d   :  { %v2203_v63 = vpop.f32.mrb[34].mxu1 }
0x143e   :  { %2217 = vrot.lane.b32.xlu1 %v2203_v63, %s4084_s0  ;;  %v3555_v42 = vpop.f32.mrb[35].mxu1  ;;  %v3817_v63 = vpack.c.bf16 %v2384_v8, %v2382_v61  ;;  %v2400_v61 = vld [vmem:[%s5379_s1 + $0x370] sm:$0xff]  ;;  %v2401_v8 = vld [vmem:[%s5379_s1 + $0x378] sm:$0xff] }
0x143f   :  { %v2387_v42 = vld [vmem:[%s5380_s2 + $0x1d8] sm:$0xff] }
0x1441   :  { %v2208_v43 = vpop.f32.mrb[36].mxu1 }
0x1442   :  { %2219 = vrot.lane.b32.xlu0 %v2208_v43, %s4084_s0  ;;  %v3558_v44 = vpop.f32.mrb[37].mxu1  ;;  %v2389_v43 = vld [vmem:[%s5380_s2 + $0x1e8] sm:$0xff] }
0x1443   :  { %v3819_v44 = vpack.c.bf16 %v2389_v43, %v2387_v42  ;;  %v2418_v42 = vld [vmem:[%s5379_s1 + $0x400] sm:$0xff]  ;;  %v2419_v43 = vld [vmem:[%s5379_s1 + $0x408] sm:$0xff] }
0x14ac   :  { %v2216_v45 = vpop.permute.xlu1 %2215 }
0x14ad   :  { %v2224_v46 = vsel %vm427_vm3, %v1954_v33, %v2216_v45  ;;  %v2378_v33 = vld [vmem:[%s5380_s2 + $0x190] sm:$0xff] }
0x14ae   :  { %3576 = vmatmul.mubr.msk.f32.vlgmr.msra.gmra.mrb[24].mxu0 %vm44_vm0, %v2224_v46  ;;  %v2386_v45 = vld [vmem:[%s5380_s2 + $0x1d0] sm:$0xff]  ;;  %v2388_v46 = vld [vmem:[%s5380_s2 + $0x1e0] sm:$0xff] }
0x14af   :  { %3578 = vmatprep.mubr.msk.f32.mxu0 %vm4085_vm10, %v4080_v50 }
0x14b0   :  { %v2218_v47 = vpop.permute.xlu1 %2217 }
0x14b1   :  { %v2225_v48 = vsel %vm427_vm3, %v1959_v38, %v2218_v47  ;;  %v3813_v38 = vpack.c.bf16 %v2380_v37, %v2378_v33  ;;  %v3821_v47 = vpack.c.bf16 %v2388_v46, %v2386_v45  ;;  %v2398_v33 = vld [vmem:[%s5379_s1 + $0x360] sm:$0xff]  ;;  %v2399_v37 = vld [vmem:[%s5379_s1 + $0x368] sm:$0xff] }
0x14b2   :  { %3579 = vmatmul.mubr.msk.f32.gmra.mrb[26].mxu0 %vm44_vm0, %v2225_v48  ;;  %v2391_v48 = vld [vmem:[%s5380_s2 + $0x1f8] sm:$0xff]  ;;  %v2402_v45 = vld [vmem:[%s5379_s1 + $0x380] sm:$0xff]  ;;  %v2403_v46 = vld [vmem:[%s5379_s1 + $0x388] sm:$0xff] }
0x14b3   :  { %3581 = vmatprep.mubr.msk.f32.mxu0 %vm4085_vm10, %v4080_v50  ;;  %3814 = vmatpush1.bf16.msra.mxu1 %v3813_v38  ;;  %v3833_v38 = vpack.c.bf16 %v2399_v37, %v2398_v33 }
0x14b4   :  { %v2220_v49 = vpop.permute.xlu0 %2219 }
0x14b5   :  { %v2226_v51 = vsel %vm427_vm3, %v1964_v54, %v2220_v49  ;;  %v2385_v54 = vld [vmem:[%s5380_s2 + $0x1c8] sm:$0xff] }
0x14b6   :  { %3582 = vmatmul.mubr.msk.f32.gmra.mrb[28].mxu0 %vm44_vm0, %v2226_v51  ;;  %v3815_v26 = vpack.c.bf16 %v2385_v54, %v2383_v39  ;;  %v2393_v49 = vld [vmem:[%s5380_s2 + $0x208] sm:$0xff]  ;;  %v2416_v39 = vld [vmem:[%s5379_s1 + $0x3f0] sm:$0xff]  ;;  %v2417_v54 = vld [vmem:[%s5379_s1 + $0x3f8] sm:$0xff] }
0x14b7   :  { %v3823_v51 = vpack.c.bf16 %v2393_v49, %v2391_v48  ;;  %v2420_v48 = vld [vmem:[%s5379_s1 + $0x410] sm:$0xff]  ;;  %v2421_v49 = vld [vmem:[%s5379_s1 + $0x418] sm:$0xff] }
0x14b8   :  { %3816 = vmatprep.subr.bf16.mxu1 %v3815_v26  ;;  %v3835_v26 = vpack.c.bf16 %v2417_v54, %v2416_v39 }
0x14b9   :  { %3818 = vmatpush1.bf16.msra.mxu1 %v3817_v63  ;;  %v3837_v63 = vpack.c.bf16 %v2401_v8, %v2400_v61 }
0x14ba   :  { %3820 = vmatprep.subr.bf16.mxu1 %v3819_v44  ;;  %v3839_v44 = vpack.c.bf16 %v2419_v43, %v2418_v42 }
0x14bd   :  { %3822 = vmatpush1.bf16.msra.mxu1 %v3821_v47  ;;  %v3841_v47 = vpack.c.bf16 %v2403_v46, %v2402_v45 }
0x14be   :  { %3824 = vmatprep.subr.bf16.mxu1 %v3823_v51  ;;  %v3843_v51 = vpack.c.bf16 %v2421_v49, %v2420_v48 }
0x1581   :  { %v2306_v53 = vpop.f32.mrb[24].mxu0 }
0x1582   :  { %v2307_v58 = vadd.f32 %v3267_v52, %v2306_v53  ;;  %v3577_v56 = vpop.f32.mrb[25].mxu0  ;;  %v2392_v53 = vld [vmem:[%s5380_s2 + $0x200] sm:$0xff] }
0x1584   :  { %v4989_v28 = vadd.f32 %v4052_v57, %v2307_v58 }
0x1585   :  { %v2311_v60 = vpop.f32.mrb[26].mxu0 }
0x1586   :  { %v2312_v62 = vadd.f32 %v3267_v52, %v2311_v60  ;;  %v3580_v0 = vpop.f32.mrb[27].mxu0  ;;  %v2325_v7 = vsel %vm44_vm0, %v4989_v28, 0.0 }
0x1587   :  { %2326 = vadd.xlane.f32.xlu1 %v2325_v7 }
0x1588   :  { %v4996_v59 = vadd.f32 %v4053_v35, %v2312_v62 }
0x1589   :  { %v2316_v34 = vpop.f32.mrb[28].mxu0 }
0x158a   :  { %v2317_v1 = vadd.f32 %v3267_v52, %v2316_v34  ;;  %v3583_v36 = vpop.f32.mrb[29].mxu0  ;;  %v2328_v10 = vsel %vm44_vm0, %v4996_v59, 0.0  ;;  %v2390_v52 = vld [vmem:[%s5380_s2 + $0x1f0] sm:$0xff] }
0x158b   :  { %2329 = vadd.xlane.f32.xlu0 %v2328_v10  ;;  %v3825_v58 = vpack.c.bf16 %v2392_v53, %v2390_v52  ;;  %v3271_v10 = vld [vmem:[%s5379_s1 + $0x340] ss:$0 sm:$0xff]  ;;  %v2404_v52 = vld [vmem:[%s5379_s1 + $0x390] sm:$0xff]  ;;  %v2405_v53 = vld [vmem:[%s5379_s1 + $0x398] sm:$0xff] }
0x158c   :  { %v5003_v6 = vadd.f32 %v4054_v5, %v2317_v1 }
0x158d   :  { %3826 = vmatpush1.bf16.msra.mxu1 %v3825_v58  ;;  %v3845_v58 = vpack.c.bf16 %v2405_v53, %v2404_v52 }
0x158e   :  { %v2331_v11 = vsel %vm44_vm0, %v5003_v6, 0.0  ;;  %3859 = vmatprep.subr.bf16.mxu1 %v4079_v3  ;;  %v3272_v3 = vld [vmem:[%s5379_s1 + $0x348] ss:$0 sm:$0xff] }
0x158f   :  { %2332 = vadd.xlane.f32.xlu0 %v2331_v11 }
0x1614   :  { %v2327_v12 = vpop.xlane.xlu1 %2326 }
0x1615   :  { %v2334_v13 = vmul.f32 0.015625, %v2327_v12 }
0x1617   :  { %v5008_v15 = vsub.f32 %v4989_v28, %v2334_v13 }
0x1618   :  { %v2330_v16 = vpop.xlane.xlu0 %2329 }
0x1619   :  { %v2335_v17 = vmul.f32 0.015625, %v2330_v16  ;;  %v2340_v20 = vmul.f32 %v5008_v15, %v5008_v15 }
0x161b   :  { %v5013_v22 = vsub.f32 %v4996_v59, %v2335_v17  ;;  %v2343_v23 = vsel %vm44_vm0, %v2340_v20, 0.0 }
0x161c   :  { %2344 = vadd.xlane.f32.xlu0 %v2343_v23  ;;  %v2333_v18 = vpop.xlane.xlu0 %2332 }
0x161d   :  { %v2336_v19 = vmul.f32 0.015625, %v2333_v18  ;;  %v2341_v21 = vmul.f32 %v5013_v22, %v5013_v22 }
0x161f   :  { %v5019_v24 = vsub.f32 %v5003_v6, %v2336_v19  ;;  %v2346_v25 = vsel %vm44_vm0, %v2341_v21, 0.0  ;;  %v2413_v21 = vld [vmem:[%s5379_s1 + $0x3d8] sm:$0xff] }
0x1620   :  { %2347 = vadd.xlane.f32.xlu1 %v2346_v25  ;;  %v2396_v25 = vld [vmem:[%s5379_s1 + $0x350] sm:$0xff] }
0x1621   :  { %v2342_v27 = vmul.f32 %v5019_v24, %v5019_v24 }
0x1623   :  { %v2349_v29 = vsel %vm44_vm0, %v2342_v27, 0.0  ;;  %v2397_v27 = vld [vmem:[%s5379_s1 + $0x358] sm:$0xff] }
0x1624   :  { %2350 = vadd.xlane.f32.xlu0 %v2349_v29  ;;  %v3829_v29 = vpack.c.bf16 %v2397_v27, %v2396_v25 }
0x16a9   :  { %v2345_v56 = vpop.xlane.xlu0 %2344 }
0x16aa   :  { %v2352_v57 = vmul.f32 0.015625, %v2345_v56  ;;  %v2422_v56 = vld [vmem:[%s5379_s1 + $0x420] sm:$0xff] }
0x16ac   :  { %v2355_v60 = vadd.f32 1e-05, %v2352_v57  ;;  %v2423_v57 = vld [vmem:[%s5379_s1 + $0x428] sm:$0xff] }
0x16ad   :  { %v2348_v62 = vpop.xlane.xlu1 %2347 }
0x16ae   :  { %4012 = vrsqrt.f32 %v2355_v60  ;;  %v2353_v0 = vmul.f32 0.015625, %v2348_v62  ;;  %v3847_v60 = vpack.c.bf16 %v2423_v57, %v2422_v56  ;;  %v2406_v62 = vld [vmem:[%s5379_s1 + $0x3a0] sm:$0xff] }
0x16b0   :  { %v2356_v7 = vadd.f32 1e-05, %v2353_v0  ;;  %v2407_v0 = vld [vmem:[%s5379_s1 + $0x3a8] sm:$0xff] }
0x16b1   :  { %v2351_v35 = vpop.xlane.xlu0 %2350 }
0x16b2   :  { %4014 = vrsqrt.f32 %v2356_v7  ;;  %v2354_v34 = vmul.f32 0.015625, %v2351_v35  ;;  %v3849_v7 = vpack.c.bf16 %v2407_v0, %v2406_v62  ;;  %v2424_v35 = vld [vmem:[%s5379_s1 + $0x430] sm:$0xff] }
0x16b4   :  { %v2357_v1 = vadd.f32 1e-05, %v2354_v34  ;;  %v2425_v34 = vld [vmem:[%s5379_s1 + $0x438] sm:$0xff] }
0x16b6   :  { %4016 = vrsqrt.f32 %v2357_v1  ;;  %v3851_v1 = vpack.c.bf16 %v2425_v34, %v2424_v35 }
0x16b8   :  { %v4013_v36 = vpop.eup %4012 }
0x16b9   :  { %v2361_v5 = vmul.f32 %v4013_v36, %v5008_v15  ;;  %v2408_v36 = vld [vmem:[%s5379_s1 + $0x3b0] sm:$0xff] }
0x16bb   :  { %v2368_v11 = vmul.f32 %v3271_v10, %v2361_v5 }
0x16bc   :  { %v4015_v12 = vpop.eup %4014 }
0x16bd   :  { %v2375_v13 = vadd.f32 %v3272_v3, %v2368_v11  ;;  %v2362_v16 = vmul.f32 %v4015_v12, %v5013_v22  ;;  %v2412_v22 = vld [vmem:[%s5379_s1 + $0x3d0] sm:$0xff]  ;;  %v2427_v11 = vld [vmem:[%s5379_s1 + $0x448] sm:$0xff] }
0x16bf   :  { %3274 = vmatmul.mubr.msk.f32.vlgmr.msra.gmra.mrb[38].mxu1 %vm44_vm0, %v2375_v13  ;;  %v2369_v17 = vmul.f32 %v3271_v10, %v2362_v16  ;;  %v2410_v13 = vld [vmem:[%s5379_s1 + $0x3c0] sm:$0xff]  ;;  %v2411_v16 = vld [vmem:[%s5379_s1 + $0x3c8] sm:$0xff] }
0x16c0   :  { %v4017_v20 = vpop.eup %4016  ;;  %2519 = vmatprep.mubr.f32.mxu1 %v4080_v50 }
0x16c1   :  { %v2376_v23 = vadd.f32 %v3272_v3, %v2369_v17  ;;  %v2363_v18 = vmul.f32 %v4017_v20, %v5019_v24  ;;  %v3827_v24 = vpack.c.bf16 %v2413_v21, %v2412_v22  ;;  %v3857_v17 = vpack.c.bf16 %v2411_v16, %v2410_v13  ;;  %v3273_v20 = vld [vmem:[%s5380_s2 + $0x210] ss:$8 sm:$0x3] }
0x16c3   :  { %3275 = vmatmul.mubr.msk.f32.gmra.mrb[40].mxu1 %vm44_vm0, %v2376_v23  ;;  %v2370_v15 = vmul.f32 %v3271_v10, %v2363_v18  ;;  %3828 = vmatprep.subr.bf16.mxu0 %v3827_v24  ;;  %v2409_v10 = vld [vmem:[%s5379_s1 + $0x3b8] sm:$0xff]  ;;  %v2433_v23 = vrot.slane %v3273_v20, %v4620_v2  ;;  %v2437_v18 = vrot.slane %v3273_v20, %v4626_v4 }
0x16c4   :  { %2525 = vmatprep.mubr.f32.mxu1 %v4080_v50  ;;  %3830 = vmatpush3.bf16.msra.mxu0 %v3829_v29  ;;  %v3853_v5 = vpack.c.bf16 %v2409_v10, %v2408_v36 }
0x16c5   :  { %v2377_v19 = vadd.f32 %v3272_v3, %v2370_v15  ;;  %3832 = vmatprep.subr.bf16.mxu0 %v3831_v32  ;;  %v2426_v3 = vld [vmem:[%s5379_s1 + $0x440] sm:$0xff] }
0x16c6   :  { %v3855_v12 = vpack.c.bf16 %v2427_v11, %v2426_v3 }
0x16c7   :  { %3276 = vmatmul.mubr.msk.f32.gmra.mrb[42].mxu1 %vm44_vm0, %v2377_v19 }
0x16c8   :  { %3590 = vmatprep.mubr.msk.f32.mxu1 %vm4085_vm10, %v4080_v50  ;;  %3834 = vmatpush3.bf16.msra.mxu0 %v3833_v38 }
0x16c9   :  { %3836 = vmatprep.subr.bf16.mxu0 %v3835_v26 }
0x16cc   :  { %3838 = vmatpush3.bf16.msra.mxu0 %v3837_v63 }
0x16cd   :  { %3840 = vmatprep.subr.bf16.mxu0 %v3839_v44 }
0x16d0   :  { %3842 = vmatpush3.bf16.msra.mxu0 %v3841_v47 }
0x16d1   :  { %3844 = vmatprep.subr.bf16.mxu0 %v3843_v51 }
0x16d4   :  { %3846 = vmatpush3.bf16.msra.mxu0 %v3845_v58 }
0x16d5   :  { %3848 = vmatprep.subr.bf16.mxu0 %v3847_v60 }
0x16d8   :  { %3850 = vmatpush3.bf16.msra.mxu0 %v3849_v7 }
0x16d9   :  { %3852 = vmatprep.subr.bf16.mxu0 %v3851_v1 }
0x16dc   :  { %3854 = vmatpush3.bf16.msra.mxu0 %v3853_v5 }
0x16dd   :  { %3856 = vmatprep.subr.bf16.mxu0 %v3855_v12 }
0x16e0   :  { %3858 = vmatpush3.bf16.msra.mxu0 %v3857_v17  ;;  %v3283_v17 = vld [vmem:[%s5379_s1 + $0x450] ss:$0 sm:$0xff] }
0x1792   :  { %v2515_v15 = vpop.f32.mrb[38].mxu1 }
0x1793   :  { %v2516_v19 = vadd.f32 %v2515_v15, %v2433_v23  ;;  %v2517_v22 = vpop.f32.mrb[39].mxu1 }
0x1794   :  { %v2518_v21 = vadd.f32 %v2517_v22, %v2437_v18 }
0x1795   :  { %v3277_v24 = vmul.f32 -1.702, %v2516_v19 }
0x1796   :  { %v3278_v25 = vmul.f32 -1.702, %v2518_v21  ;;  %v2521_v27 = vpop.f32.mrb[40].mxu1 }
0x1797   :  { %v2544_v29 = vmul.f32 1.442695, %v3277_v24  ;;  %v2522_v30 = vadd.f32 %v2521_v27, %v2433_v23  ;;  %v2523_v31 = vpop.f32.mrb[41].mxu1 }
0x1798   :  { %v2546_v32 = vmul.f32 1.442695, %v3278_v25  ;;  %v2524_v33 = vadd.f32 %v2523_v31, %v2437_v18 }
0x1799   :  { %4018 = vpow2.f32 %v2544_v29  ;;  %v3279_v37 = vmul.f32 -1.702, %v2522_v30 }
0x179a   :  { %4020 = vpow2.f32 %v2546_v32  ;;  %v3280_v38 = vmul.f32 -1.702, %v2524_v33  ;;  %v2527_v39 = vpop.f32.mrb[42].mxu1 }
0x179b   :  { %v2548_v54 = vmul.f32 1.442695, %v3279_v37  ;;  %v2528_v26 = vadd.f32 %v2527_v39, %v2433_v23  ;;  %v2529_v61 = vpop.f32.mrb[43].mxu1  ;;  %v1374_v39 = vsub.s32 2, %v4617_v14 }
0x179c   :  { %v2550_v8 = vmul.f32 1.442695, %v3280_v38  ;;  %v2530_v63 = vadd.f32 %v2529_v61, %v2437_v18  ;;  %v1378_v61 = vsub.s32 3, %v4617_v14 }
0x179d   :  { %4022 = vpow2.f32 %v2548_v54  ;;  %v3281_v42 = vmul.f32 -1.702, %v2528_v26 }
0x179e   :  { %4024 = vpow2.f32 %v2550_v8  ;;  %v3282_v43 = vmul.f32 -1.702, %v2530_v63 }
0x179f   :  { %v2552_v44 = vmul.f32 1.442695, %v3281_v42 }
0x17a0   :  { %v2554_v45 = vmul.f32 1.442695, %v3282_v43 }
0x17a1   :  { %4026 = vpow2.f32 %v2552_v44 }
0x17a2   :  { %4028 = vpow2.f32 %v2554_v45 }
0x17a3   :  { %v4019_v46 = vpop.eup %4018 }
0x17a4   :  { %v4021_v47 = vpop.eup %4020  ;;  %v2556_v48 = vadd.f32 1.0, %v4019_v46 }
0x17a5   :  { %v2557_v49 = vadd.f32 1.0, %v4021_v47 }
0x17a6   :  { %4030 = vrcp.f32 %v2556_v48 }
0x17a7   :  { %v4023_v51 = vpop.eup %4022  ;;  %4032 = vrcp.f32 %v2557_v49 }
0x17a8   :  { %v4025_v52 = vpop.eup %4024  ;;  %v2558_v53 = vadd.f32 1.0, %v4023_v51 }
0x17a9   :  { %v2559_v58 = vadd.f32 1.0, %v4025_v52 }
0x17aa   :  { %4034 = vrcp.f32 %v2558_v53 }
0x17ab   :  { %v4027_v56 = vpop.eup %4026  ;;  %4036 = vrcp.f32 %v2559_v58 }
0x17ac   :  { %v4029_v57 = vpop.eup %4028  ;;  %v2560_v60 = vadd.f32 1.0, %v4027_v56 }
0x17ad   :  { %v2561_v62 = vadd.f32 1.0, %v4029_v57 }
0x17ae   :  { %4038 = vrcp.f32 %v2560_v60 }
0x17af   :  { %4040 = vrcp.f32 %v2561_v62 }
0x17b0   :  { %v4031_v0 = vpop.eup %4030 }
0x17b1   :  { %v4033_v7 = vpop.eup %4032  ;;  %v2574_v34 = vmul.f32 %v4031_v0, %v2516_v19 }
0x17b2   :  { %v2575_v35 = vmul.f32 %v4033_v7, %v2518_v21 }
0x17b4   :  { %v4035_v1 = vpop.eup %4034  ;;  %2648 = vmatprep.mubr.f32.mxu0 %v2575_v35 }
0x17b5   :  { %v4037_v36 = vpop.eup %4036  ;;  %2649 = vmatmul.mubr.f32.vlgmr.msra.gmra.mrb[30].mxu0 %v2574_v34  ;;  %v2576_v5 = vmul.f32 %v4035_v1, %v2522_v30 }
0x17b6   :  { %v2577_v10 = vmul.f32 %v4037_v36, %v2524_v33 }
0x17b8   :  { %v4039_v3 = vpop.eup %4038  ;;  %2653 = vmatprep.mubr.f32.mxu0 %v2577_v10 }
0x17b9   :  { %v4041_v11 = vpop.eup %4040  ;;  %2654 = vmatmul.mubr.f32.gmra.mrb[32].mxu0 %v2576_v5  ;;  %v2578_v13 = vmul.f32 %v4039_v3, %v2528_v26 }
0x17ba   :  { %v2579_v12 = vmul.f32 %v4041_v11, %v2530_v63 }
0x17bc   :  { %2658 = vmatprep.mubr.f32.mxu0 %v2579_v12 }
0x17bd   :  { %2659 = vmatmul.mubr.f32.gmra.mrb[34].mxu0 %v2578_v13 }
0x1888   :  { %v3427_v16 = vpop.f32.mrb[30].mxu0 }
0x1889   :  { %v3428_v20 = vpop.f32.mrb[31].mxu0 }
0x188a   :  { %v3429_v23 = vadd.f32 %v3428_v20, %v3427_v16 }
0x188c   :  { %v2651_v18 = vadd.f32 %v3429_v23, %v3283_v17  ;;  %v3430_v15 = vpop.f32.mrb[32].mxu0 }
0x188d   :  { %v3431_v19 = vpop.f32.mrb[33].mxu0 }
0x188e   :  { %v3432_v22 = vadd.f32 %v3431_v19, %v3430_v15  ;;  %v2664_v21 = vadd.f32 %v2651_v18, %v4989_v28  ;;  %v3238_v28 = vld [vmem:[%s5381_s3 + $0x100] ss:$8 sm:$0xf] }
0x188f   :  { %v1367_v54 = vrot.slane %v3238_v28, %v4620_v2  ;;  %v1371_v26 = vrot.slane %v3238_v28, %v4626_v4  ;;  %v1379_v44 = vrot.slane %v3238_v28, %v1378_v61 }
0x1890   :  { %v2656_v24 = vadd.f32 %v3432_v22, %v3283_v17  ;;  %v3433_v25 = vpop.f32.mrb[34].mxu0  ;;  %v2669_v27 = vsel %vm44_vm0, %v2664_v21, 0.0 }
0x1891   :  { %v3434_v29 = vpop.f32.mrb[35].mxu0  ;;  %2670 = vadd.xlane.f32.xlu1 %v2669_v27  ;;  %v1456_v63 = vadd.f32 %v4892_v55, %v1371_v26  ;;  %v5223_v55 = vadd.f32 %v4896_v41, %v1379_v44  ;;  %v2800_v44 = vld [vmem:[%s5381_s3 + $0x140] sm:$0xff] }
0x1892   :  { %v3435_v30 = vadd.f32 %v3434_v29, %v3433_v25  ;;  %v2665_v31 = vadd.f32 %v2656_v24, %v4996_v59  ;;  %v1375_v59 = vrot.slane %v3238_v28, %v1374_v39  ;;  %v3285_v29 = vld [vmem:[%s5379_s1 + $0x468] ss:$0 sm:$0xff] }
0x1893   :  { %v2997_v48 = vmul.f32 %v1456_v63, %v1456_v63  ;;  %v2999_v62 = vmul.f32 %v5223_v55, %v5223_v55 }
0x1894   :  { %v2661_v32 = vadd.f32 %v3435_v30, %v3283_v17  ;;  %v2672_v33 = vsel %vm44_vm0, %v2665_v31, 0.0  ;;  %v5214_v43 = vadd.f32 %v4894_v40, %v1375_v59  ;;  %v2797_v59 = vld [vmem:[%s5381_s3 + $0x128] sm:$0xff] }
0x1895   :  { %2673 = vadd.xlane.f32.xlu0 %v2672_v33  ;;  %v3001_v56 = vsel %vm547_vm4, %v2997_v48, 0.0  ;;  %v3005_v10 = vsel %vm547_vm4, %v2999_v62, 0.0  ;;  %v2722_v48 = vld [vmem:[%s5379_s1 + $0x458] sm:$0x7]  ;;  %v2821_v62 = vld [vmem:[%s5381_s3 + $0x1e8] sm:$0xff] }
0x1896   :  { %v2666_v37 = vadd.f32 %v2661_v32, %v5003_v6  ;;  %v5210_v6 = vadd.f32 %v4890_v9, %v1367_v54  ;;  %v2998_v9 = vmul.f32 %v5214_v43, %v5214_v43 }
0x1898   :  { %v2675_v38 = vsel %vm44_vm0, %v2666_v37, 0.0  ;;  %v2996_v47 = vmul.f32 %v5210_v6, %v5210_v6  ;;  %v3003_v41 = vsel %vm547_vm4, %v2998_v9, 0.0  ;;  %v2804_v9 = vld [vmem:[%s5381_s3 + $0x160] sm:$0xff] }
0x1899   :  { %2676 = vadd.xlane.f32.xlu1 %v2675_v38 }
0x189a   :  { %v3000_v58 = vsel %vm547_vm4, %v2996_v47, 0.0 }
0x189b   :  { %v3002_v35 = vadd.f32 %v3001_v56, %v3000_v58 }
0x189d   :  { %v3004_v1 = vadd.f32 %v3003_v41, %v3002_v35  ;;  %v2820_v35 = vld [vmem:[%s5381_s3 + $0x1e0] sm:$0xff] }
0x189f   :  { %v3006_v5 = vadd.f32 %v3005_v10, %v3004_v1  ;;  %v2803_v10 = vld [vmem:[%s5381_s3 + $0x158] sm:$0xff] }
0x191e   :  { %v2671_v8 = vpop.xlane.xlu1 %2670 }
0x191f   :  { %v2678_v42 = vmul.f32 0.015625, %v2671_v8  ;;  %v2801_v8 = vld [vmem:[%s5381_s3 + $0x148] sm:$0xff] }
0x1921   :  { %v2681_v45 = vsub.f32 %v2664_v21, %v2678_v42  ;;  %v3284_v21 = vld [vmem:[%s5379_s1 + $0x460] ss:$0 sm:$0xff] }
0x1922   :  { %v2674_v46 = vpop.xlane.xlu0 %2673  ;;  %v2796_v42 = vld [vmem:[%s5381_s3 + $0x120] sm:$0xff] }
0x1923   :  { %v2679_v49 = vmul.f32 0.015625, %v2674_v46  ;;  %v2684_v51 = vmul.f32 %v2681_v45, %v2681_v45  ;;  %v3862_v46 = vpack.c.bf16 %v2801_v8, %v2797_v59 }
0x1925   :  { %v2682_v52 = vsub.f32 %v2665_v31, %v2679_v49  ;;  %v2687_v40 = vsel %vm44_vm0, %v2684_v51, 0.0  ;;  %v3864_v49 = vpack.c.bf16 %v2800_v44, %v2796_v42 }
0x1926   :  { %2688 = vadd.xlane.f32.xlu0 %v2687_v40  ;;  %v2677_v53 = vpop.xlane.xlu1 %2676  ;;  %v2813_v40 = vld [vmem:[%s5381_s3 + $0x1a8] sm:$0xff] }
0x1927   :  { %v2680_v57 = vmul.f32 0.015625, %v2677_v53  ;;  %v2685_v60 = vmul.f32 %v2682_v52, %v2682_v52  ;;  %v2817_v53 = vld [vmem:[%s5381_s3 + $0x1c8] sm:$0xff] }
0x1928   :  { %v3870_v56 = vpack.c.bf16 %v2817_v53, %v2813_v40 }
0x1929   :  { %v2683_v0 = vsub.f32 %v2666_v37, %v2680_v57  ;;  %v2690_v7 = vsel %vm44_vm0, %v2685_v60, 0.0  ;;  %v2812_v57 = vld [vmem:[%s5381_s3 + $0x1a0] sm:$0xff] }
0x192a   :  { %2691 = vadd.xlane.f32.xlu1 %v2690_v7  ;;  %v2816_v60 = vld [vmem:[%s5381_s3 + $0x1c0] sm:$0xff] }
0x192b   :  { %v2686_v34 = vmul.f32 %v2683_v0, %v2683_v0  ;;  %v3872_v7 = vpack.c.bf16 %v2816_v60, %v2812_v57 }
0x192d   :  { %v2693_v36 = vsel %vm44_vm0, %v2686_v34, 0.0  ;;  %v2824_v34 = vld [vmem:[%s5381_s3 + $0x200] sm:$0xff] }
0x192e   :  { %2694 = vadd.xlane.f32.xlu0 %v2693_v36  ;;  %v3876_v1 = vpack.c.bf16 %v2824_v34, %v2820_v35  ;;  %v2799_v36 = vld [vmem:[%s5381_s3 + $0x138] sm:$0xff] }
0x1932   :  { %3007 = vadd.xlane.f32.xlu0 %v3006_v5  ;;  %v3878_v5 = vpack.c.bf16 %v2803_v10, %v2799_v36 }
0x19b3   :  { %v2689_v3 = vpop.xlane.xlu0 %2688 }
0x19b4   :  { %v2696_v11 = vmul.f32 0.015625, %v2689_v3  ;;  %v2798_v3 = vld [vmem:[%s5381_s3 + $0x130] sm:$0xff] }
0x19b6   :  { %v2699_v12 = vadd.f32 1e-05, %v2696_v11  ;;  %v2802_v11 = vld [vmem:[%s5381_s3 + $0x150] sm:$0xff] }
0x19b7   :  { %v2692_v13 = vpop.xlane.xlu1 %2691 }
0x19b8   :  { %4042 = vrsqrt.f32 %v2699_v12  ;;  %v2697_v16 = vmul.f32 0.015625, %v2692_v13  ;;  %v2807_v12 = vld [vmem:[%s5381_s3 + $0x178] sm:$0xff] }
0x19b9   :  { %v2811_v13 = vld [vmem:[%s5381_s3 + $0x198] sm:$0xff] }
0x19ba   :  { %v2700_v17 = vadd.f32 1e-05, %v2697_v16  ;;  %v3880_v16 = vpack.c.bf16 %v2802_v11, %v2798_v3 }
0x19bb   :  { %v2695_v20 = vpop.xlane.xlu0 %2694 }
0x19bc   :  { %4044 = vrsqrt.f32 %v2700_v17  ;;  %v2698_v23 = vmul.f32 0.015625, %v2695_v20  ;;  %v3882_v17 = vpack.c.bf16 %v2811_v13, %v2807_v12  ;;  %v2806_v20 = vld [vmem:[%s5381_s3 + $0x170] sm:$0xff] }
0x19be   :  { %v2701_v18 = vadd.f32 1e-05, %v2698_v23  ;;  %v2810_v23 = vld [vmem:[%s5381_s3 + $0x190] sm:$0xff] }
0x19bf   :  { %v3008_v15 = vpop.xlane.xlu0 %3007 }
0x19c0   :  { %4046 = vrsqrt.f32 %v2701_v18 }
0x19c1   :  { %4048 = vrsqrt.f32 %v3008_v15  ;;  %v2815_v15 = vld [vmem:[%s5381_s3 + $0x1b8] sm:$0xff] }
0x19c2   :  { %v4043_v19 = vpop.eup %4042 }
0x19c3   :  { %v2705_v22 = vmul.f32 %v4043_v19, %v2681_v45  ;;  %v2809_v45 = vld [vmem:[%s5381_s3 + $0x188] sm:$0xff]  ;;  %v2819_v19 = vld [vmem:[%s5381_s3 + $0x1d8] sm:$0xff] }
0x19c5   :  { %v2712_v27 = vmul.f32 %v3284_v21, %v2705_v22 }
0x19c6   :  { %v4045_v24 = vpop.eup %4044 }
0x19c7   :  { %v2706_v25 = vmul.f32 %v4045_v24, %v2682_v52  ;;  %v2719_v33 = vadd.f32 %v3285_v29, %v2712_v27  ;;  %v2808_v52 = vld [vmem:[%s5381_s3 + $0x180] sm:$0xff]  ;;  %v3886_v24 = vpack.c.bf16 %v2819_v19, %v2815_v15  ;;  %v2818_v27 = vld [vmem:[%s5381_s3 + $0x1d0] sm:$0xff] }
0x19c8   :  { %v3868_v58 = vpack.c.bf16 %v2808_v52, %v2804_v9 }
0x19c9   :  { %v2713_v30 = vmul.f32 %v3284_v21, %v2706_v25  ;;  %v2814_v25 = vld [vmem:[%s5381_s3 + $0x1b0] sm:$0xff] }
0x19ca   :  { %v4047_v31 = vpop.eup %4046 }
0x19cb   :  { %v5240_v32 = vpop.eup %4048  ;;  %v2720_v37 = vadd.f32 %v3285_v29, %v2713_v30  ;;  %v2707_v38 = vmul.f32 %v4047_v31, %v2683_v0  ;;  %v2825_v0 = vld [vmem:[%s5381_s3 + $0x208] sm:$0xff]  ;;  %v2827_v30 = vld [vmem:[%s5381_s3 + $0x218] sm:$0xff] }
0x19cc   :  { %v3011_v28 = vmul.f32 %v5240_v32, %v1456_v63  ;;  %v2805_v63 = vld [vmem:[%s5381_s3 + $0x168] sm:$0xff]  ;;  %v3874_v41 = vpack.c.bf16 %v2825_v0, %v2821_v62  ;;  %v3013_v34 = vmul.f32 %v5240_v32, %v5223_v55 }
0x19cd   :  { %v3860_v54 = vpack.c.bf16 %v2720_v37, %v2719_v33  ;;  %v2714_v26 = vmul.f32 %v3284_v21, %v2707_v38  ;;  %v3866_v51 = vpack.c.bf16 %v2809_v45, %v2805_v63  ;;  %v3884_v21 = vpack.c.bf16 %v2810_v23, %v2806_v20  ;;  %v2822_v33 = vld [vmem:[%s5381_s3 + $0x1f0] sm:$0xff] }
0x19ce   :  { %3097 = vmatprep.mubr.f32.mxu0 %v3011_v28  ;;  %v2826_v37 = vld [vmem:[%s5381_s3 + $0x210] sm:$0xff] }
0x19cf   :  { %3861 = vmatpush3.bf16.msra.mxu1 %v3860_v54  ;;  %v2721_v47 = vadd.f32 %v3285_v29, %v2714_v26  ;;  %v2823_v29 = vld [vmem:[%s5381_s3 + $0x1f8] sm:$0xff]  ;;  %v3892_v38 = vpack.c.bf16 %v2826_v37, %v2822_v33 }
0x19d0   :  { %3588 = vmatprep.subr.mxu1 %v4080_v50  ;;  %v3890_v31 = vpack.c.bf16 %v2827_v30, %v2823_v29  ;;  %v3287_v26 = vld [vmem:[%s5381_s3 + $0x220] ss:$8 sm:$0xf] }
0x19d1   :  { %v2834_v59 = vrot.slane %v3287_v26, %v4620_v2  ;;  %v2838_v8 = vrot.slane %v3287_v26, %v4626_v4 }
0x19d3   :  { %3589 = vmatpush3.msra.mxu1 %v2721_v47  ;;  %v2846_v47 = vrot.slane %v3287_v26, %v1378_v61 }
0x19d4   :  { %3591 = vmatmul.mubr.msk.f32.vlgmr.msra.gmra.mrb[44].mxu1 %vm1845_vm11, %v2722_v48  ;;  %3863 = vmatprep.subr.bf16.mxu1 %v3862_v46  ;;  %v2842_v46 = vrot.slane %v3287_v26, %v1374_v39  ;;  %v3173_v39 = vld [vmem:[%s5379_s1 + $0x470] sm:$0x1] }
0x19d5   :  { %3865 = vmatpush1.bf16.msra.mxu1 %v3864_v49  ;;  %2918 = vmatprep.mubr.f32.mxu1 %v4080_v50  ;;  %3896 = vpush %v3173_v39 }
0x19d6   :  { %3867 = vmatprep.subr.bf16.mxu1 %v3866_v51 }
0x19d9   :  { %3869 = vmatpush1.bf16.msra.mxu1 %v3868_v58 }
0x19da   :  { %3871 = vmatprep.subr.bf16.mxu1 %v3870_v56 }
0x19dd   :  { %3873 = vmatpush1.bf16.msra.mxu1 %v3872_v7 }
0x19de   :  { %3875 = vmatprep.subr.bf16.mxu1 %v3874_v41  ;;  %v3010_v41 = vmul.f32 %v5240_v32, %v5210_v6 }
0x19e1   :  { %3877 = vmatpush1.bf16.msra.mxu1 %v3876_v1  ;;  %v3012_v1 = vmul.f32 %v5240_v32, %v5214_v43 }
0x19e2   :  { %3879 = vmatprep.subr.bf16.mxu1 %v3878_v5 }
0x1a06   :  { %s3897_s1 = spop %3896 }
0x1a07   :  { %v3176_v36 = vstv %s3897_s1 }
0x1aa7   :  { %v2792_v18 = vpop.f32.mrb[44].mxu1 }
0x1aa8   :  { %v3592_v22 = vpop.f32.mrb[45].mxu1  ;;  %3288 = vmatmul.mubr.msk.f32.vlgmr.msra.gmra.mrb[46].mxu1 %vm44_vm0, %v2792_v18 }
0x1aa9   :  { %3881 = vmatpush1.bf16.msra.mxu1 %v3880_v16  ;;  %2989 = vmatprep.mubr.f32.mxu1 %v4080_v50  ;;  %v3888_v50 = vpack.c.bf16 %v2818_v27, %v2814_v25 }
0x1aaa   :  { %3883 = vmatprep.subr.bf16.mxu1 %v3882_v17 }
0x1aad   :  { %3885 = vmatpush1.bf16.msra.mxu1 %v3884_v21 }
0x1aae   :  { %3887 = vmatprep.subr.bf16.mxu1 %v3886_v24 }
0x1ab1   :  { %3889 = vmatpush1.bf16.msra.mxu1 %v3888_v50 }
0x1ab2   :  { %3891 = vmatprep.subr.bf16.mxu1 %v3890_v31 }
0x1ab5   :  { %3893 = vmatpush1.bf16.msra.mxu1 %v3892_v38 }
0x1ab8   :  { %3289 = vmatmul.mubr.msk.f32.vlgmr.msra.gmra.mrb[48].mxu1 %vm44_vm0, %v2792_v18 }
0x1b7b   :  { %v2920_v28 = vpop.f32.mrb[46].mxu1 }
0x1b7c   :  { %v2922_v54 = vpop.f32.mrb[47].mxu1  ;;  %v2921_v42 = vadd.f32 %v2920_v28, %v2834_v59 }
0x1b7d   :  { %v2923_v44 = vadd.f32 %v2922_v54, %v2838_v8 }
0x1b7e   :  { %v3014_v63 = vmul.f32 %v2921_v42, %v2921_v42 }
0x1b7f   :  { %v3015_v45 = vmul.f32 %v2923_v44, %v2923_v44 }
0x1b80   :  { %v3019_v49 = vsel %vm3018_vm12, %v3014_v63, 0.0 }
0x1b81   :  { %v3020_v51 = vsel %vm3018_vm12, %v3015_v45, 0.0 }
0x1b82   :  { %v3021_v4 = vadd.f32 %v3020_v51, %v3019_v49 }
0x1b8b   :  { %v2991_v48 = vpop.f32.mrb[48].mxu1 }
0x1b8c   :  { %v2992_v9 = vadd.f32 %v2991_v48, %v2842_v46  ;;  %v2993_v52 = vpop.f32.mrb[49].mxu1 }
0x1b8d   :  { %v2994_v40 = vadd.f32 %v2993_v52, %v2846_v47 }
0x1b8e   :  { %v3016_v2 = vmul.f32 %v2992_v9, %v2992_v9 }
0x1b8f   :  { %v3017_v53 = vmul.f32 %v2994_v40, %v2994_v40 }
0x1b90   :  { %v3022_v58 = vsel %vm3018_vm12, %v3016_v2, 0.0 }
0x1b91   :  { %v3023_v56 = vadd.f32 %v3022_v58, %v3021_v4  ;;  %v3024_v57 = vsel %vm3018_vm12, %v3017_v53, 0.0 }
0x1b93   :  { %v3025_v60 = vadd.f32 %v3024_v57, %v3023_v56 }
0x1b95   :  { %3026 = vadd.xlane.f32.xlu1 %v3025_v60 }
0x1c22   :  { %v3027_v14 = vpop.xlane.xlu1 %3026 }
0x1c23   :  { %4050 = vrsqrt.f32 %v3027_v14 }
0x1c2d   :  { %v4051_v61 = vpop.eup %4050 }
0x1c2e   :  { %v3030_v62 = vmul.f32 %v4051_v61, %v2923_v44  ;;  %v3029_v0 = vmul.f32 %v4051_v61, %v2921_v42  ;;  %v3032_v7 = vmul.f32 %v4051_v61, %v2994_v40  ;;  %v3031_v35 = vmul.f32 %v4051_v61, %v2992_v9 }
0x1c30   :  { %3033 = vmatprep.subr.mxu0 %v3030_v62 }
0x1c31   :  { %3034 = vmatpush1.xpose.msra.mxu0 %v3029_v0 }
0x1c32   :  { %3103 = vmatprep.subr.mxu0 %v3032_v7 }
0x1c34   :  { %3098 = vmatmul.mubr.f32.vlgmr.msra.gmra.mrb[36].mxu0 %v3010_v41 }
0x1c35   :  { %3104 = vmatpush1.xpose.msra.mxu0 %v3031_v35  ;;  %3167 = vmatprep.mubr.f32.mxu0 %v3013_v34 }
0x1c3c   :  { %3168 = vmatmul.mubr.f32.vlgmr.msra.gmra.mrb[36].mxu0 %v3012_v1 }
0x1d0f   :  { %v3169_v10 = vpop.f32.mrb[36].mxu0 }
0x1d10   :  { %v3178_v5 = vmul.f32 %v3176_v36, %v3169_v10  ;;  %v3171_v3 = vpop.f32.mrb[37].mxu0 }
0x1d12   :  { %3180 = vst.msk [vmem:[#allocation2] sm:$0x3] %vm3179_vm13, %v3178_v5 }
0x1d13   :  { %4066 = shalt.err (!%p4063_p4)
}
0x1d14   :  { %s4067_s0 = scalar_lea.hbm %s5382_s4, 32 }
0x1d15   :  { %p4068_p5 = scmp.ne.s32.totalorder %s5382_s4, %s4067_s0  ;;  %p4071_p6 = scmp.lt.u32.totalorder %s4067_s0, %s5382_s4 }
0x1d17   :  { %p4073_p7 = pnand %p4071_p6, %p4068_p5 }
0x1d19   :  { %4076 = shalt.err (!%p4073_p7)
}
0x1d1a   :  { %3190 = dma.vmem_to_hbm [thread:$0]  %s3188_s10, 32, %s5382_s4, [#allocation3]  }
0x1d1b   :  { %4077 = dma.done.wait [#allocation3], 32  }
0x1d1c   :  { %4078 = vsyncadd [#allocation3], 4294967264 }
0x1d1d   :  { %3194 = vsyncpa [#allocation3], 1 }

</bundles_post_ra>
